<compile_context>
chip_gen: v6e
topology: v6e:2x2x1
jax: 0.10.0
libtpu: 0.0.40
codegen_flags: <defaults>
</compile_context>

<pallas_src>
import functools

import jax
import jax.numpy as jnp
from jax.experimental import pallas as pl
from jax.experimental.pallas import tpu as pltpu

EPS = 1e-5


# --------------------------------------------------------------------------
# Pallas kernel
# --------------------------------------------------------------------------
def _film_down_kernel(x_ref, w3_ref, w1_ref, wm_ref, vres_ref, vmain_ref,
                      o_ref, ep_ref, *, c_in, c_out, m, stride, k_main,
                      l_out, padm):
    """One batch element.  Time axis is phase-major: columns [p*m:(p+1)*m] of
    every (C, L) activation hold original time positions p, p+stride, ..."""

    def dot(a, b):  # bf16 x bf16 -> f32 accumulate on the MXU
        return jnp.dot(a, b, preferred_element_type=jnp.float32)

    def load_planes(v_f32):
        # cast once to bf16 and refresh the padded phase planes in VMEM scratch
        vb = v_f32.astype(jnp.bfloat16)
        for p in range(stride):
            ep_ref[p, :, padm:padm + m] = vb[:, p * m:(p + 1) * m]

    def plane(q, f, width=m):
        # plane q, shifted by f samples ('same' zero padding lives in the halo)
        return ep_ref[q, :, padm + f:padm + f + width]

    def conv3(v, blk, d):
        # k=3 dilated 'same' conv, expressed per output phase as 3 matmuls on
        # shifted planes: y[s*mm+p] = sum_t W_t @ x[s*mm + p + (t-1)*d]
        load_planes(v)
        outs = []
        for p in range(stride):
            acc = None
            for t in range(3):
                a = p + (t - 1) * d
                q, f = a % stride, a // stride          # Python floor semantics
                term = dot(w3_ref[blk, t], plane(q, f))
                acc = term if acc is None else acc + term
            outs.append(acc)
        return jnp.concatenate(outs, axis=1)            # (C, stride*m) f32

    def conv1(v, blk):
        return dot(w1_ref[blk], v.astype(jnp.bfloat16))

    def group_norm_elu(v, gamma, beta, ngroups):
        c, lv = v.shape
        gs = c // ngroups
        inv_n = 1.0 / float(gs * lv)
        # one vectorized lane reduction per moment, then tiny per-group folds
        s_c = jnp.sum(v, axis=1, keepdims=True)          # (C, 1)
        q_c = jnp.sum(v * v, axis=1, keepdims=True)      # (C, 1)
        mu_parts, var_parts = [], []
        for g in range(ngroups):
            sg = jnp.sum(s_c[g * gs:(g + 1) * gs], keepdims=True) * inv_n
            qg = jnp.sum(q_c[g * gs:(g + 1) * gs], keepdims=True) * inv_n
            vg = qg - sg * sg                            # biased variance
            mu_parts.append(jnp.broadcast_to(sg, (gs, 1)))
            var_parts.append(jnp.broadcast_to(vg, (gs, 1)))
        mu_c = jnp.concatenate(mu_parts, axis=0)         # (C, 1)
        var_c = jnp.concatenate(var_parts, axis=0)       # (C, 1)
        y = (v - mu_c) * jax.lax.rsqrt(var_c + EPS) * gamma + beta
        # ELU(alpha=1): expm1-accurate negative branch (Taylor for tiny |y|),
        # avoids depending on a lax.expm1 lowering in Mosaic.
        em1 = jnp.exp(y) - 1.0
        em1 = jnp.where(jnp.abs(y) < 1e-3, y * (1.0 + 0.5 * y), em1)
        return jnp.where(y > 0.0, y, em1)

    def res3(v, blk, d, pidx):
        b = vres_ref[:, 3 * pidx:3 * pidx + 1]
        g = vres_ref[:, 3 * pidx + 1:3 * pidx + 2]
        be = vres_ref[:, 3 * pidx + 2:3 * pidx + 3]
        return group_norm_elu(conv3(v, blk, d) + b, g, be, c_in // 16)

    def res1(v, blk, pidx):
        b = vres_ref[:, 3 * pidx:3 * pidx + 1]
        g = vres_ref[:, 3 * pidx + 1:3 * pidx + 2]
        be = vres_ref[:, 3 * pidx + 2:3 * pidx + 3]
        return group_norm_elu(conv1(v, blk) + b, g, be, c_in // 16)

    # zero the halo columns of the plane scratch (middle gets rewritten anyway)
    zpad = jnp.zeros((stride, c_in, padm), jnp.bfloat16)
    ep_ref[:, :, 0:padm] = zpad
    ep_ref[:, :, padm + m:padm + m + padm] = zpad

    o1 = x_ref[0]                                        # (C_in, L) f32
    o2 = res3(o1, 0, 1, 0)                               # residual11 (d=1)
    o3 = res1(o2, 0, 1)                                  # residual12
    s13 = o1 + o3                                        # running skip sum
    o4 = res3(s13, 1, 3, 2)                              # residual21 (d=3)
    o5 = res1(o4, 1, 3)                                  # residual22
    s135 = s13 + o5
    o6 = res3(s135, 2, 9, 4)                             # residual31 (d=9)
    o7 = res1(o6, 2, 5)                                  # residual32
    main_in = s135 + o7                                  # o1 + o3 + o5 + o7

    # main: Conv1d(C_in, C_out, k=2*stride, stride=stride), valid padding.
    # out[:, j] = sum_t Wm[t] @ x[stride*j + t]  ==  shifted plane reads only.
    load_planes(main_in)
    y = None
    for t in range(k_main):
        q, f = t % stride, t // stride
        term = dot(wm_ref[t], plane(q, f, l_out))
        y = term if y is None else y + term              # (C_out, L_out) f32

    bm = vmain_ref[:, 0:1]
    gm = vmain_ref[:, 1:2]
    bem = vmain_ref[:, 2:3]
    o_ref[0] = group_norm_elu(y + bm, gm, bem, c_out // 16)


# --------------------------------------------------------------------------
# Wrapper: layout permutation, parameter packing, pallas_call
# --------------------------------------------------------------------------
def film_downsampling(x, params, *, stride=2):
    B, C, L = x.shape
    Cout, _, K = params["w_main"].shape
    assert K == 2 * stride
    assert L % stride == 0, "time length must be divisible by stride"
    assert C % 16 == 0 and Cout % 16 == 0
    M = L // stride
    Lo = (L - K) // stride + 1                           # == M - 1

    dilations = (1, 3, 9)
    padm = max(1, max(abs((p + (t - 1) * d) // stride)
                      for d in dilations for p in range(stride)
                      for t in range(3)))

    # Phase-major time permutation (the only strided access in the pipeline,
    # done once by XLA): columns [p*M:(p+1)*M] hold x[..., p::stride].
    xp = jnp.concatenate([x[:, :, p::stride] for p in range(stride)],
                         axis=-1).astype(jnp.float32)

    # weights packed as (block, tap, C_out, C_in), cast to bf16 for the MXU
    w3 = jnp.stack([jnp.moveaxis(params[f"w_{n}"], 2, 0)
                    for n in ("r11", "r21", "r31")]).astype(jnp.bfloat16)
    w1 = jnp.stack([params[f"w_{n}"][:, :, 0]
                    for n in ("r12", "r22", "r32")]).astype(jnp.bfloat16)
    wm = jnp.moveaxis(params["w_main"], 2, 0).astype(jnp.bfloat16)

    cols = []
    for blk in ("r11", "r12", "r21", "r22", "r31", "r32"):
        cols += [params[f"b_{blk}"], params[f"g_{blk}"], params[f"be_{blk}"]]
    vres = jnp.stack(cols, axis=1).astype(jnp.float32)           # (C, 18)
    vmain = jnp.stack([params["b_main"], params["g_main"], params["be_main"]],
                      axis=1).astype(jnp.float32)                # (Cout, 3)

    kernel = functools.partial(_film_down_kernel, c_in=C, c_out=Cout, m=M,
                               stride=stride, k_main=K, l_out=Lo, padm=padm)

    flops_per_b = (3 * 3 + 3) * 2 * C * C * L + K * 2 * Cout * C * Lo
    cost = pl.CostEstimate(
        flops=B * flops_per_b,
        transcendentals=B * (6 * C * L + Cout * Lo),
        bytes_accessed=int(xp.size * 4 + w3.size * 2 + w1.size * 2
                           + wm.size * 2 + vres.size * 4 + vmain.size * 4
                           + B * Cout * Lo * 4))

    return pl.pallas_call(
        kernel,
        out_shape=jax.ShapeDtypeStruct((B, Cout, Lo), jnp.float32),
        grid_spec=pltpu.PrefetchScalarGridSpec(
            num_scalar_prefetch=0,
            grid=(B,),
            in_specs=[
                pl.BlockSpec((1, C, L), lambda b: (b, 0, 0)),
                pl.BlockSpec((3, 3, C, C), lambda b: (0, 0, 0, 0)),
                pl.BlockSpec((3, C, C), lambda b: (0, 0, 0)),
                pl.BlockSpec((K, Cout, C), lambda b: (0, 0, 0)),
                pl.BlockSpec((C, 18), lambda b: (0, 0)),
                pl.BlockSpec((Cout, 3), lambda b: (0, 0)),
            ],
            out_specs=pl.BlockSpec((1, Cout, Lo), lambda b: (b, 0, 0)),
            scratch_shapes=[pltpu.VMEM((stride, C, M + 2 * padm),
                                       jnp.bfloat16)],
        ),
        compiler_params=pltpu.CompilerParams(
            dimension_semantics=("parallel",)),
        cost_estimate=cost,
    )(xp, w3, w1, wm, vres, vmain)


# --------------------------------------------------------------------------
# Deterministic parameter init (PyTorch-like uniform fan-in init)
# --------------------------------------------------------------------------
def init_params(key, c_in, c_out, stride=2):
    specs = {
        "r11": (c_in, c_in, 3), "r12": (c_in, c_in, 1),
        "r21": (c_in, c_in, 3), "r22": (c_in, c_in, 1),
        "r31": (c_in, c_in, 3), "r32": (c_in, c_in, 1),
        "main": (c_out, c_in, 2 * stride),
    }
    params = {}
    for name, shp in specs.items():
        key, kw, kb, kg, kbe = jax.random.split(key, 5)
        bound = 1.0 / float(shp[1] * shp[2]) ** 0.5
        params[f"w_{name}"] = jax.random.uniform(kw, shp, jnp.float32, -bound, bound)
        params[f"b_{name}"] = jax.random.uniform(kb, (shp[0],), jnp.float32, -bound, bound)
        params[f"g_{name}"] = 1.0 + 0.05 * jax.random.normal(kg, (shp[0],), jnp.float32)
        params[f"be_{name}"] = 0.05 * jax.random.normal(kbe, (shp[0],), jnp.float32)
    return params


# --------------------------------------------------------------------------
# Pure-JAX references (mirror the PyTorch forward)
# --------------------------------------------------------------------------
def _conv1d(x, w, b, *, dilation=1, padding=0, stride=1, mxu_bf16=False):
    if mxu_bf16:  # matches the kernel: bf16 operands, f32 accumulation
        x = x.astype(jnp.bfloat16)
        w = w.astype(jnp.bfloat16)
        prec = None
    else:
        prec = jax.lax.Precision.HIGHEST
    out = jax.lax.conv_general_dilated(
        x, w, window_strides=(stride,), padding=[(padding, padding)],
        rhs_dilation=(dilation,), dimension_numbers=("NCH", "OIH", "NCH"),
        preferred_element_type=jnp.float32, precision=prec)
    return out + b[None, :, None]


def _group_norm(x, gamma, beta, groups):
    B, C, L = x.shape
    xg = x.reshape(B, groups, -1)
    mu = xg.mean(-1, keepdims=True)
    var = jnp.mean(jnp.square(xg - mu), axis=-1, keepdims=True)
    xn = ((xg - mu) * jax.lax.rsqrt(var + EPS)).reshape(B, C, L)
    return xn * gamma[None, :, None] + beta[None, :, None]


def reference_forward(x, p, *, stride=2, mxu_bf16=False):
    C = x.shape[1]
    Cout = p["w_main"].shape[0]

    def blk(v, name, dilation=1, padding=0, strd=1, groups=None):
        g = groups if groups is not None else C // 16
        y = _conv1d(v, p[f"w_{name}"], p[f"b_{name}"], dilation=dilation,
                    padding=padding, stride=strd, mxu_bf16=mxu_bf16)
        y = _group_norm(y, p[f"g_{name}"], p[f"be_{name}"], g)
        return jax.nn.elu(y)

    o1 = x
    o2 = blk(o1, "r11", dilation=1, padding=1)
    o3 = blk(o2, "r12")
    o4 = blk(o3 + o1, "r21", dilation=3, padding=3)
    o5 = blk(o4, "r22")
    o6 = blk(o1 + o3 + o5, "r31", dilation=9, padding=9)
    o7 = blk(o6, "r32")
    return blk(o1 + o3 + o5 + o7, "main", strd=stride, groups=Cout // 16)


# --------------------------------------------------------------------------
if __name__ == "__main__":
    B, C_in, C_out, L, STRIDE = 2, 32, 32, 64, 2
    key = jax.random.PRNGKey(0)
    kx, kp = jax.random.split(key)
    x = jax.random.normal(kx, (B, C_in, L), jnp.float32)
    params = init_params(kp, C_in, C_out, STRIDE)

    out = jax.block_until_ready(film_downsampling(x, params, stride=STRIDE))

    Lo = (L - 2 * STRIDE) // STRIDE + 1
    assert out.shape == (B, C_out, Lo), out.shape

    # Structural check: against a reference with matched bf16 matmul inputs.
    ref_matched = reference_forward(x, params, stride=STRIDE, mxu_bf16=True)
    err_matched = float(jnp.max(jnp.abs(out - ref_matched)))
    assert err_matched < 2.5e-2, f"max abs err vs bf16-matched ref: {err_matched}"

    # Semantic sanity check: against the pure f32 PyTorch-style reference.
    ref_f32 = reference_forward(x, params, stride=STRIDE, mxu_bf16=False)
    err_f32 = float(jnp.max(jnp.abs(out - ref_f32)))
    assert err_f32 < 2.5e-1, f"max abs err vs f32 ref: {err_f32}"

    print("KERNEL_OK")
</pallas_src>

<mosaic_0001>
module attributes {stable_mosaic.version = 11 : i64} {
  func.func @_film_down_kernel(%arg0: i32, %arg1: memref<1x32x64xf32, #tpu.memory_space<vmem>>, %arg2: memref<3x3x32x32xbf16, #tpu.memory_space<vmem>>, %arg3: memref<3x32x32xbf16, #tpu.memory_space<vmem>>, %arg4: memref<4x32x32xbf16, #tpu.memory_space<vmem>>, %arg5: memref<32x18xf32, #tpu.memory_space<vmem>>, %arg6: memref<32x3xf32, #tpu.memory_space<vmem>>, %arg7: memref<1x32x31xf32, #tpu.memory_space<vmem>>, %arg8: memref<2x32x42xbf16, #tpu.memory_space<vmem>>) attributes {dimension_semantics = [#tpu.dimension_semantics<parallel>], iteration_bounds = array<i64: 2>, scalar_prefetch = 0 : i64, scratch_operands = 1 : i64, tpu.core_type = #tpu.core_type<tc>, window_params = [{transform_indices = @transform_0, window_bounds = array<i64: 1, 32, 64>}, {pipeline_mode = #tpu.pipeline_mode<synchronous>, transform_indices = @transform_1, window_bounds = array<i64: 3, 3, 32, 32>}, {pipeline_mode = #tpu.pipeline_mode<synchronous>, transform_indices = @transform_2, window_bounds = array<i64: 3, 32, 32>}, {pipeline_mode = #tpu.pipeline_mode<synchronous>, transform_indices = @transform_3, window_bounds = array<i64: 4, 32, 32>}, {pipeline_mode = #tpu.pipeline_mode<synchronous>, transform_indices = @transform_4, window_bounds = array<i64: 32, 18>}, {pipeline_mode = #tpu.pipeline_mode<synchronous>, transform_indices = @transform_5, window_bounds = array<i64: 32, 3>}, {transform_indices = @transform_6, window_bounds = array<i64: 1, 32, 31>}]} {
    %cst = arith.constant 0.000000e+00 : bf16
    %0 = vector.broadcast %cst : bf16 to vector<2x32x5xbf16>
    %c0 = arith.constant 0 : index
    %c0_0 = arith.constant 0 : index
    %c0_1 = arith.constant 0 : index
    %1 = vector.load %arg8[%c0, %c0_0, %c0_1] : memref<2x32x42xbf16, #tpu.memory_space<vmem>>, vector<2x32x5xbf16>
    tpu.vector_store %arg8[%c0, %c0_0, %c0_1], %0 {strides = array<i32>} : memref<2x32x42xbf16, #tpu.memory_space<vmem>>, vector<2x32x5xbf16>,
    %c0_2 = arith.constant 0 : index
    %c0_3 = arith.constant 0 : index
    %c37 = arith.constant 37 : index
    %2 = vector.load %arg8[%c0_2, %c0_3, %c37] : memref<2x32x42xbf16, #tpu.memory_space<vmem>>, vector<2x32x5xbf16>
    tpu.vector_store %arg8[%c0_2, %c0_3, %c37], %0 {strides = array<i32>} : memref<2x32x42xbf16, #tpu.memory_space<vmem>>, vector<2x32x5xbf16>,
    %c0_4 = arith.constant 0 : index
    %c0_5 = arith.constant 0 : index
    %c0_6 = arith.constant 0 : index
    %3 = vector.load %arg1[%c0_4, %c0_5, %c0_6] : memref<1x32x64xf32, #tpu.memory_space<vmem>>, vector<1x32x64xf32>
    %4 = vector.shape_cast %3 : vector<1x32x64xf32> to vector<32x64xf32>
    %c0_7 = arith.constant 0 : index
    %c0_8 = arith.constant 0 : index
    %5 = vector.load %arg5[%c0_7, %c0_8] : memref<32x18xf32, #tpu.memory_space<vmem>>, vector<32x1xf32>
    %c0_9 = arith.constant 0 : index
    %c1 = arith.constant 1 : index
    %6 = vector.load %arg5[%c0_9, %c1] : memref<32x18xf32, #tpu.memory_space<vmem>>, vector<32x1xf32>
    %c0_10 = arith.constant 0 : index
    %c2 = arith.constant 2 : index
    %7 = vector.load %arg5[%c0_10, %c2] : memref<32x18xf32, #tpu.memory_space<vmem>>, vector<32x1xf32>
    %8 = arith.truncf %4 : vector<32x64xf32> to vector<32x64xbf16>
    %9 = vector.extract_strided_slice %8 {offsets = [0, 0], sizes = [32, 32], strides = [1, 1]} : vector<32x64xbf16> to vector<32x32xbf16>
    %c0_11 = arith.constant 0 : index
    %c0_12 = arith.constant 0 : index
    %c5 = arith.constant 5 : index
    %10 = vector.load %arg8[%c0_11, %c0_12, %c5] : memref<2x32x42xbf16, #tpu.memory_space<vmem>>, vector<1x32x32xbf16>
    %11 = vector.shape_cast %10 : vector<1x32x32xbf16> to vector<32x32xbf16>
    %12 = vector.shape_cast %9 : vector<32x32xbf16> to vector<1x32x32xbf16>
    tpu.vector_store %arg8[%c0_11, %c0_12, %c5], %12 {strides = array<i32>} : memref<2x32x42xbf16, #tpu.memory_space<vmem>>, vector<1x32x32xbf16>,
    %13 = vector.extract_strided_slice %8 {offsets = [0, 32], sizes = [32, 32], strides = [1, 1]} : vector<32x64xbf16> to vector<32x32xbf16>
    %c1_13 = arith.constant 1 : index
    %c0_14 = arith.constant 0 : index
    %c5_15 = arith.constant 5 : index
    %14 = vector.load %arg8[%c1_13, %c0_14, %c5_15] : memref<2x32x42xbf16, #tpu.memory_space<vmem>>, vector<1x32x32xbf16>
    %15 = vector.shape_cast %14 : vector<1x32x32xbf16> to vector<32x32xbf16>
    %16 = vector.shape_cast %13 : vector<32x32xbf16> to vector<1x32x32xbf16>
    tpu.vector_store %arg8[%c1_13, %c0_14, %c5_15], %16 {strides = array<i32>} : memref<2x32x42xbf16, #tpu.memory_space<vmem>>, vector<1x32x32xbf16>,
    %c0_16 = arith.constant 0 : index
    %c0_17 = arith.constant 0 : index
    %c0_18 = arith.constant 0 : index
    %c0_19 = arith.constant 0 : index
    %17 = vector.load %arg2[%c0_16, %c0_17, %c0_18, %c0_19] : memref<3x3x32x32xbf16, #tpu.memory_space<vmem>>, vector<1x1x32x32xbf16>
    %18 = vector.shape_cast %17 : vector<1x1x32x32xbf16> to vector<32x32xbf16>
    %c1_20 = arith.constant 1 : index
    %c0_21 = arith.constant 0 : index
    %c4 = arith.constant 4 : index
    %19 = vector.load %arg8[%c1_20, %c0_21, %c4] : memref<2x32x42xbf16, #tpu.memory_space<vmem>>, vector<1x32x32xbf16>
    %20 = vector.shape_cast %19 : vector<1x32x32xbf16> to vector<32x32xbf16>
    %cst_22 = arith.constant dense<0.000000e+00> : vector<32x32xf32>
    %21 = tpu.matmul %18, %20, %cst_22 {dimension_numbers = #tpu.dot_dimension_numbers<[1], [0], [0], [1], [0, 0, 1, 1], [], []>} : vector<32x32xbf16>, vector<32x32xbf16>, vector<32x32xf32> -> vector<32x32xf32>
    %c0_23 = arith.constant 0 : index
    %c1_24 = arith.constant 1 : index
    %c0_25 = arith.constant 0 : index
    %c0_26 = arith.constant 0 : index
    %22 = vector.load %arg2[%c0_23, %c1_24, %c0_25, %c0_26] : memref<3x3x32x32xbf16, #tpu.memory_space<vmem>>, vector<1x1x32x32xbf16>
    %23 = vector.shape_cast %22 : vector<1x1x32x32xbf16> to vector<32x32xbf16>
    %c0_27 = arith.constant 0 : index
    %c0_28 = arith.constant 0 : index
    %c5_29 = arith.constant 5 : index
    %24 = vector.load %arg8[%c0_27, %c0_28, %c5_29] : memref<2x32x42xbf16, #tpu.memory_space<vmem>>, vector<1x32x32xbf16>
    %25 = vector.shape_cast %24 : vector<1x32x32xbf16> to vector<32x32xbf16>
    %cst_30 = arith.constant dense<0.000000e+00> : vector<32x32xf32>
    %26 = tpu.matmul %23, %25, %cst_30 {dimension_numbers = #tpu.dot_dimension_numbers<[1], [0], [0], [1], [0, 0, 1, 1], [], []>} : vector<32x32xbf16>, vector<32x32xbf16>, vector<32x32xf32> -> vector<32x32xf32>
    %27 = arith.addf %21, %26 : vector<32x32xf32>
    %c0_31 = arith.constant 0 : index
    %c2_32 = arith.constant 2 : index
    %c0_33 = arith.constant 0 : index
    %c0_34 = arith.constant 0 : index
    %28 = vector.load %arg2[%c0_31, %c2_32, %c0_33, %c0_34] : memref<3x3x32x32xbf16, #tpu.memory_space<vmem>>, vector<1x1x32x32xbf16>
    %29 = vector.shape_cast %28 : vector<1x1x32x32xbf16> to vector<32x32xbf16>
    %c1_35 = arith.constant 1 : index
    %c0_36 = arith.constant 0 : index
    %c5_37 = arith.constant 5 : index
    %30 = vector.load %arg8[%c1_35, %c0_36, %c5_37] : memref<2x32x42xbf16, #tpu.memory_space<vmem>>, vector<1x32x32xbf16>
    %31 = vector.shape_cast %30 : vector<1x32x32xbf16> to vector<32x32xbf16>
    %cst_38 = arith.constant dense<0.000000e+00> : vector<32x32xf32>
    %32 = tpu.matmul %29, %31, %cst_38 {dimension_numbers = #tpu.dot_dimension_numbers<[1], [0], [0], [1], [0, 0, 1, 1], [], []>} : vector<32x32xbf16>, vector<32x32xbf16>, vector<32x32xf32> -> vector<32x32xf32>
    %33 = arith.addf %27, %32 : vector<32x32xf32>
    %c0_39 = arith.constant 0 : index
    %c0_40 = arith.constant 0 : index
    %c0_41 = arith.constant 0 : index
    %c0_42 = arith.constant 0 : index
    %34 = vector.load %arg2[%c0_39, %c0_40, %c0_41, %c0_42] : memref<3x3x32x32xbf16, #tpu.memory_space<vmem>>, vector<1x1x32x32xbf16>
    %35 = vector.shape_cast %34 : vector<1x1x32x32xbf16> to vector<32x32xbf16>
    %c0_43 = arith.constant 0 : index
    %c0_44 = arith.constant 0 : index
    %c5_45 = arith.constant 5 : index
    %36 = vector.load %arg8[%c0_43, %c0_44, %c5_45] : memref<2x32x42xbf16, #tpu.memory_space<vmem>>, vector<1x32x32xbf16>
    %37 = vector.shape_cast %36 : vector<1x32x32xbf16> to vector<32x32xbf16>
    %cst_46 = arith.constant dense<0.000000e+00> : vector<32x32xf32>
    %38 = tpu.matmul %35, %37, %cst_46 {dimension_numbers = #tpu.dot_dimension_numbers<[1], [0], [0], [1], [0, 0, 1, 1], [], []>} : vector<32x32xbf16>, vector<32x32xbf16>, vector<32x32xf32> -> vector<32x32xf32>
    %c0_47 = arith.constant 0 : index
    %c1_48 = arith.constant 1 : index
    %c0_49 = arith.constant 0 : index
    %c0_50 = arith.constant 0 : index
    %39 = vector.load %arg2[%c0_47, %c1_48, %c0_49, %c0_50] : memref<3x3x32x32xbf16, #tpu.memory_space<vmem>>, vector<1x1x32x32xbf16>
    %40 = vector.shape_cast %39 : vector<1x1x32x32xbf16> to vector<32x32xbf16>
    %c1_51 = arith.constant 1 : index
    %c0_52 = arith.constant 0 : index
    %c5_53 = arith.constant 5 : index
    %41 = vector.load %arg8[%c1_51, %c0_52, %c5_53] : memref<2x32x42xbf16, #tpu.memory_space<vmem>>, vector<1x32x32xbf16>
    %42 = vector.shape_cast %41 : vector<1x32x32xbf16> to vector<32x32xbf16>
    %cst_54 = arith.constant dense<0.000000e+00> : vector<32x32xf32>
    %43 = tpu.matmul %40, %42, %cst_54 {dimension_numbers = #tpu.dot_dimension_numbers<[1], [0], [0], [1], [0, 0, 1, 1], [], []>} : vector<32x32xbf16>, vector<32x32xbf16>, vector<32x32xf32> -> vector<32x32xf32>
    %44 = arith.addf %38, %43 : vector<32x32xf32>
    %c0_55 = arith.constant 0 : index
    %c2_56 = arith.constant 2 : index
    %c0_57 = arith.constant 0 : index
    %c0_58 = arith.constant 0 : index
    %45 = vector.load %arg2[%c0_55, %c2_56, %c0_57, %c0_58] : memref<3x3x32x32xbf16, #tpu.memory_space<vmem>>, vector<1x1x32x32xbf16>
    %46 = vector.shape_cast %45 : vector<1x1x32x32xbf16> to vector<32x32xbf16>
    %c0_59 = arith.constant 0 : index
    %c0_60 = arith.constant 0 : index
    %c6 = arith.constant 6 : index
    %47 = vector.load %arg8[%c0_59, %c0_60, %c6] : memref<2x32x42xbf16, #tpu.memory_space<vmem>>, vector<1x32x32xbf16>
    %48 = vector.shape_cast %47 : vector<1x32x32xbf16> to vector<32x32xbf16>
    %cst_61 = arith.constant dense<0.000000e+00> : vector<32x32xf32>
    %49 = tpu.matmul %46, %48, %cst_61 {dimension_numbers = #tpu.dot_dimension_numbers<[1], [0], [0], [1], [0, 0, 1, 1], [], []>} : vector<32x32xbf16>, vector<32x32xbf16>, vector<32x32xf32> -> vector<32x32xf32>
    %50 = arith.addf %44, %49 : vector<32x32xf32>
    %51 = tpu.concatenate %33, %50 in 1 : vector<32x32xf32>, vector<32x32xf32> -> vector<32x64xf32>
    %52 = vector.broadcast %5 : vector<32x1xf32> to vector<32x64xf32>
    %53 = arith.addf %51, %52 : vector<32x64xf32>
    %cst_62 = arith.constant dense<0.000000e+00> : vector<32xf32>
    %54 = vector.multi_reduction <add>, %53, %cst_62 [1] : vector<32x64xf32> to vector<32xf32>
    %55 = vector.shape_cast %54 : vector<32xf32> to vector<32x1xf32>
    %56 = arith.mulf %53, %53 : vector<32x64xf32>
    %cst_63 = arith.constant dense<0.000000e+00> : vector<32xf32>
    %57 = vector.multi_reduction <add>, %56, %cst_63 [1] : vector<32x64xf32> to vector<32xf32>
    %58 = vector.shape_cast %57 : vector<32xf32> to vector<32x1xf32>
    %59 = vector.extract_strided_slice %55 {offsets = [0, 0], sizes = [16, 1], strides = [1, 1]} : vector<32x1xf32> to vector<16x1xf32>
    %60 = vector.shape_cast %59 : vector<16x1xf32> to vector<1x16x1xf32>
    %cst_64 = arith.constant dense<0.000000e+00> : vector<1xf32>
    %61 = vector.multi_reduction <add>, %60, %cst_64 [1, 2] : vector<1x16x1xf32> to vector<1xf32>
    %62 = vector.shape_cast %61 : vector<1xf32> to vector<1x1x1xf32>
    %63 = vector.extract %62[0, 0, 0] : f32 from vector<1x1x1xf32>
    %64 = vector.broadcast %63 : f32 to vector<1x1xf32>
    %cst_65 = arith.constant 9.765625E-4 : f32
    %65 = vector.broadcast %cst_65 : f32 to vector<1x1xf32>
    %66 = arith.mulf %64, %65 : vector<1x1xf32>
    %67 = vector.extract_strided_slice %58 {offsets = [0, 0], sizes = [16, 1], strides = [1, 1]} : vector<32x1xf32> to vector<16x1xf32>
    %68 = vector.shape_cast %67 : vector<16x1xf32> to vector<1x16x1xf32>
    %cst_66 = arith.constant dense<0.000000e+00> : vector<1xf32>
    %69 = vector.multi_reduction <add>, %68, %cst_66 [1, 2] : vector<1x16x1xf32> to vector<1xf32>
    %70 = vector.shape_cast %69 : vector<1xf32> to vector<1x1x1xf32>
    %71 = vector.extract %70[0, 0, 0] : f32 from vector<1x1x1xf32>
    %72 = vector.broadcast %71 : f32 to vector<1x1xf32>
    %cst_67 = arith.constant 9.765625E-4 : f32
    %73 = vector.broadcast %cst_67 : f32 to vector<1x1xf32>
    %74 = arith.mulf %72, %73 : vector<1x1xf32>
    %75 = arith.mulf %66, %66 : vector<1x1xf32>
    %76 = arith.subf %74, %75 : vector<1x1xf32>
    %77 = vector.shape_cast %66 : vector<1x1xf32> to vector<1x1xf32>
    %78 = vector.broadcast %77 : vector<1x1xf32> to vector<16x1xf32>
    %79 = vector.shape_cast %76 : vector<1x1xf32> to vector<1x1xf32>
    %80 = vector.broadcast %79 : vector<1x1xf32> to vector<16x1xf32>
    %81 = vector.extract_strided_slice %55 {offsets = [16, 0], sizes = [16, 1], strides = [1, 1]} : vector<32x1xf32> to vector<16x1xf32>
    %82 = vector.shape_cast %81 : vector<16x1xf32> to vector<1x16x1xf32>
    %cst_68 = arith.constant dense<0.000000e+00> : vector<1xf32>
    %83 = vector.multi_reduction <add>, %82, %cst_68 [1, 2] : vector<1x16x1xf32> to vector<1xf32>
    %84 = vector.shape_cast %83 : vector<1xf32> to vector<1x1x1xf32>
    %85 = vector.extract %84[0, 0, 0] : f32 from vector<1x1x1xf32>
    %86 = vector.broadcast %85 : f32 to vector<1x1xf32>
    %cst_69 = arith.constant 9.765625E-4 : f32
    %87 = vector.broadcast %cst_69 : f32 to vector<1x1xf32>
    %88 = arith.mulf %86, %87 : vector<1x1xf32>
    %89 = vector.extract_strided_slice %58 {offsets = [16, 0], sizes = [16, 1], strides = [1, 1]} : vector<32x1xf32> to vector<16x1xf32>
    %90 = vector.shape_cast %89 : vector<16x1xf32> to vector<1x16x1xf32>
    %cst_70 = arith.constant dense<0.000000e+00> : vector<1xf32>
    %91 = vector.multi_reduction <add>, %90, %cst_70 [1, 2] : vector<1x16x1xf32> to vector<1xf32>
    %92 = vector.shape_cast %91 : vector<1xf32> to vector<1x1x1xf32>
    %93 = vector.extract %92[0, 0, 0] : f32 from vector<1x1x1xf32>
    %94 = vector.broadcast %93 : f32 to vector<1x1xf32>
    %cst_71 = arith.constant 9.765625E-4 : f32
    %95 = vector.broadcast %cst_71 : f32 to vector<1x1xf32>
    %96 = arith.mulf %94, %95 : vector<1x1xf32>
    %97 = arith.mulf %88, %88 : vector<1x1xf32>
    %98 = arith.subf %96, %97 : vector<1x1xf32>
    %99 = vector.shape_cast %88 : vector<1x1xf32> to vector<1x1xf32>
    %100 = vector.broadcast %99 : vector<1x1xf32> to vector<16x1xf32>
    %101 = vector.shape_cast %98 : vector<1x1xf32> to vector<1x1xf32>
    %102 = vector.broadcast %101 : vector<1x1xf32> to vector<16x1xf32>
    %103 = tpu.concatenate %78, %100 in 0 : vector<16x1xf32>, vector<16x1xf32> -> vector<32x1xf32>
    %104 = tpu.concatenate %80, %102 in 0 : vector<16x1xf32>, vector<16x1xf32> -> vector<32x1xf32>
    %105 = vector.broadcast %103 : vector<32x1xf32> to vector<32x64xf32>
    %106 = arith.subf %53, %105 : vector<32x64xf32>
    %cst_72 = arith.constant 9.99999974E-6 : f32
    %107 = vector.broadcast %cst_72 : f32 to vector<32x1xf32>
    %108 = arith.addf %104, %107 : vector<32x1xf32>
    %109 = math.rsqrt %108 : vector<32x1xf32>
    %110 = vector.broadcast %109 : vector<32x1xf32> to vector<32x64xf32>
    %111 = arith.mulf %106, %110 : vector<32x64xf32>
    %112 = vector.broadcast %6 : vector<32x1xf32> to vector<32x64xf32>
    %113 = arith.mulf %111, %112 : vector<32x64xf32>
    %114 = vector.broadcast %7 : vector<32x1xf32> to vector<32x64xf32>
    %115 = arith.addf %113, %114 : vector<32x64xf32>
    %116 = math.exp %115 : vector<32x64xf32>
    %cst_73 = arith.constant 1.000000e+00 : f32
    %117 = vector.broadcast %cst_73 : f32 to vector<32x64xf32>
    %118 = arith.subf %116, %117 : vector<32x64xf32>
    %119 = math.absf %115 : vector<32x64xf32>
    %cst_74 = arith.constant 1.000000e-03 : f32
    %120 = vector.broadcast %cst_74 : f32 to vector<32x64xf32>
    %121 = arith.cmpf olt, %119, %120 : vector<32x64xf32>
    %cst_75 = arith.constant 5.000000e-01 : f32
    %122 = vector.broadcast %cst_75 : f32 to vector<32x64xf32>
    %123 = arith.mulf %122, %115 : vector<32x64xf32>
    %cst_76 = arith.constant 1.000000e+00 : f32
    %124 = vector.broadcast %cst_76 : f32 to vector<32x64xf32>
    %125 = arith.addf %124, %123 : vector<32x64xf32>
    %126 = arith.mulf %115, %125 : vector<32x64xf32>
    %127 = arith.select %121, %126, %118 : vector<32x64xi1>, vector<32x64xf32>
    %cst_77 = arith.constant 0.000000e+00 : f32
    %128 = vector.broadcast %cst_77 : f32 to vector<32x64xf32>
    %129 = arith.cmpf ogt, %115, %128 : vector<32x64xf32>
    %130 = arith.select %129, %115, %127 : vector<32x64xi1>, vector<32x64xf32>
    %c0_78 = arith.constant 0 : index
    %c3 = arith.constant 3 : index
    %131 = vector.load %arg5[%c0_78, %c3] : memref<32x18xf32, #tpu.memory_space<vmem>>, vector<32x1xf32>
    %c0_79 = arith.constant 0 : index
    %c4_80 = arith.constant 4 : index
    %132 = vector.load %arg5[%c0_79, %c4_80] : memref<32x18xf32, #tpu.memory_space<vmem>>, vector<32x1xf32>
    %c0_81 = arith.constant 0 : index
    %c5_82 = arith.constant 5 : index
    %133 = vector.load %arg5[%c0_81, %c5_82] : memref<32x18xf32, #tpu.memory_space<vmem>>, vector<32x1xf32>
    %c0_83 = arith.constant 0 : index
    %c0_84 = arith.constant 0 : index
    %c0_85 = arith.constant 0 : index
    %134 = vector.load %arg3[%c0_83, %c0_84, %c0_85] : memref<3x32x32xbf16, #tpu.memory_space<vmem>>, vector<1x32x32xbf16>
    %135 = vector.shape_cast %134 : vector<1x32x32xbf16> to vector<32x32xbf16>
    %136 = arith.truncf %130 : vector<32x64xf32> to vector<32x64xbf16>
    %cst_86 = arith.constant dense<0.000000e+00> : vector<32x64xf32>
    %137 = tpu.matmul %135, %136, %cst_86 {dimension_numbers = #tpu.dot_dimension_numbers<[1], [0], [0], [1], [0, 0, 1, 1], [], []>} : vector<32x32xbf16>, vector<32x64xbf16>, vector<32x64xf32> -> vector<32x64xf32>
    %138 = vector.broadcast %131 : vector<32x1xf32> to vector<32x64xf32>
    %139 = arith.addf %137, %138 : vector<32x64xf32>
    %cst_87 = arith.constant dense<0.000000e+00> : vector<32xf32>
    %140 = vector.multi_reduction <add>, %139, %cst_87 [1] : vector<32x64xf32> to vector<32xf32>
    %141 = vector.shape_cast %140 : vector<32xf32> to vector<32x1xf32>
    %142 = arith.mulf %139, %139 : vector<32x64xf32>
    %cst_88 = arith.constant dense<0.000000e+00> : vector<32xf32>
    %143 = vector.multi_reduction <add>, %142, %cst_88 [1] : vector<32x64xf32> to vector<32xf32>
    %144 = vector.shape_cast %143 : vector<32xf32> to vector<32x1xf32>
    %145 = vector.extract_strided_slice %141 {offsets = [0, 0], sizes = [16, 1], strides = [1, 1]} : vector<32x1xf32> to vector<16x1xf32>
    %146 = vector.shape_cast %145 : vector<16x1xf32> to vector<1x16x1xf32>
    %cst_89 = arith.constant dense<0.000000e+00> : vector<1xf32>
    %147 = vector.multi_reduction <add>, %146, %cst_89 [1, 2] : vector<1x16x1xf32> to vector<1xf32>
    %148 = vector.shape_cast %147 : vector<1xf32> to vector<1x1x1xf32>
    %149 = vector.extract %148[0, 0, 0] : f32 from vector<1x1x1xf32>
    %150 = vector.broadcast %149 : f32 to vector<1x1xf32>
    %cst_90 = arith.constant 9.765625E-4 : f32
    %151 = vector.broadcast %cst_90 : f32 to vector<1x1xf32>
    %152 = arith.mulf %150, %151 : vector<1x1xf32>
    %153 = vector.extract_strided_slice %144 {offsets = [0, 0], sizes = [16, 1], strides = [1, 1]} : vector<32x1xf32> to vector<16x1xf32>
    %154 = vector.shape_cast %153 : vector<16x1xf32> to vector<1x16x1xf32>
    %cst_91 = arith.constant dense<0.000000e+00> : vector<1xf32>
    %155 = vector.multi_reduction <add>, %154, %cst_91 [1, 2] : vector<1x16x1xf32> to vector<1xf32>
    %156 = vector.shape_cast %155 : vector<1xf32> to vector<1x1x1xf32>
    %157 = vector.extract %156[0, 0, 0] : f32 from vector<1x1x1xf32>
    %158 = vector.broadcast %157 : f32 to vector<1x1xf32>
    %cst_92 = arith.constant 9.765625E-4 : f32
    %159 = vector.broadcast %cst_92 : f32 to vector<1x1xf32>
    %160 = arith.mulf %158, %159 : vector<1x1xf32>
    %161 = arith.mulf %152, %152 : vector<1x1xf32>
    %162 = arith.subf %160, %161 : vector<1x1xf32>
    %163 = vector.shape_cast %152 : vector<1x1xf32> to vector<1x1xf32>
    %164 = vector.broadcast %163 : vector<1x1xf32> to vector<16x1xf32>
    %165 = vector.shape_cast %162 : vector<1x1xf32> to vector<1x1xf32>
    %166 = vector.broadcast %165 : vector<1x1xf32> to vector<16x1xf32>
    %167 = vector.extract_strided_slice %141 {offsets = [16, 0], sizes = [16, 1], strides = [1, 1]} : vector<32x1xf32> to vector<16x1xf32>
    %168 = vector.shape_cast %167 : vector<16x1xf32> to vector<1x16x1xf32>
    %cst_93 = arith.constant dense<0.000000e+00> : vector<1xf32>
    %169 = vector.multi_reduction <add>, %168, %cst_93 [1, 2] : vector<1x16x1xf32> to vector<1xf32>
    %170 = vector.shape_cast %169 : vector<1xf32> to vector<1x1x1xf32>
    %171 = vector.extract %170[0, 0, 0] : f32 from vector<1x1x1xf32>
    %172 = vector.broadcast %171 : f32 to vector<1x1xf32>
    %cst_94 = arith.constant 9.765625E-4 : f32
    %173 = vector.broadcast %cst_94 : f32 to vector<1x1xf32>
    %174 = arith.mulf %172, %173 : vector<1x1xf32>
    %175 = vector.extract_strided_slice %144 {offsets = [16, 0], sizes = [16, 1], strides = [1, 1]} : vector<32x1xf32> to vector<16x1xf32>
    %176 = vector.shape_cast %175 : vector<16x1xf32> to vector<1x16x1xf32>
    %cst_95 = arith.constant dense<0.000000e+00> : vector<1xf32>
    %177 = vector.multi_reduction <add>, %176, %cst_95 [1, 2] : vector<1x16x1xf32> to vector<1xf32>
    %178 = vector.shape_cast %177 : vector<1xf32> to vector<1x1x1xf32>
    %179 = vector.extract %178[0, 0, 0] : f32 from vector<1x1x1xf32>
    %180 = vector.broadcast %179 : f32 to vector<1x1xf32>
    %cst_96 = arith.constant 9.765625E-4 : f32
    %181 = vector.broadcast %cst_96 : f32 to vector<1x1xf32>
    %182 = arith.mulf %180, %181 : vector<1x1xf32>
    %183 = arith.mulf %174, %174 : vector<1x1xf32>
    %184 = arith.subf %182, %183 : vector<1x1xf32>
    %185 = vector.shape_cast %174 : vector<1x1xf32> to vector<1x1xf32>
    %186 = vector.broadcast %185 : vector<1x1xf32> to vector<16x1xf32>
    %187 = vector.shape_cast %184 : vector<1x1xf32> to vector<1x1xf32>
    %188 = vector.broadcast %187 : vector<1x1xf32> to vector<16x1xf32>
    %189 = tpu.concatenate %164, %186 in 0 : vector<16x1xf32>, vector<16x1xf32> -> vector<32x1xf32>
    %190 = tpu.concatenate %166, %188 in 0 : vector<16x1xf32>, vector<16x1xf32> -> vector<32x1xf32>
    %191 = vector.broadcast %189 : vector<32x1xf32> to vector<32x64xf32>
    %192 = arith.subf %139, %191 : vector<32x64xf32>
    %cst_97 = arith.constant 9.99999974E-6 : f32
    %193 = vector.broadcast %cst_97 : f32 to vector<32x1xf32>
    %194 = arith.addf %190, %193 : vector<32x1xf32>
    %195 = math.rsqrt %194 : vector<32x1xf32>
    %196 = vector.broadcast %195 : vector<32x1xf32> to vector<32x64xf32>
    %197 = arith.mulf %192, %196 : vector<32x64xf32>
    %198 = vector.broadcast %132 : vector<32x1xf32> to vector<32x64xf32>
    %199 = arith.mulf %197, %198 : vector<32x64xf32>
    %200 = vector.broadcast %133 : vector<32x1xf32> to vector<32x64xf32>
    %201 = arith.addf %199, %200 : vector<32x64xf32>
    %202 = math.exp %201 : vector<32x64xf32>
    %cst_98 = arith.constant 1.000000e+00 : f32
    %203 = vector.broadcast %cst_98 : f32 to vector<32x64xf32>
    %204 = arith.subf %202, %203 : vector<32x64xf32>
    %205 = math.absf %201 : vector<32x64xf32>
    %cst_99 = arith.constant 1.000000e-03 : f32
    %206 = vector.broadcast %cst_99 : f32 to vector<32x64xf32>
    %207 = arith.cmpf olt, %205, %206 : vector<32x64xf32>
    %cst_100 = arith.constant 5.000000e-01 : f32
    %208 = vector.broadcast %cst_100 : f32 to vector<32x64xf32>
    %209 = arith.mulf %208, %201 : vector<32x64xf32>
    %cst_101 = arith.constant 1.000000e+00 : f32
    %210 = vector.broadcast %cst_101 : f32 to vector<32x64xf32>
    %211 = arith.addf %210, %209 : vector<32x64xf32>
    %212 = arith.mulf %201, %211 : vector<32x64xf32>
    %213 = arith.select %207, %212, %204 : vector<32x64xi1>, vector<32x64xf32>
    %cst_102 = arith.constant 0.000000e+00 : f32
    %214 = vector.broadcast %cst_102 : f32 to vector<32x64xf32>
    %215 = arith.cmpf ogt, %201, %214 : vector<32x64xf32>
    %216 = arith.select %215, %201, %213 : vector<32x64xi1>, vector<32x64xf32>
    %217 = arith.addf %4, %216 : vector<32x64xf32>
    %c0_103 = arith.constant 0 : index
    %c6_104 = arith.constant 6 : index
    %218 = vector.load %arg5[%c0_103, %c6_104] : memref<32x18xf32, #tpu.memory_space<vmem>>, vector<32x1xf32>
    %c0_105 = arith.constant 0 : index
    %c7 = arith.constant 7 : index
    %219 = vector.load %arg5[%c0_105, %c7] : memref<32x18xf32, #tpu.memory_space<vmem>>, vector<32x1xf32>
    %c0_106 = arith.constant 0 : index
    %c8 = arith.constant 8 : index
    %220 = vector.load %arg5[%c0_106, %c8] : memref<32x18xf32, #tpu.memory_space<vmem>>, vector<32x1xf32>
    %221 = arith.truncf %217 : vector<32x64xf32> to vector<32x64xbf16>
    %222 = vector.extract_strided_slice %221 {offsets = [0, 0], sizes = [32, 32], strides = [1, 1]} : vector<32x64xbf16> to vector<32x32xbf16>
    %c0_107 = arith.constant 0 : index
    %c0_108 = arith.constant 0 : index
    %c5_109 = arith.constant 5 : index
    %223 = vector.load %arg8[%c0_107, %c0_108, %c5_109] : memref<2x32x42xbf16, #tpu.memory_space<vmem>>, vector<1x32x32xbf16>
    %224 = vector.shape_cast %223 : vector<1x32x32xbf16> to vector<32x32xbf16>
    %225 = vector.shape_cast %222 : vector<32x32xbf16> to vector<1x32x32xbf16>
    tpu.vector_store %arg8[%c0_107, %c0_108, %c5_109], %225 {strides = array<i32>} : memref<2x32x42xbf16, #tpu.memory_space<vmem>>, vector<1x32x32xbf16>,
    %226 = vector.extract_strided_slice %221 {offsets = [0, 32], sizes = [32, 32], strides = [1, 1]} : vector<32x64xbf16> to vector<32x32xbf16>
    %c1_110 = arith.constant 1 : index
    %c0_111 = arith.constant 0 : index
    %c5_112 = arith.constant 5 : index
    %227 = vector.load %arg8[%c1_110, %c0_111, %c5_112] : memref<2x32x42xbf16, #tpu.memory_space<vmem>>, vector<1x32x32xbf16>
    %228 = vector.shape_cast %227 : vector<1x32x32xbf16> to vector<32x32xbf16>
    %229 = vector.shape_cast %226 : vector<32x32xbf16> to vector<1x32x32xbf16>
    tpu.vector_store %arg8[%c1_110, %c0_111, %c5_112], %229 {strides = array<i32>} : memref<2x32x42xbf16, #tpu.memory_space<vmem>>, vector<1x32x32xbf16>,
    %c1_113 = arith.constant 1 : index
    %c0_114 = arith.constant 0 : index
    %c0_115 = arith.constant 0 : index
    %c0_116 = arith.constant 0 : index
    %230 = vector.load %arg2[%c1_113, %c0_114, %c0_115, %c0_116] : memref<3x3x32x32xbf16, #tpu.memory_space<vmem>>, vector<1x1x32x32xbf16>
    %231 = vector.shape_cast %230 : vector<1x1x32x32xbf16> to vector<32x32xbf16>
    %c1_117 = arith.constant 1 : index
    %c0_118 = arith.constant 0 : index
    %c3_119 = arith.constant 3 : index
    %232 = vector.load %arg8[%c1_117, %c0_118, %c3_119] : memref<2x32x42xbf16, #tpu.memory_space<vmem>>, vector<1x32x32xbf16>
    %233 = vector.shape_cast %232 : vector<1x32x32xbf16> to vector<32x32xbf16>
    %cst_120 = arith.constant dense<0.000000e+00> : vector<32x32xf32>
    %234 = tpu.matmul %231, %233, %cst_120 {dimension_numbers = #tpu.dot_dimension_numbers<[1], [0], [0], [1], [0, 0, 1, 1], [], []>} : vector<32x32xbf16>, vector<32x32xbf16>, vector<32x32xf32> -> vector<32x32xf32>
    %c1_121 = arith.constant 1 : index
    %c1_122 = arith.constant 1 : index
    %c0_123 = arith.constant 0 : index
    %c0_124 = arith.constant 0 : index
    %235 = vector.load %arg2[%c1_121, %c1_122, %c0_123, %c0_124] : memref<3x3x32x32xbf16, #tpu.memory_space<vmem>>, vector<1x1x32x32xbf16>
    %236 = vector.shape_cast %235 : vector<1x1x32x32xbf16> to vector<32x32xbf16>
    %c0_125 = arith.constant 0 : index
    %c0_126 = arith.constant 0 : index
    %c5_127 = arith.constant 5 : index
    %237 = vector.load %arg8[%c0_125, %c0_126, %c5_127] : memref<2x32x42xbf16, #tpu.memory_space<vmem>>, vector<1x32x32xbf16>
    %238 = vector.shape_cast %237 : vector<1x32x32xbf16> to vector<32x32xbf16>
    %cst_128 = arith.constant dense<0.000000e+00> : vector<32x32xf32>
    %239 = tpu.matmul %236, %238, %cst_128 {dimension_numbers = #tpu.dot_dimension_numbers<[1], [0], [0], [1], [0, 0, 1, 1], [], []>} : vector<32x32xbf16>, vector<32x32xbf16>, vector<32x32xf32> -> vector<32x32xf32>
    %240 = arith.addf %234, %239 : vector<32x32xf32>
    %c1_129 = arith.constant 1 : index
    %c2_130 = arith.constant 2 : index
    %c0_131 = arith.constant 0 : index
    %c0_132 = arith.constant 0 : index
    %241 = vector.load %arg2[%c1_129, %c2_130, %c0_131, %c0_132] : memref<3x3x32x32xbf16, #tpu.memory_space<vmem>>, vector<1x1x32x32xbf16>
    %242 = vector.shape_cast %241 : vector<1x1x32x32xbf16> to vector<32x32xbf16>
    %c1_133 = arith.constant 1 : index
    %c0_134 = arith.constant 0 : index
    %c6_135 = arith.constant 6 : index
    %243 = vector.load %arg8[%c1_133, %c0_134, %c6_135] : memref<2x32x42xbf16, #tpu.memory_space<vmem>>, vector<1x32x32xbf16>
    %244 = vector.shape_cast %243 : vector<1x32x32xbf16> to vector<32x32xbf16>
    %cst_136 = arith.constant dense<0.000000e+00> : vector<32x32xf32>
    %245 = tpu.matmul %242, %244, %cst_136 {dimension_numbers = #tpu.dot_dimension_numbers<[1], [0], [0], [1], [0, 0, 1, 1], [], []>} : vector<32x32xbf16>, vector<32x32xbf16>, vector<32x32xf32> -> vector<32x32xf32>
    %246 = arith.addf %240, %245 : vector<32x32xf32>
    %c1_137 = arith.constant 1 : index
    %c0_138 = arith.constant 0 : index
    %c0_139 = arith.constant 0 : index
    %c0_140 = arith.constant 0 : index
    %247 = vector.load %arg2[%c1_137, %c0_138, %c0_139, %c0_140] : memref<3x3x32x32xbf16, #tpu.memory_space<vmem>>, vector<1x1x32x32xbf16>
    %248 = vector.shape_cast %247 : vector<1x1x32x32xbf16> to vector<32x32xbf16>
    %c0_141 = arith.constant 0 : index
    %c0_142 = arith.constant 0 : index
    %c4_143 = arith.constant 4 : index
    %249 = vector.load %arg8[%c0_141, %c0_142, %c4_143] : memref<2x32x42xbf16, #tpu.memory_space<vmem>>, vector<1x32x32xbf16>
    %250 = vector.shape_cast %249 : vector<1x32x32xbf16> to vector<32x32xbf16>
    %cst_144 = arith.constant dense<0.000000e+00> : vector<32x32xf32>
    %251 = tpu.matmul %248, %250, %cst_144 {dimension_numbers = #tpu.dot_dimension_numbers<[1], [0], [0], [1], [0, 0, 1, 1], [], []>} : vector<32x32xbf16>, vector<32x32xbf16>, vector<32x32xf32> -> vector<32x32xf32>
    %c1_145 = arith.constant 1 : index
    %c1_146 = arith.constant 1 : index
    %c0_147 = arith.constant 0 : index
    %c0_148 = arith.constant 0 : index
    %252 = vector.load %arg2[%c1_145, %c1_146, %c0_147, %c0_148] : memref<3x3x32x32xbf16, #tpu.memory_space<vmem>>, vector<1x1x32x32xbf16>
    %253 = vector.shape_cast %252 : vector<1x1x32x32xbf16> to vector<32x32xbf16>
    %c1_149 = arith.constant 1 : index
    %c0_150 = arith.constant 0 : index
    %c5_151 = arith.constant 5 : index
    %254 = vector.load %arg8[%c1_149, %c0_150, %c5_151] : memref<2x32x42xbf16, #tpu.memory_space<vmem>>, vector<1x32x32xbf16>
    %255 = vector.shape_cast %254 : vector<1x32x32xbf16> to vector<32x32xbf16>
    %cst_152 = arith.constant dense<0.000000e+00> : vector<32x32xf32>
    %256 = tpu.matmul %253, %255, %cst_152 {dimension_numbers = #tpu.dot_dimension_numbers<[1], [0], [0], [1], [0, 0, 1, 1], [], []>} : vector<32x32xbf16>, vector<32x32xbf16>, vector<32x32xf32> -> vector<32x32xf32>
    %257 = arith.addf %251, %256 : vector<32x32xf32>
    %c1_153 = arith.constant 1 : index
    %c2_154 = arith.constant 2 : index
    %c0_155 = arith.constant 0 : index
    %c0_156 = arith.constant 0 : index
    %258 = vector.load %arg2[%c1_153, %c2_154, %c0_155, %c0_156] : memref<3x3x32x32xbf16, #tpu.memory_space<vmem>>, vector<1x1x32x32xbf16>
    %259 = vector.shape_cast %258 : vector<1x1x32x32xbf16> to vector<32x32xbf16>
    %c0_157 = arith.constant 0 : index
    %c0_158 = arith.constant 0 : index
    %c7_159 = arith.constant 7 : index
    %260 = vector.load %arg8[%c0_157, %c0_158, %c7_159] : memref<2x32x42xbf16, #tpu.memory_space<vmem>>, vector<1x32x32xbf16>
    %261 = vector.shape_cast %260 : vector<1x32x32xbf16> to vector<32x32xbf16>
    %cst_160 = arith.constant dense<0.000000e+00> : vector<32x32xf32>
    %262 = tpu.matmul %259, %261, %cst_160 {dimension_numbers = #tpu.dot_dimension_numbers<[1], [0], [0], [1], [0, 0, 1, 1], [], []>} : vector<32x32xbf16>, vector<32x32xbf16>, vector<32x32xf32> -> vector<32x32xf32>
    %263 = arith.addf %257, %262 : vector<32x32xf32>
    %264 = tpu.concatenate %246, %263 in 1 : vector<32x32xf32>, vector<32x32xf32> -> vector<32x64xf32>
    %265 = vector.broadcast %218 : vector<32x1xf32> to vector<32x64xf32>
    %266 = arith.addf %264, %265 : vector<32x64xf32>
    %cst_161 = arith.constant dense<0.000000e+00> : vector<32xf32>
    %267 = vector.multi_reduction <add>, %266, %cst_161 [1] : vector<32x64xf32> to vector<32xf32>
    %268 = vector.shape_cast %267 : vector<32xf32> to vector<32x1xf32>
    %269 = arith.mulf %266, %266 : vector<32x64xf32>
    %cst_162 = arith.constant dense<0.000000e+00> : vector<32xf32>
    %270 = vector.multi_reduction <add>, %269, %cst_162 [1] : vector<32x64xf32> to vector<32xf32>
    %271 = vector.shape_cast %270 : vector<32xf32> to vector<32x1xf32>
    %272 = vector.extract_strided_slice %268 {offsets = [0, 0], sizes = [16, 1], strides = [1, 1]} : vector<32x1xf32> to vector<16x1xf32>
    %273 = vector.shape_cast %272 : vector<16x1xf32> to vector<1x16x1xf32>
    %cst_163 = arith.constant dense<0.000000e+00> : vector<1xf32>
    %274 = vector.multi_reduction <add>, %273, %cst_163 [1, 2] : vector<1x16x1xf32> to vector<1xf32>
    %275 = vector.shape_cast %274 : vector<1xf32> to vector<1x1x1xf32>
    %276 = vector.extract %275[0, 0, 0] : f32 from vector<1x1x1xf32>
    %277 = vector.broadcast %276 : f32 to vector<1x1xf32>
    %cst_164 = arith.constant 9.765625E-4 : f32
    %278 = vector.broadcast %cst_164 : f32 to vector<1x1xf32>
    %279 = arith.mulf %277, %278 : vector<1x1xf32>
    %280 = vector.extract_strided_slice %271 {offsets = [0, 0], sizes = [16, 1], strides = [1, 1]} : vector<32x1xf32> to vector<16x1xf32>
    %281 = vector.shape_cast %280 : vector<16x1xf32> to vector<1x16x1xf32>
    %cst_165 = arith.constant dense<0.000000e+00> : vector<1xf32>
    %282 = vector.multi_reduction <add>, %281, %cst_165 [1, 2] : vector<1x16x1xf32> to vector<1xf32>
    %283 = vector.shape_cast %282 : vector<1xf32> to vector<1x1x1xf32>
    %284 = vector.extract %283[0, 0, 0] : f32 from vector<1x1x1xf32>
    %285 = vector.broadcast %284 : f32 to vector<1x1xf32>
    %cst_166 = arith.constant 9.765625E-4 : f32
    %286 = vector.broadcast %cst_166 : f32 to vector<1x1xf32>
    %287 = arith.mulf %285, %286 : vector<1x1xf32>
    %288 = arith.mulf %279, %279 : vector<1x1xf32>
    %289 = arith.subf %287, %288 : vector<1x1xf32>
    %290 = vector.shape_cast %279 : vector<1x1xf32> to vector<1x1xf32>
    %291 = vector.broadcast %290 : vector<1x1xf32> to vector<16x1xf32>
    %292 = vector.shape_cast %289 : vector<1x1xf32> to vector<1x1xf32>
    %293 = vector.broadcast %292 : vector<1x1xf32> to vector<16x1xf32>
    %294 = vector.extract_strided_slice %268 {offsets = [16, 0], sizes = [16, 1], strides = [1, 1]} : vector<32x1xf32> to vector<16x1xf32>
    %295 = vector.shape_cast %294 : vector<16x1xf32> to vector<1x16x1xf32>
    %cst_167 = arith.constant dense<0.000000e+00> : vector<1xf32>
    %296 = vector.multi_reduction <add>, %295, %cst_167 [1, 2] : vector<1x16x1xf32> to vector<1xf32>
    %297 = vector.shape_cast %296 : vector<1xf32> to vector<1x1x1xf32>
    %298 = vector.extract %297[0, 0, 0] : f32 from vector<1x1x1xf32>
    %299 = vector.broadcast %298 : f32 to vector<1x1xf32>
    %cst_168 = arith.constant 9.765625E-4 : f32
    %300 = vector.broadcast %cst_168 : f32 to vector<1x1xf32>
    %301 = arith.mulf %299, %300 : vector<1x1xf32>
    %302 = vector.extract_strided_slice %271 {offsets = [16, 0], sizes = [16, 1], strides = [1, 1]} : vector<32x1xf32> to vector<16x1xf32>
    %303 = vector.shape_cast %302 : vector<16x1xf32> to vector<1x16x1xf32>
    %cst_169 = arith.constant dense<0.000000e+00> : vector<1xf32>
    %304 = vector.multi_reduction <add>, %303, %cst_169 [1, 2] : vector<1x16x1xf32> to vector<1xf32>
    %305 = vector.shape_cast %304 : vector<1xf32> to vector<1x1x1xf32>
    %306 = vector.extract %305[0, 0, 0] : f32 from vector<1x1x1xf32>
    %307 = vector.broadcast %306 : f32 to vector<1x1xf32>
    %cst_170 = arith.constant 9.765625E-4 : f32
    %308 = vector.broadcast %cst_170 : f32 to vector<1x1xf32>
    %309 = arith.mulf %307, %308 : vector<1x1xf32>
    %310 = arith.mulf %301, %301 : vector<1x1xf32>
    %311 = arith.subf %309, %310 : vector<1x1xf32>
    %312 = vector.shape_cast %301 : vector<1x1xf32> to vector<1x1xf32>
    %313 = vector.broadcast %312 : vector<1x1xf32> to vector<16x1xf32>
    %314 = vector.shape_cast %311 : vector<1x1xf32> to vector<1x1xf32>
    %315 = vector.broadcast %314 : vector<1x1xf32> to vector<16x1xf32>
    %316 = tpu.concatenate %291, %313 in 0 : vector<16x1xf32>, vector<16x1xf32> -> vector<32x1xf32>
    %317 = tpu.concatenate %293, %315 in 0 : vector<16x1xf32>, vector<16x1xf32> -> vector<32x1xf32>
    %318 = vector.broadcast %316 : vector<32x1xf32> to vector<32x64xf32>
    %319 = arith.subf %266, %318 : vector<32x64xf32>
    %cst_171 = arith.constant 9.99999974E-6 : f32
    %320 = vector.broadcast %cst_171 : f32 to vector<32x1xf32>
    %321 = arith.addf %317, %320 : vector<32x1xf32>
    %322 = math.rsqrt %321 : vector<32x1xf32>
    %323 = vector.broadcast %322 : vector<32x1xf32> to vector<32x64xf32>
    %324 = arith.mulf %319, %323 : vector<32x64xf32>
    %325 = vector.broadcast %219 : vector<32x1xf32> to vector<32x64xf32>
    %326 = arith.mulf %324, %325 : vector<32x64xf32>
    %327 = vector.broadcast %220 : vector<32x1xf32> to vector<32x64xf32>
    %328 = arith.addf %326, %327 : vector<32x64xf32>
    %329 = math.exp %328 : vector<32x64xf32>
    %cst_172 = arith.constant 1.000000e+00 : f32
    %330 = vector.broadcast %cst_172 : f32 to vector<32x64xf32>
    %331 = arith.subf %329, %330 : vector<32x64xf32>
    %332 = math.absf %328 : vector<32x64xf32>
    %cst_173 = arith.constant 1.000000e-03 : f32
    %333 = vector.broadcast %cst_173 : f32 to vector<32x64xf32>
    %334 = arith.cmpf olt, %332, %333 : vector<32x64xf32>
    %cst_174 = arith.constant 5.000000e-01 : f32
    %335 = vector.broadcast %cst_174 : f32 to vector<32x64xf32>
    %336 = arith.mulf %335, %328 : vector<32x64xf32>
    %cst_175 = arith.constant 1.000000e+00 : f32
    %337 = vector.broadcast %cst_175 : f32 to vector<32x64xf32>
    %338 = arith.addf %337, %336 : vector<32x64xf32>
    %339 = arith.mulf %328, %338 : vector<32x64xf32>
    %340 = arith.select %334, %339, %331 : vector<32x64xi1>, vector<32x64xf32>
    %cst_176 = arith.constant 0.000000e+00 : f32
    %341 = vector.broadcast %cst_176 : f32 to vector<32x64xf32>
    %342 = arith.cmpf ogt, %328, %341 : vector<32x64xf32>
    %343 = arith.select %342, %328, %340 : vector<32x64xi1>, vector<32x64xf32>
    %c0_177 = arith.constant 0 : index
    %c9 = arith.constant 9 : index
    %344 = vector.load %arg5[%c0_177, %c9] : memref<32x18xf32, #tpu.memory_space<vmem>>, vector<32x1xf32>
    %c0_178 = arith.constant 0 : index
    %c10 = arith.constant 10 : index
    %345 = vector.load %arg5[%c0_178, %c10] : memref<32x18xf32, #tpu.memory_space<vmem>>, vector<32x1xf32>
    %c0_179 = arith.constant 0 : index
    %c11 = arith.constant 11 : index
    %346 = vector.load %arg5[%c0_179, %c11] : memref<32x18xf32, #tpu.memory_space<vmem>>, vector<32x1xf32>
    %c1_180 = arith.constant 1 : index
    %c0_181 = arith.constant 0 : index
    %c0_182 = arith.constant 0 : index
    %347 = vector.load %arg3[%c1_180, %c0_181, %c0_182] : memref<3x32x32xbf16, #tpu.memory_space<vmem>>, vector<1x32x32xbf16>
    %348 = vector.shape_cast %347 : vector<1x32x32xbf16> to vector<32x32xbf16>
    %349 = arith.truncf %343 : vector<32x64xf32> to vector<32x64xbf16>
    %cst_183 = arith.constant dense<0.000000e+00> : vector<32x64xf32>
    %350 = tpu.matmul %348, %349, %cst_183 {dimension_numbers = #tpu.dot_dimension_numbers<[1], [0], [0], [1], [0, 0, 1, 1], [], []>} : vector<32x32xbf16>, vector<32x64xbf16>, vector<32x64xf32> -> vector<32x64xf32>
    %351 = vector.broadcast %344 : vector<32x1xf32> to vector<32x64xf32>
    %352 = arith.addf %350, %351 : vector<32x64xf32>
    %cst_184 = arith.constant dense<0.000000e+00> : vector<32xf32>
    %353 = vector.multi_reduction <add>, %352, %cst_184 [1] : vector<32x64xf32> to vector<32xf32>
    %354 = vector.shape_cast %353 : vector<32xf32> to vector<32x1xf32>
    %355 = arith.mulf %352, %352 : vector<32x64xf32>
    %cst_185 = arith.constant dense<0.000000e+00> : vector<32xf32>
    %356 = vector.multi_reduction <add>, %355, %cst_185 [1] : vector<32x64xf32> to vector<32xf32>
    %357 = vector.shape_cast %356 : vector<32xf32> to vector<32x1xf32>
    %358 = vector.extract_strided_slice %354 {offsets = [0, 0], sizes = [16, 1], strides = [1, 1]} : vector<32x1xf32> to vector<16x1xf32>
    %359 = vector.shape_cast %358 : vector<16x1xf32> to vector<1x16x1xf32>
    %cst_186 = arith.constant dense<0.000000e+00> : vector<1xf32>
    %360 = vector.multi_reduction <add>, %359, %cst_186 [1, 2] : vector<1x16x1xf32> to vector<1xf32>
    %361 = vector.shape_cast %360 : vector<1xf32> to vector<1x1x1xf32>
    %362 = vector.extract %361[0, 0, 0] : f32 from vector<1x1x1xf32>
    %363 = vector.broadcast %362 : f32 to vector<1x1xf32>
    %cst_187 = arith.constant 9.765625E-4 : f32
    %364 = vector.broadcast %cst_187 : f32 to vector<1x1xf32>
    %365 = arith.mulf %363, %364 : vector<1x1xf32>
    %366 = vector.extract_strided_slice %357 {offsets = [0, 0], sizes = [16, 1], strides = [1, 1]} : vector<32x1xf32> to vector<16x1xf32>
    %367 = vector.shape_cast %366 : vector<16x1xf32> to vector<1x16x1xf32>
    %cst_188 = arith.constant dense<0.000000e+00> : vector<1xf32>
    %368 = vector.multi_reduction <add>, %367, %cst_188 [1, 2] : vector<1x16x1xf32> to vector<1xf32>
    %369 = vector.shape_cast %368 : vector<1xf32> to vector<1x1x1xf32>
    %370 = vector.extract %369[0, 0, 0] : f32 from vector<1x1x1xf32>
    %371 = vector.broadcast %370 : f32 to vector<1x1xf32>
    %cst_189 = arith.constant 9.765625E-4 : f32
    %372 = vector.broadcast %cst_189 : f32 to vector<1x1xf32>
    %373 = arith.mulf %371, %372 : vector<1x1xf32>
    %374 = arith.mulf %365, %365 : vector<1x1xf32>
    %375 = arith.subf %373, %374 : vector<1x1xf32>
    %376 = vector.shape_cast %365 : vector<1x1xf32> to vector<1x1xf32>
    %377 = vector.broadcast %376 : vector<1x1xf32> to vector<16x1xf32>
    %378 = vector.shape_cast %375 : vector<1x1xf32> to vector<1x1xf32>
    %379 = vector.broadcast %378 : vector<1x1xf32> to vector<16x1xf32>
    %380 = vector.extract_strided_slice %354 {offsets = [16, 0], sizes = [16, 1], strides = [1, 1]} : vector<32x1xf32> to vector<16x1xf32>
    %381 = vector.shape_cast %380 : vector<16x1xf32> to vector<1x16x1xf32>
    %cst_190 = arith.constant dense<0.000000e+00> : vector<1xf32>
    %382 = vector.multi_reduction <add>, %381, %cst_190 [1, 2] : vector<1x16x1xf32> to vector<1xf32>
    %383 = vector.shape_cast %382 : vector<1xf32> to vector<1x1x1xf32>
    %384 = vector.extract %383[0, 0, 0] : f32 from vector<1x1x1xf32>
    %385 = vector.broadcast %384 : f32 to vector<1x1xf32>
    %cst_191 = arith.constant 9.765625E-4 : f32
    %386 = vector.broadcast %cst_191 : f32 to vector<1x1xf32>
    %387 = arith.mulf %385, %386 : vector<1x1xf32>
    %388 = vector.extract_strided_slice %357 {offsets = [16, 0], sizes = [16, 1], strides = [1, 1]} : vector<32x1xf32> to vector<16x1xf32>
    %389 = vector.shape_cast %388 : vector<16x1xf32> to vector<1x16x1xf32>
    %cst_192 = arith.constant dense<0.000000e+00> : vector<1xf32>
    %390 = vector.multi_reduction <add>, %389, %cst_192 [1, 2] : vector<1x16x1xf32> to vector<1xf32>
    %391 = vector.shape_cast %390 : vector<1xf32> to vector<1x1x1xf32>
    %392 = vector.extract %391[0, 0, 0] : f32 from vector<1x1x1xf32>
    %393 = vector.broadcast %392 : f32 to vector<1x1xf32>
    %cst_193 = arith.constant 9.765625E-4 : f32
    %394 = vector.broadcast %cst_193 : f32 to vector<1x1xf32>
    %395 = arith.mulf %393, %394 : vector<1x1xf32>
    %396 = arith.mulf %387, %387 : vector<1x1xf32>
    %397 = arith.subf %395, %396 : vector<1x1xf32>
    %398 = vector.shape_cast %387 : vector<1x1xf32> to vector<1x1xf32>
    %399 = vector.broadcast %398 : vector<1x1xf32> to vector<16x1xf32>
    %400 = vector.shape_cast %397 : vector<1x1xf32> to vector<1x1xf32>
    %401 = vector.broadcast %400 : vector<1x1xf32> to vector<16x1xf32>
    %402 = tpu.concatenate %377, %399 in 0 : vector<16x1xf32>, vector<16x1xf32> -> vector<32x1xf32>
    %403 = tpu.concatenate %379, %401 in 0 : vector<16x1xf32>, vector<16x1xf32> -> vector<32x1xf32>
    %404 = vector.broadcast %402 : vector<32x1xf32> to vector<32x64xf32>
    %405 = arith.subf %352, %404 : vector<32x64xf32>
    %cst_194 = arith.constant 9.99999974E-6 : f32
    %406 = vector.broadcast %cst_194 : f32 to vector<32x1xf32>
    %407 = arith.addf %403, %406 : vector<32x1xf32>
    %408 = math.rsqrt %407 : vector<32x1xf32>
    %409 = vector.broadcast %408 : vector<32x1xf32> to vector<32x64xf32>
    %410 = arith.mulf %405, %409 : vector<32x64xf32>
    %411 = vector.broadcast %345 : vector<32x1xf32> to vector<32x64xf32>
    %412 = arith.mulf %410, %411 : vector<32x64xf32>
    %413 = vector.broadcast %346 : vector<32x1xf32> to vector<32x64xf32>
    %414 = arith.addf %412, %413 : vector<32x64xf32>
    %415 = math.exp %414 : vector<32x64xf32>
    %cst_195 = arith.constant 1.000000e+00 : f32
    %416 = vector.broadcast %cst_195 : f32 to vector<32x64xf32>
    %417 = arith.subf %415, %416 : vector<32x64xf32>
    %418 = math.absf %414 : vector<32x64xf32>
    %cst_196 = arith.constant 1.000000e-03 : f32
    %419 = vector.broadcast %cst_196 : f32 to vector<32x64xf32>
    %420 = arith.cmpf olt, %418, %419 : vector<32x64xf32>
    %cst_197 = arith.constant 5.000000e-01 : f32
    %421 = vector.broadcast %cst_197 : f32 to vector<32x64xf32>
    %422 = arith.mulf %421, %414 : vector<32x64xf32>
    %cst_198 = arith.constant 1.000000e+00 : f32
    %423 = vector.broadcast %cst_198 : f32 to vector<32x64xf32>
    %424 = arith.addf %423, %422 : vector<32x64xf32>
    %425 = arith.mulf %414, %424 : vector<32x64xf32>
    %426 = arith.select %420, %425, %417 : vector<32x64xi1>, vector<32x64xf32>
    %cst_199 = arith.constant 0.000000e+00 : f32
    %427 = vector.broadcast %cst_199 : f32 to vector<32x64xf32>
    %428 = arith.cmpf ogt, %414, %427 : vector<32x64xf32>
    %429 = arith.select %428, %414, %426 : vector<32x64xi1>, vector<32x64xf32>
    %430 = arith.addf %217, %429 : vector<32x64xf32>
    %c0_200 = arith.constant 0 : index
    %c12 = arith.constant 12 : index
    %431 = vector.load %arg5[%c0_200, %c12] : memref<32x18xf32, #tpu.memory_space<vmem>>, vector<32x1xf32>
    %c0_201 = arith.constant 0 : index
    %c13 = arith.constant 13 : index
    %432 = vector.load %arg5[%c0_201, %c13] : memref<32x18xf32, #tpu.memory_space<vmem>>, vector<32x1xf32>
    %c0_202 = arith.constant 0 : index
    %c14 = arith.constant 14 : index
    %433 = vector.load %arg5[%c0_202, %c14] : memref<32x18xf32, #tpu.memory_space<vmem>>, vector<32x1xf32>
    %434 = arith.truncf %430 : vector<32x64xf32> to vector<32x64xbf16>
    %435 = vector.extract_strided_slice %434 {offsets = [0, 0], sizes = [32, 32], strides = [1, 1]} : vector<32x64xbf16> to vector<32x32xbf16>
    %c0_203 = arith.constant 0 : index
    %c0_204 = arith.constant 0 : index
    %c5_205 = arith.constant 5 : index
    %436 = vector.load %arg8[%c0_203, %c0_204, %c5_205] : memref<2x32x42xbf16, #tpu.memory_space<vmem>>, vector<1x32x32xbf16>
    %437 = vector.shape_cast %436 : vector<1x32x32xbf16> to vector<32x32xbf16>
    %438 = vector.shape_cast %435 : vector<32x32xbf16> to vector<1x32x32xbf16>
    tpu.vector_store %arg8[%c0_203, %c0_204, %c5_205], %438 {strides = array<i32>} : memref<2x32x42xbf16, #tpu.memory_space<vmem>>, vector<1x32x32xbf16>,
    %439 = vector.extract_strided_slice %434 {offsets = [0, 32], sizes = [32, 32], strides = [1, 1]} : vector<32x64xbf16> to vector<32x32xbf16>
    %c1_206 = arith.constant 1 : index
    %c0_207 = arith.constant 0 : index
    %c5_208 = arith.constant 5 : index
    %440 = vector.load %arg8[%c1_206, %c0_207, %c5_208] : memref<2x32x42xbf16, #tpu.memory_space<vmem>>, vector<1x32x32xbf16>
    %441 = vector.shape_cast %440 : vector<1x32x32xbf16> to vector<32x32xbf16>
    %442 = vector.shape_cast %439 : vector<32x32xbf16> to vector<1x32x32xbf16>
    tpu.vector_store %arg8[%c1_206, %c0_207, %c5_208], %442 {strides = array<i32>} : memref<2x32x42xbf16, #tpu.memory_space<vmem>>, vector<1x32x32xbf16>,
    %c2_209 = arith.constant 2 : index
    %c0_210 = arith.constant 0 : index
    %c0_211 = arith.constant 0 : index
    %c0_212 = arith.constant 0 : index
    %443 = vector.load %arg2[%c2_209, %c0_210, %c0_211, %c0_212] : memref<3x3x32x32xbf16, #tpu.memory_space<vmem>>, vector<1x1x32x32xbf16>
    %444 = vector.shape_cast %443 : vector<1x1x32x32xbf16> to vector<32x32xbf16>
    %c1_213 = arith.constant 1 : index
    %c0_214 = arith.constant 0 : index
    %c0_215 = arith.constant 0 : index
    %445 = vector.load %arg8[%c1_213, %c0_214, %c0_215] : memref<2x32x42xbf16, #tpu.memory_space<vmem>>, vector<1x32x32xbf16>
    %446 = vector.shape_cast %445 : vector<1x32x32xbf16> to vector<32x32xbf16>
    %cst_216 = arith.constant dense<0.000000e+00> : vector<32x32xf32>
    %447 = tpu.matmul %444, %446, %cst_216 {dimension_numbers = #tpu.dot_dimension_numbers<[1], [0], [0], [1], [0, 0, 1, 1], [], []>} : vector<32x32xbf16>, vector<32x32xbf16>, vector<32x32xf32> -> vector<32x32xf32>
    %c2_217 = arith.constant 2 : index
    %c1_218 = arith.constant 1 : index
    %c0_219 = arith.constant 0 : index
    %c0_220 = arith.constant 0 : index
    %448 = vector.load %arg2[%c2_217, %c1_218, %c0_219, %c0_220] : memref<3x3x32x32xbf16, #tpu.memory_space<vmem>>, vector<1x1x32x32xbf16>
    %449 = vector.shape_cast %448 : vector<1x1x32x32xbf16> to vector<32x32xbf16>
    %c0_221 = arith.constant 0 : index
    %c0_222 = arith.constant 0 : index
    %c5_223 = arith.constant 5 : index
    %450 = vector.load %arg8[%c0_221, %c0_222, %c5_223] : memref<2x32x42xbf16, #tpu.memory_space<vmem>>, vector<1x32x32xbf16>
    %451 = vector.shape_cast %450 : vector<1x32x32xbf16> to vector<32x32xbf16>
    %cst_224 = arith.constant dense<0.000000e+00> : vector<32x32xf32>
    %452 = tpu.matmul %449, %451, %cst_224 {dimension_numbers = #tpu.dot_dimension_numbers<[1], [0], [0], [1], [0, 0, 1, 1], [], []>} : vector<32x32xbf16>, vector<32x32xbf16>, vector<32x32xf32> -> vector<32x32xf32>
    %453 = arith.addf %447, %452 : vector<32x32xf32>
    %c2_225 = arith.constant 2 : index
    %c2_226 = arith.constant 2 : index
    %c0_227 = arith.constant 0 : index
    %c0_228 = arith.constant 0 : index
    %454 = vector.load %arg2[%c2_225, %c2_226, %c0_227, %c0_228] : memref<3x3x32x32xbf16, #tpu.memory_space<vmem>>, vector<1x1x32x32xbf16>
    %455 = vector.shape_cast %454 : vector<1x1x32x32xbf16> to vector<32x32xbf16>
    %c1_229 = arith.constant 1 : index
    %c0_230 = arith.constant 0 : index
    %c9_231 = arith.constant 9 : index
    %456 = vector.load %arg8[%c1_229, %c0_230, %c9_231] : memref<2x32x42xbf16, #tpu.memory_space<vmem>>, vector<1x32x32xbf16>
    %457 = vector.shape_cast %456 : vector<1x32x32xbf16> to vector<32x32xbf16>
    %cst_232 = arith.constant dense<0.000000e+00> : vector<32x32xf32>
    %458 = tpu.matmul %455, %457, %cst_232 {dimension_numbers = #tpu.dot_dimension_numbers<[1], [0], [0], [1], [0, 0, 1, 1], [], []>} : vector<32x32xbf16>, vector<32x32xbf16>, vector<32x32xf32> -> vector<32x32xf32>
    %459 = arith.addf %453, %458 : vector<32x32xf32>
    %c2_233 = arith.constant 2 : index
    %c0_234 = arith.constant 0 : index
    %c0_235 = arith.constant 0 : index
    %c0_236 = arith.constant 0 : index
    %460 = vector.load %arg2[%c2_233, %c0_234, %c0_235, %c0_236] : memref<3x3x32x32xbf16, #tpu.memory_space<vmem>>, vector<1x1x32x32xbf16>
    %461 = vector.shape_cast %460 : vector<1x1x32x32xbf16> to vector<32x32xbf16>
    %c0_237 = arith.constant 0 : index
    %c0_238 = arith.constant 0 : index
    %c1_239 = arith.constant 1 : index
    %462 = vector.load %arg8[%c0_237, %c0_238, %c1_239] : memref<2x32x42xbf16, #tpu.memory_space<vmem>>, vector<1x32x32xbf16>
    %463 = vector.shape_cast %462 : vector<1x32x32xbf16> to vector<32x32xbf16>
    %cst_240 = arith.constant dense<0.000000e+00> : vector<32x32xf32>
    %464 = tpu.matmul %461, %463, %cst_240 {dimension_numbers = #tpu.dot_dimension_numbers<[1], [0], [0], [1], [0, 0, 1, 1], [], []>} : vector<32x32xbf16>, vector<32x32xbf16>, vector<32x32xf32> -> vector<32x32xf32>
    %c2_241 = arith.constant 2 : index
    %c1_242 = arith.constant 1 : index
    %c0_243 = arith.constant 0 : index
    %c0_244 = arith.constant 0 : index
    %465 = vector.load %arg2[%c2_241, %c1_242, %c0_243, %c0_244] : memref<3x3x32x32xbf16, #tpu.memory_space<vmem>>, vector<1x1x32x32xbf16>
    %466 = vector.shape_cast %465 : vector<1x1x32x32xbf16> to vector<32x32xbf16>
    %c1_245 = arith.constant 1 : index
    %c0_246 = arith.constant 0 : index
    %c5_247 = arith.constant 5 : index
    %467 = vector.load %arg8[%c1_245, %c0_246, %c5_247] : memref<2x32x42xbf16, #tpu.memory_space<vmem>>, vector<1x32x32xbf16>
    %468 = vector.shape_cast %467 : vector<1x32x32xbf16> to vector<32x32xbf16>
    %cst_248 = arith.constant dense<0.000000e+00> : vector<32x32xf32>
    %469 = tpu.matmul %466, %468, %cst_248 {dimension_numbers = #tpu.dot_dimension_numbers<[1], [0], [0], [1], [0, 0, 1, 1], [], []>} : vector<32x32xbf16>, vector<32x32xbf16>, vector<32x32xf32> -> vector<32x32xf32>
    %470 = arith.addf %464, %469 : vector<32x32xf32>
    %c2_249 = arith.constant 2 : index
    %c2_250 = arith.constant 2 : index
    %c0_251 = arith.constant 0 : index
    %c0_252 = arith.constant 0 : index
    %471 = vector.load %arg2[%c2_249, %c2_250, %c0_251, %c0_252] : memref<3x3x32x32xbf16, #tpu.memory_space<vmem>>, vector<1x1x32x32xbf16>
    %472 = vector.shape_cast %471 : vector<1x1x32x32xbf16> to vector<32x32xbf16>
    %c0_253 = arith.constant 0 : index
    %c0_254 = arith.constant 0 : index
    %c10_255 = arith.constant 10 : index
    %473 = vector.load %arg8[%c0_253, %c0_254, %c10_255] : memref<2x32x42xbf16, #tpu.memory_space<vmem>>, vector<1x32x32xbf16>
    %474 = vector.shape_cast %473 : vector<1x32x32xbf16> to vector<32x32xbf16>
    %cst_256 = arith.constant dense<0.000000e+00> : vector<32x32xf32>
    %475 = tpu.matmul %472, %474, %cst_256 {dimension_numbers = #tpu.dot_dimension_numbers<[1], [0], [0], [1], [0, 0, 1, 1], [], []>} : vector<32x32xbf16>, vector<32x32xbf16>, vector<32x32xf32> -> vector<32x32xf32>
    %476 = arith.addf %470, %475 : vector<32x32xf32>
    %477 = tpu.concatenate %459, %476 in 1 : vector<32x32xf32>, vector<32x32xf32> -> vector<32x64xf32>
    %478 = vector.broadcast %431 : vector<32x1xf32> to vector<32x64xf32>
    %479 = arith.addf %477, %478 : vector<32x64xf32>
    %cst_257 = arith.constant dense<0.000000e+00> : vector<32xf32>
    %480 = vector.multi_reduction <add>, %479, %cst_257 [1] : vector<32x64xf32> to vector<32xf32>
    %481 = vector.shape_cast %480 : vector<32xf32> to vector<32x1xf32>
    %482 = arith.mulf %479, %479 : vector<32x64xf32>
    %cst_258 = arith.constant dense<0.000000e+00> : vector<32xf32>
    %483 = vector.multi_reduction <add>, %482, %cst_258 [1] : vector<32x64xf32> to vector<32xf32>
    %484 = vector.shape_cast %483 : vector<32xf32> to vector<32x1xf32>
    %485 = vector.extract_strided_slice %481 {offsets = [0, 0], sizes = [16, 1], strides = [1, 1]} : vector<32x1xf32> to vector<16x1xf32>
    %486 = vector.shape_cast %485 : vector<16x1xf32> to vector<1x16x1xf32>
    %cst_259 = arith.constant dense<0.000000e+00> : vector<1xf32>
    %487 = vector.multi_reduction <add>, %486, %cst_259 [1, 2] : vector<1x16x1xf32> to vector<1xf32>
    %488 = vector.shape_cast %487 : vector<1xf32> to vector<1x1x1xf32>
    %489 = vector.extract %488[0, 0, 0] : f32 from vector<1x1x1xf32>
    %490 = vector.broadcast %489 : f32 to vector<1x1xf32>
    %cst_260 = arith.constant 9.765625E-4 : f32
    %491 = vector.broadcast %cst_260 : f32 to vector<1x1xf32>
    %492 = arith.mulf %490, %491 : vector<1x1xf32>
    %493 = vector.extract_strided_slice %484 {offsets = [0, 0], sizes = [16, 1], strides = [1, 1]} : vector<32x1xf32> to vector<16x1xf32>
    %494 = vector.shape_cast %493 : vector<16x1xf32> to vector<1x16x1xf32>
    %cst_261 = arith.constant dense<0.000000e+00> : vector<1xf32>
    %495 = vector.multi_reduction <add>, %494, %cst_261 [1, 2] : vector<1x16x1xf32> to vector<1xf32>
    %496 = vector.shape_cast %495 : vector<1xf32> to vector<1x1x1xf32>
    %497 = vector.extract %496[0, 0, 0] : f32 from vector<1x1x1xf32>
    %498 = vector.broadcast %497 : f32 to vector<1x1xf32>
    %cst_262 = arith.constant 9.765625E-4 : f32
    %499 = vector.broadcast %cst_262 : f32 to vector<1x1xf32>
    %500 = arith.mulf %498, %499 : vector<1x1xf32>
    %501 = arith.mulf %492, %492 : vector<1x1xf32>
    %502 = arith.subf %500, %501 : vector<1x1xf32>
    %503 = vector.shape_cast %492 : vector<1x1xf32> to vector<1x1xf32>
    %504 = vector.broadcast %503 : vector<1x1xf32> to vector<16x1xf32>
    %505 = vector.shape_cast %502 : vector<1x1xf32> to vector<1x1xf32>
    %506 = vector.broadcast %505 : vector<1x1xf32> to vector<16x1xf32>
    %507 = vector.extract_strided_slice %481 {offsets = [16, 0], sizes = [16, 1], strides = [1, 1]} : vector<32x1xf32> to vector<16x1xf32>
    %508 = vector.shape_cast %507 : vector<16x1xf32> to vector<1x16x1xf32>
    %cst_263 = arith.constant dense<0.000000e+00> : vector<1xf32>
    %509 = vector.multi_reduction <add>, %508, %cst_263 [1, 2] : vector<1x16x1xf32> to vector<1xf32>
    %510 = vector.shape_cast %509 : vector<1xf32> to vector<1x1x1xf32>
    %511 = vector.extract %510[0, 0, 0] : f32 from vector<1x1x1xf32>
    %512 = vector.broadcast %511 : f32 to vector<1x1xf32>
    %cst_264 = arith.constant 9.765625E-4 : f32
    %513 = vector.broadcast %cst_264 : f32 to vector<1x1xf32>
    %514 = arith.mulf %512, %513 : vector<1x1xf32>
    %515 = vector.extract_strided_slice %484 {offsets = [16, 0], sizes = [16, 1], strides = [1, 1]} : vector<32x1xf32> to vector<16x1xf32>
    %516 = vector.shape_cast %515 : vector<16x1xf32> to vector<1x16x1xf32>
    %cst_265 = arith.constant dense<0.000000e+00> : vector<1xf32>
    %517 = vector.multi_reduction <add>, %516, %cst_265 [1, 2] : vector<1x16x1xf32> to vector<1xf32>
    %518 = vector.shape_cast %517 : vector<1xf32> to vector<1x1x1xf32>
    %519 = vector.extract %518[0, 0, 0] : f32 from vector<1x1x1xf32>
    %520 = vector.broadcast %519 : f32 to vector<1x1xf32>
    %cst_266 = arith.constant 9.765625E-4 : f32
    %521 = vector.broadcast %cst_266 : f32 to vector<1x1xf32>
    %522 = arith.mulf %520, %521 : vector<1x1xf32>
    %523 = arith.mulf %514, %514 : vector<1x1xf32>
    %524 = arith.subf %522, %523 : vector<1x1xf32>
    %525 = vector.shape_cast %514 : vector<1x1xf32> to vector<1x1xf32>
    %526 = vector.broadcast %525 : vector<1x1xf32> to vector<16x1xf32>
    %527 = vector.shape_cast %524 : vector<1x1xf32> to vector<1x1xf32>
    %528 = vector.broadcast %527 : vector<1x1xf32> to vector<16x1xf32>
    %529 = tpu.concatenate %504, %526 in 0 : vector<16x1xf32>, vector<16x1xf32> -> vector<32x1xf32>
    %530 = tpu.concatenate %506, %528 in 0 : vector<16x1xf32>, vector<16x1xf32> -> vector<32x1xf32>
    %531 = vector.broadcast %529 : vector<32x1xf32> to vector<32x64xf32>
    %532 = arith.subf %479, %531 : vector<32x64xf32>
    %cst_267 = arith.constant 9.99999974E-6 : f32
    %533 = vector.broadcast %cst_267 : f32 to vector<32x1xf32>
    %534 = arith.addf %530, %533 : vector<32x1xf32>
    %535 = math.rsqrt %534 : vector<32x1xf32>
    %536 = vector.broadcast %535 : vector<32x1xf32> to vector<32x64xf32>
    %537 = arith.mulf %532, %536 : vector<32x64xf32>
    %538 = vector.broadcast %432 : vector<32x1xf32> to vector<32x64xf32>
    %539 = arith.mulf %537, %538 : vector<32x64xf32>
    %540 = vector.broadcast %433 : vector<32x1xf32> to vector<32x64xf32>
    %541 = arith.addf %539, %540 : vector<32x64xf32>
    %542 = math.exp %541 : vector<32x64xf32>
    %cst_268 = arith.constant 1.000000e+00 : f32
    %543 = vector.broadcast %cst_268 : f32 to vector<32x64xf32>
    %544 = arith.subf %542, %543 : vector<32x64xf32>
    %545 = math.absf %541 : vector<32x64xf32>
    %cst_269 = arith.constant 1.000000e-03 : f32
    %546 = vector.broadcast %cst_269 : f32 to vector<32x64xf32>
    %547 = arith.cmpf olt, %545, %546 : vector<32x64xf32>
    %cst_270 = arith.constant 5.000000e-01 : f32
    %548 = vector.broadcast %cst_270 : f32 to vector<32x64xf32>
    %549 = arith.mulf %548, %541 : vector<32x64xf32>
    %cst_271 = arith.constant 1.000000e+00 : f32
    %550 = vector.broadcast %cst_271 : f32 to vector<32x64xf32>
    %551 = arith.addf %550, %549 : vector<32x64xf32>
    %552 = arith.mulf %541, %551 : vector<32x64xf32>
    %553 = arith.select %547, %552, %544 : vector<32x64xi1>, vector<32x64xf32>
    %cst_272 = arith.constant 0.000000e+00 : f32
    %554 = vector.broadcast %cst_272 : f32 to vector<32x64xf32>
    %555 = arith.cmpf ogt, %541, %554 : vector<32x64xf32>
    %556 = arith.select %555, %541, %553 : vector<32x64xi1>, vector<32x64xf32>
    %c0_273 = arith.constant 0 : index
    %c15 = arith.constant 15 : index
    %557 = vector.load %arg5[%c0_273, %c15] : memref<32x18xf32, #tpu.memory_space<vmem>>, vector<32x1xf32>
    %c0_274 = arith.constant 0 : index
    %c16 = arith.constant 16 : index
    %558 = vector.load %arg5[%c0_274, %c16] : memref<32x18xf32, #tpu.memory_space<vmem>>, vector<32x1xf32>
    %c0_275 = arith.constant 0 : index
    %c17 = arith.constant 17 : index
    %559 = vector.load %arg5[%c0_275, %c17] : memref<32x18xf32, #tpu.memory_space<vmem>>, vector<32x1xf32>
    %c2_276 = arith.constant 2 : index
    %c0_277 = arith.constant 0 : index
    %c0_278 = arith.constant 0 : index
    %560 = vector.load %arg3[%c2_276, %c0_277, %c0_278] : memref<3x32x32xbf16, #tpu.memory_space<vmem>>, vector<1x32x32xbf16>
    %561 = vector.shape_cast %560 : vector<1x32x32xbf16> to vector<32x32xbf16>
    %562 = arith.truncf %556 : vector<32x64xf32> to vector<32x64xbf16>
    %cst_279 = arith.constant dense<0.000000e+00> : vector<32x64xf32>
    %563 = tpu.matmul %561, %562, %cst_279 {dimension_numbers = #tpu.dot_dimension_numbers<[1], [0], [0], [1], [0, 0, 1, 1], [], []>} : vector<32x32xbf16>, vector<32x64xbf16>, vector<32x64xf32> -> vector<32x64xf32>
    %564 = vector.broadcast %557 : vector<32x1xf32> to vector<32x64xf32>
    %565 = arith.addf %563, %564 : vector<32x64xf32>
    %cst_280 = arith.constant dense<0.000000e+00> : vector<32xf32>
    %566 = vector.multi_reduction <add>, %565, %cst_280 [1] : vector<32x64xf32> to vector<32xf32>
    %567 = vector.shape_cast %566 : vector<32xf32> to vector<32x1xf32>
    %568 = arith.mulf %565, %565 : vector<32x64xf32>
    %cst_281 = arith.constant dense<0.000000e+00> : vector<32xf32>
    %569 = vector.multi_reduction <add>, %568, %cst_281 [1] : vector<32x64xf32> to vector<32xf32>
    %570 = vector.shape_cast %569 : vector<32xf32> to vector<32x1xf32>
    %571 = vector.extract_strided_slice %567 {offsets = [0, 0], sizes = [16, 1], strides = [1, 1]} : vector<32x1xf32> to vector<16x1xf32>
    %572 = vector.shape_cast %571 : vector<16x1xf32> to vector<1x16x1xf32>
    %cst_282 = arith.constant dense<0.000000e+00> : vector<1xf32>
    %573 = vector.multi_reduction <add>, %572, %cst_282 [1, 2] : vector<1x16x1xf32> to vector<1xf32>
    %574 = vector.shape_cast %573 : vector<1xf32> to vector<1x1x1xf32>
    %575 = vector.extract %574[0, 0, 0] : f32 from vector<1x1x1xf32>
    %576 = vector.broadcast %575 : f32 to vector<1x1xf32>
    %cst_283 = arith.constant 9.765625E-4 : f32
    %577 = vector.broadcast %cst_283 : f32 to vector<1x1xf32>
    %578 = arith.mulf %576, %577 : vector<1x1xf32>
    %579 = vector.extract_strided_slice %570 {offsets = [0, 0], sizes = [16, 1], strides = [1, 1]} : vector<32x1xf32> to vector<16x1xf32>
    %580 = vector.shape_cast %579 : vector<16x1xf32> to vector<1x16x1xf32>
    %cst_284 = arith.constant dense<0.000000e+00> : vector<1xf32>
    %581 = vector.multi_reduction <add>, %580, %cst_284 [1, 2] : vector<1x16x1xf32> to vector<1xf32>
    %582 = vector.shape_cast %581 : vector<1xf32> to vector<1x1x1xf32>
    %583 = vector.extract %582[0, 0, 0] : f32 from vector<1x1x1xf32>
    %584 = vector.broadcast %583 : f32 to vector<1x1xf32>
    %cst_285 = arith.constant 9.765625E-4 : f32
    %585 = vector.broadcast %cst_285 : f32 to vector<1x1xf32>
    %586 = arith.mulf %584, %585 : vector<1x1xf32>
    %587 = arith.mulf %578, %578 : vector<1x1xf32>
    %588 = arith.subf %586, %587 : vector<1x1xf32>
    %589 = vector.shape_cast %578 : vector<1x1xf32> to vector<1x1xf32>
    %590 = vector.broadcast %589 : vector<1x1xf32> to vector<16x1xf32>
    %591 = vector.shape_cast %588 : vector<1x1xf32> to vector<1x1xf32>
    %592 = vector.broadcast %591 : vector<1x1xf32> to vector<16x1xf32>
    %593 = vector.extract_strided_slice %567 {offsets = [16, 0], sizes = [16, 1], strides = [1, 1]} : vector<32x1xf32> to vector<16x1xf32>
    %594 = vector.shape_cast %593 : vector<16x1xf32> to vector<1x16x1xf32>
    %cst_286 = arith.constant dense<0.000000e+00> : vector<1xf32>
    %595 = vector.multi_reduction <add>, %594, %cst_286 [1, 2] : vector<1x16x1xf32> to vector<1xf32>
    %596 = vector.shape_cast %595 : vector<1xf32> to vector<1x1x1xf32>
    %597 = vector.extract %596[0, 0, 0] : f32 from vector<1x1x1xf32>
    %598 = vector.broadcast %597 : f32 to vector<1x1xf32>
    %cst_287 = arith.constant 9.765625E-4 : f32
    %599 = vector.broadcast %cst_287 : f32 to vector<1x1xf32>
    %600 = arith.mulf %598, %599 : vector<1x1xf32>
    %601 = vector.extract_strided_slice %570 {offsets = [16, 0], sizes = [16, 1], strides = [1, 1]} : vector<32x1xf32> to vector<16x1xf32>
    %602 = vector.shape_cast %601 : vector<16x1xf32> to vector<1x16x1xf32>
    %cst_288 = arith.constant dense<0.000000e+00> : vector<1xf32>
    %603 = vector.multi_reduction <add>, %602, %cst_288 [1, 2] : vector<1x16x1xf32> to vector<1xf32>
    %604 = vector.shape_cast %603 : vector<1xf32> to vector<1x1x1xf32>
    %605 = vector.extract %604[0, 0, 0] : f32 from vector<1x1x1xf32>
    %606 = vector.broadcast %605 : f32 to vector<1x1xf32>
    %cst_289 = arith.constant 9.765625E-4 : f32
    %607 = vector.broadcast %cst_289 : f32 to vector<1x1xf32>
    %608 = arith.mulf %606, %607 : vector<1x1xf32>
    %609 = arith.mulf %600, %600 : vector<1x1xf32>
    %610 = arith.subf %608, %609 : vector<1x1xf32>
    %611 = vector.shape_cast %600 : vector<1x1xf32> to vector<1x1xf32>
    %612 = vector.broadcast %611 : vector<1x1xf32> to vector<16x1xf32>
    %613 = vector.shape_cast %610 : vector<1x1xf32> to vector<1x1xf32>
    %614 = vector.broadcast %613 : vector<1x1xf32> to vector<16x1xf32>
    %615 = tpu.concatenate %590, %612 in 0 : vector<16x1xf32>, vector<16x1xf32> -> vector<32x1xf32>
    %616 = tpu.concatenate %592, %614 in 0 : vector<16x1xf32>, vector<16x1xf32> -> vector<32x1xf32>
    %617 = vector.broadcast %615 : vector<32x1xf32> to vector<32x64xf32>
    %618 = arith.subf %565, %617 : vector<32x64xf32>
    %cst_290 = arith.constant 9.99999974E-6 : f32
    %619 = vector.broadcast %cst_290 : f32 to vector<32x1xf32>
    %620 = arith.addf %616, %619 : vector<32x1xf32>
    %621 = math.rsqrt %620 : vector<32x1xf32>
    %622 = vector.broadcast %621 : vector<32x1xf32> to vector<32x64xf32>
    %623 = arith.mulf %618, %622 : vector<32x64xf32>
    %624 = vector.broadcast %558 : vector<32x1xf32> to vector<32x64xf32>
    %625 = arith.mulf %623, %624 : vector<32x64xf32>
    %626 = vector.broadcast %559 : vector<32x1xf32> to vector<32x64xf32>
    %627 = arith.addf %625, %626 : vector<32x64xf32>
    %628 = math.exp %627 : vector<32x64xf32>
    %cst_291 = arith.constant 1.000000e+00 : f32
    %629 = vector.broadcast %cst_291 : f32 to vector<32x64xf32>
    %630 = arith.subf %628, %629 : vector<32x64xf32>
    %631 = math.absf %627 : vector<32x64xf32>
    %cst_292 = arith.constant 1.000000e-03 : f32
    %632 = vector.broadcast %cst_292 : f32 to vector<32x64xf32>
    %633 = arith.cmpf olt, %631, %632 : vector<32x64xf32>
    %cst_293 = arith.constant 5.000000e-01 : f32
    %634 = vector.broadcast %cst_293 : f32 to vector<32x64xf32>
    %635 = arith.mulf %634, %627 : vector<32x64xf32>
    %cst_294 = arith.constant 1.000000e+00 : f32
    %636 = vector.broadcast %cst_294 : f32 to vector<32x64xf32>
    %637 = arith.addf %636, %635 : vector<32x64xf32>
    %638 = arith.mulf %627, %637 : vector<32x64xf32>
    %639 = arith.select %633, %638, %630 : vector<32x64xi1>, vector<32x64xf32>
    %cst_295 = arith.constant 0.000000e+00 : f32
    %640 = vector.broadcast %cst_295 : f32 to vector<32x64xf32>
    %641 = arith.cmpf ogt, %627, %640 : vector<32x64xf32>
    %642 = arith.select %641, %627, %639 : vector<32x64xi1>, vector<32x64xf32>
    %643 = arith.addf %430, %642 : vector<32x64xf32>
    %644 = arith.truncf %643 : vector<32x64xf32> to vector<32x64xbf16>
    %645 = vector.extract_strided_slice %644 {offsets = [0, 0], sizes = [32, 32], strides = [1, 1]} : vector<32x64xbf16> to vector<32x32xbf16>
    %c0_296 = arith.constant 0 : index
    %c0_297 = arith.constant 0 : index
    %c5_298 = arith.constant 5 : index
    %646 = vector.load %arg8[%c0_296, %c0_297, %c5_298] : memref<2x32x42xbf16, #tpu.memory_space<vmem>>, vector<1x32x32xbf16>
    %647 = vector.shape_cast %646 : vector<1x32x32xbf16> to vector<32x32xbf16>
    %648 = vector.shape_cast %645 : vector<32x32xbf16> to vector<1x32x32xbf16>
    tpu.vector_store %arg8[%c0_296, %c0_297, %c5_298], %648 {strides = array<i32>} : memref<2x32x42xbf16, #tpu.memory_space<vmem>>, vector<1x32x32xbf16>,
    %649 = vector.extract_strided_slice %644 {offsets = [0, 32], sizes = [32, 32], strides = [1, 1]} : vector<32x64xbf16> to vector<32x32xbf16>
    %c1_299 = arith.constant 1 : index
    %c0_300 = arith.constant 0 : index
    %c5_301 = arith.constant 5 : index
    %650 = vector.load %arg8[%c1_299, %c0_300, %c5_301] : memref<2x32x42xbf16, #tpu.memory_space<vmem>>, vector<1x32x32xbf16>
    %651 = vector.shape_cast %650 : vector<1x32x32xbf16> to vector<32x32xbf16>
    %652 = vector.shape_cast %649 : vector<32x32xbf16> to vector<1x32x32xbf16>
    tpu.vector_store %arg8[%c1_299, %c0_300, %c5_301], %652 {strides = array<i32>} : memref<2x32x42xbf16, #tpu.memory_space<vmem>>, vector<1x32x32xbf16>,
    %c0_302 = arith.constant 0 : index
    %c0_303 = arith.constant 0 : index
    %c0_304 = arith.constant 0 : index
    %653 = vector.load %arg4[%c0_302, %c0_303, %c0_304] : memref<4x32x32xbf16, #tpu.memory_space<vmem>>, vector<1x32x32xbf16>
    %654 = vector.shape_cast %653 : vector<1x32x32xbf16> to vector<32x32xbf16>
    %c0_305 = arith.constant 0 : index
    %c0_306 = arith.constant 0 : index
    %c5_307 = arith.constant 5 : index
    %655 = vector.load %arg8[%c0_305, %c0_306, %c5_307] : memref<2x32x42xbf16, #tpu.memory_space<vmem>>, vector<1x32x31xbf16>
    %656 = vector.shape_cast %655 : vector<1x32x31xbf16> to vector<32x31xbf16>
    %cst_308 = arith.constant dense<0.000000e+00> : vector<32x31xf32>
    %657 = tpu.matmul %654, %656, %cst_308 {dimension_numbers = #tpu.dot_dimension_numbers<[1], [0], [0], [1], [0, 0, 1, 1], [], []>} : vector<32x32xbf16>, vector<32x31xbf16>, vector<32x31xf32> -> vector<32x31xf32>
    %c1_309 = arith.constant 1 : index
    %c0_310 = arith.constant 0 : index
    %c0_311 = arith.constant 0 : index
    %658 = vector.load %arg4[%c1_309, %c0_310, %c0_311] : memref<4x32x32xbf16, #tpu.memory_space<vmem>>, vector<1x32x32xbf16>
    %659 = vector.shape_cast %658 : vector<1x32x32xbf16> to vector<32x32xbf16>
    %c1_312 = arith.constant 1 : index
    %c0_313 = arith.constant 0 : index
    %c5_314 = arith.constant 5 : index
    %660 = vector.load %arg8[%c1_312, %c0_313, %c5_314] : memref<2x32x42xbf16, #tpu.memory_space<vmem>>, vector<1x32x31xbf16>
    %661 = vector.shape_cast %660 : vector<1x32x31xbf16> to vector<32x31xbf16>
    %cst_315 = arith.constant dense<0.000000e+00> : vector<32x31xf32>
    %662 = tpu.matmul %659, %661, %cst_315 {dimension_numbers = #tpu.dot_dimension_numbers<[1], [0], [0], [1], [0, 0, 1, 1], [], []>} : vector<32x32xbf16>, vector<32x31xbf16>, vector<32x31xf32> -> vector<32x31xf32>
    %663 = arith.addf %657, %662 : vector<32x31xf32>
    %c2_316 = arith.constant 2 : index
    %c0_317 = arith.constant 0 : index
    %c0_318 = arith.constant 0 : index
    %664 = vector.load %arg4[%c2_316, %c0_317, %c0_318] : memref<4x32x32xbf16, #tpu.memory_space<vmem>>, vector<1x32x32xbf16>
    %665 = vector.shape_cast %664 : vector<1x32x32xbf16> to vector<32x32xbf16>
    %c0_319 = arith.constant 0 : index
    %c0_320 = arith.constant 0 : index
    %c6_321 = arith.constant 6 : index
    %666 = vector.load %arg8[%c0_319, %c0_320, %c6_321] : memref<2x32x42xbf16, #tpu.memory_space<vmem>>, vector<1x32x31xbf16>
    %667 = vector.shape_cast %666 : vector<1x32x31xbf16> to vector<32x31xbf16>
    %cst_322 = arith.constant dense<0.000000e+00> : vector<32x31xf32>
    %668 = tpu.matmul %665, %667, %cst_322 {dimension_numbers = #tpu.dot_dimension_numbers<[1], [0], [0], [1], [0, 0, 1, 1], [], []>} : vector<32x32xbf16>, vector<32x31xbf16>, vector<32x31xf32> -> vector<32x31xf32>
    %669 = arith.addf %663, %668 : vector<32x31xf32>
    %c3_323 = arith.constant 3 : index
    %c0_324 = arith.constant 0 : index
    %c0_325 = arith.constant 0 : index
    %670 = vector.load %arg4[%c3_323, %c0_324, %c0_325] : memref<4x32x32xbf16, #tpu.memory_space<vmem>>, vector<1x32x32xbf16>
    %671 = vector.shape_cast %670 : vector<1x32x32xbf16> to vector<32x32xbf16>
    %c1_326 = arith.constant 1 : index
    %c0_327 = arith.constant 0 : index
    %c6_328 = arith.constant 6 : index
    %672 = vector.load %arg8[%c1_326, %c0_327, %c6_328] : memref<2x32x42xbf16, #tpu.memory_space<vmem>>, vector<1x32x31xbf16>
    %673 = vector.shape_cast %672 : vector<1x32x31xbf16> to vector<32x31xbf16>
    %cst_329 = arith.constant dense<0.000000e+00> : vector<32x31xf32>
    %674 = tpu.matmul %671, %673, %cst_329 {dimension_numbers = #tpu.dot_dimension_numbers<[1], [0], [0], [1], [0, 0, 1, 1], [], []>} : vector<32x32xbf16>, vector<32x31xbf16>, vector<32x31xf32> -> vector<32x31xf32>
    %675 = arith.addf %669, %674 : vector<32x31xf32>
    %c0_330 = arith.constant 0 : index
    %c0_331 = arith.constant 0 : index
    %676 = vector.load %arg6[%c0_330, %c0_331] : memref<32x3xf32, #tpu.memory_space<vmem>>, vector<32x1xf32>
    %c0_332 = arith.constant 0 : index
    %c1_333 = arith.constant 1 : index
    %677 = vector.load %arg6[%c0_332, %c1_333] : memref<32x3xf32, #tpu.memory_space<vmem>>, vector<32x1xf32>
    %c0_334 = arith.constant 0 : index
    %c2_335 = arith.constant 2 : index
    %678 = vector.load %arg6[%c0_334, %c2_335] : memref<32x3xf32, #tpu.memory_space<vmem>>, vector<32x1xf32>
    %679 = vector.broadcast %676 : vector<32x1xf32> to vector<32x31xf32>
    %680 = arith.addf %675, %679 : vector<32x31xf32>
    %cst_336 = arith.constant dense<0.000000e+00> : vector<32xf32>
    %681 = vector.multi_reduction <add>, %680, %cst_336 [1] : vector<32x31xf32> to vector<32xf32>
    %682 = vector.shape_cast %681 : vector<32xf32> to vector<32x1xf32>
    %683 = arith.mulf %680, %680 : vector<32x31xf32>
    %cst_337 = arith.constant dense<0.000000e+00> : vector<32xf32>
    %684 = vector.multi_reduction <add>, %683, %cst_337 [1] : vector<32x31xf32> to vector<32xf32>
    %685 = vector.shape_cast %684 : vector<32xf32> to vector<32x1xf32>
    %686 = vector.extract_strided_slice %682 {offsets = [0, 0], sizes = [16, 1], strides = [1, 1]} : vector<32x1xf32> to vector<16x1xf32>
    %687 = vector.shape_cast %686 : vector<16x1xf32> to vector<1x16x1xf32>
    %cst_338 = arith.constant dense<0.000000e+00> : vector<1xf32>
    %688 = vector.multi_reduction <add>, %687, %cst_338 [1, 2] : vector<1x16x1xf32> to vector<1xf32>
    %689 = vector.shape_cast %688 : vector<1xf32> to vector<1x1x1xf32>
    %690 = vector.extract %689[0, 0, 0] : f32 from vector<1x1x1xf32>
    %691 = vector.broadcast %690 : f32 to vector<1x1xf32>
    %cst_339 = arith.constant 0.00201612897 : f32
    %692 = vector.broadcast %cst_339 : f32 to vector<1x1xf32>
    %693 = arith.mulf %691, %692 : vector<1x1xf32>
    %694 = vector.extract_strided_slice %685 {offsets = [0, 0], sizes = [16, 1], strides = [1, 1]} : vector<32x1xf32> to vector<16x1xf32>
    %695 = vector.shape_cast %694 : vector<16x1xf32> to vector<1x16x1xf32>
    %cst_340 = arith.constant dense<0.000000e+00> : vector<1xf32>
    %696 = vector.multi_reduction <add>, %695, %cst_340 [1, 2] : vector<1x16x1xf32> to vector<1xf32>
    %697 = vector.shape_cast %696 : vector<1xf32> to vector<1x1x1xf32>
    %698 = vector.extract %697[0, 0, 0] : f32 from vector<1x1x1xf32>
    %699 = vector.broadcast %698 : f32 to vector<1x1xf32>
    %cst_341 = arith.constant 0.00201612897 : f32
    %700 = vector.broadcast %cst_341 : f32 to vector<1x1xf32>
    %701 = arith.mulf %699, %700 : vector<1x1xf32>
    %702 = arith.mulf %693, %693 : vector<1x1xf32>
    %703 = arith.subf %701, %702 : vector<1x1xf32>
    %704 = vector.shape_cast %693 : vector<1x1xf32> to vector<1x1xf32>
    %705 = vector.broadcast %704 : vector<1x1xf32> to vector<16x1xf32>
    %706 = vector.shape_cast %703 : vector<1x1xf32> to vector<1x1xf32>
    %707 = vector.broadcast %706 : vector<1x1xf32> to vector<16x1xf32>
    %708 = vector.extract_strided_slice %682 {offsets = [16, 0], sizes = [16, 1], strides = [1, 1]} : vector<32x1xf32> to vector<16x1xf32>
    %709 = vector.shape_cast %708 : vector<16x1xf32> to vector<1x16x1xf32>
    %cst_342 = arith.constant dense<0.000000e+00> : vector<1xf32>
    %710 = vector.multi_reduction <add>, %709, %cst_342 [1, 2] : vector<1x16x1xf32> to vector<1xf32>
    %711 = vector.shape_cast %710 : vector<1xf32> to vector<1x1x1xf32>
    %712 = vector.extract %711[0, 0, 0] : f32 from vector<1x1x1xf32>
    %713 = vector.broadcast %712 : f32 to vector<1x1xf32>
    %cst_343 = arith.constant 0.00201612897 : f32
    %714 = vector.broadcast %cst_343 : f32 to vector<1x1xf32>
    %715 = arith.mulf %713, %714 : vector<1x1xf32>
    %716 = vector.extract_strided_slice %685 {offsets = [16, 0], sizes = [16, 1], strides = [1, 1]} : vector<32x1xf32> to vector<16x1xf32>
    %717 = vector.shape_cast %716 : vector<16x1xf32> to vector<1x16x1xf32>
    %cst_344 = arith.constant dense<0.000000e+00> : vector<1xf32>
    %718 = vector.multi_reduction <add>, %717, %cst_344 [1, 2] : vector<1x16x1xf32> to vector<1xf32>
    %719 = vector.shape_cast %718 : vector<1xf32> to vector<1x1x1xf32>
    %720 = vector.extract %719[0, 0, 0] : f32 from vector<1x1x1xf32>
    %721 = vector.broadcast %720 : f32 to vector<1x1xf32>
    %cst_345 = arith.constant 0.00201612897 : f32
    %722 = vector.broadcast %cst_345 : f32 to vector<1x1xf32>
    %723 = arith.mulf %721, %722 : vector<1x1xf32>
    %724 = arith.mulf %715, %715 : vector<1x1xf32>
    %725 = arith.subf %723, %724 : vector<1x1xf32>
    %726 = vector.shape_cast %715 : vector<1x1xf32> to vector<1x1xf32>
    %727 = vector.broadcast %726 : vector<1x1xf32> to vector<16x1xf32>
    %728 = vector.shape_cast %725 : vector<1x1xf32> to vector<1x1xf32>
    %729 = vector.broadcast %728 : vector<1x1xf32> to vector<16x1xf32>
    %730 = tpu.concatenate %705, %727 in 0 : vector<16x1xf32>, vector<16x1xf32> -> vector<32x1xf32>
    %731 = tpu.concatenate %707, %729 in 0 : vector<16x1xf32>, vector<16x1xf32> -> vector<32x1xf32>
    %732 = vector.broadcast %730 : vector<32x1xf32> to vector<32x31xf32>
    %733 = arith.subf %680, %732 : vector<32x31xf32>
    %cst_346 = arith.constant 9.99999974E-6 : f32
    %734 = vector.broadcast %cst_346 : f32 to vector<32x1xf32>
    %735 = arith.addf %731, %734 : vector<32x1xf32>
    %736 = math.rsqrt %735 : vector<32x1xf32>
    %737 = vector.broadcast %736 : vector<32x1xf32> to vector<32x31xf32>
    %738 = arith.mulf %733, %737 : vector<32x31xf32>
    %739 = vector.broadcast %677 : vector<32x1xf32> to vector<32x31xf32>
    %740 = arith.mulf %738, %739 : vector<32x31xf32>
    %741 = vector.broadcast %678 : vector<32x1xf32> to vector<32x31xf32>
    %742 = arith.addf %740, %741 : vector<32x31xf32>
    %743 = math.exp %742 : vector<32x31xf32>
    %cst_347 = arith.constant 1.000000e+00 : f32
    %744 = vector.broadcast %cst_347 : f32 to vector<32x31xf32>
    %745 = arith.subf %743, %744 : vector<32x31xf32>
    %746 = math.absf %742 : vector<32x31xf32>
    %cst_348 = arith.constant 1.000000e-03 : f32
    %747 = vector.broadcast %cst_348 : f32 to vector<32x31xf32>
    %748 = arith.cmpf olt, %746, %747 : vector<32x31xf32>
    %cst_349 = arith.constant 5.000000e-01 : f32
    %749 = vector.broadcast %cst_349 : f32 to vector<32x31xf32>
    %750 = arith.mulf %749, %742 : vector<32x31xf32>
    %cst_350 = arith.constant 1.000000e+00 : f32
    %751 = vector.broadcast %cst_350 : f32 to vector<32x31xf32>
    %752 = arith.addf %751, %750 : vector<32x31xf32>
    %753 = arith.mulf %742, %752 : vector<32x31xf32>
    %754 = arith.select %748, %753, %745 : vector<32x31xi1>, vector<32x31xf32>
    %cst_351 = arith.constant 0.000000e+00 : f32
    %755 = vector.broadcast %cst_351 : f32 to vector<32x31xf32>
    %756 = arith.cmpf ogt, %742, %755 : vector<32x31xf32>
    %757 = arith.select %756, %742, %754 : vector<32x31xi1>, vector<32x31xf32>
    %c0_352 = arith.constant 0 : index
    %c0_353 = arith.constant 0 : index
    %c0_354 = arith.constant 0 : index
    %758 = vector.load %arg7[%c0_352, %c0_353, %c0_354] : memref<1x32x31xf32, #tpu.memory_space<vmem>>, vector<1x32x31xf32>
    %759 = vector.shape_cast %758 : vector<1x32x31xf32> to vector<32x31xf32>
    %760 = vector.shape_cast %757 : vector<32x31xf32> to vector<1x32x31xf32>
    tpu.vector_store %arg7[%c0_352, %c0_353, %c0_354], %760 {strides = array<i32>} : memref<1x32x31xf32, #tpu.memory_space<vmem>>, vector<1x32x31xf32>,
    return
  }
  func.func @transform_0(%arg0: i32) -> (i32, i32, i32) {
    %c0_i32 = arith.constant 0 : i32
    %c0_i32_0 = arith.constant 0 : i32
    %c0_i32_1 = arith.constant 0 : i32
    return %arg0, %c0_i32, %c0_i32_0 : i32, i32, i32
  }
  func.func @transform_1(%arg0: i32) -> (i32, i32, i32, i32) {
    %c0_i32 = arith.constant 0 : i32
    %c0_i32_0 = arith.constant 0 : i32
    %c0_i32_1 = arith.constant 0 : i32
    %c0_i32_2 = arith.constant 0 : i32
    %c0_i32_3 = arith.constant 0 : i32
    return %c0_i32, %c0_i32_0, %c0_i32_1, %c0_i32_2 : i32, i32, i32, i32
  }
  func.func @transform_2(%arg0: i32) -> (i32, i32, i32) {
    %c0_i32 = arith.constant 0 : i32
    %c0_i32_0 = arith.constant 0 : i32
    %c0_i32_1 = arith.constant 0 : i32
    %c0_i32_2 = arith.constant 0 : i32
    return %c0_i32, %c0_i32_0, %c0_i32_1 : i32, i32, i32
  }
  func.func @transform_3(%arg0: i32) -> (i32, i32, i32) {
    %c0_i32 = arith.constant 0 : i32
    %c0_i32_0 = arith.constant 0 : i32
    %c0_i32_1 = arith.constant 0 : i32
    %c0_i32_2 = arith.constant 0 : i32
    return %c0_i32, %c0_i32_0, %c0_i32_1 : i32, i32, i32
  }
  func.func @transform_4(%arg0: i32) -> (i32, i32) {
    %c0_i32 = arith.constant 0 : i32
    %c0_i32_0 = arith.constant 0 : i32
    %c0_i32_1 = arith.constant 0 : i32
    return %c0_i32, %c0_i32_0 : i32, i32
  }
  func.func @transform_5(%arg0: i32) -> (i32, i32) {
    %c0_i32 = arith.constant 0 : i32
    %c0_i32_0 = arith.constant 0 : i32
    %c0_i32_1 = arith.constant 0 : i32
    return %c0_i32, %c0_i32_0 : i32, i32
  }
  func.func @transform_6(%arg0: i32) -> (i32, i32, i32) {
    %c0_i32 = arith.constant 0 : i32
    %c0_i32_0 = arith.constant 0 : i32
    %c0_i32_1 = arith.constant 0 : i32
    return %arg0, %c0_i32, %c0_i32_0 : i32, i32, i32
  }
}

</mosaic_0001>

<bundles_post_ra>
// kernel: tpu_custom_call.1
= control target key start
LH: loop header
LB: loop body
LE: loop exit
PB: predicated region body
PF: predicated region fallthrough
CT: control target
= control target key end

     0   :  { %11 = vsyncpa [#allocation4], 0  ;;  %s5927_s0 = inlined_call_operand.vmem [shape: f32[2,32,64], index: 0, kind: input, shape index: {}]   ;;  %s5928_s1 = inlined_call_operand.hbm [shape: bf16[3,3,32,32], index: 1, kind: input, shape index: {}]   ;;  %s5929_s2 = inlined_call_operand.hbm [shape: bf16[3,32,32], index: 2, kind: input, shape index: {}]   ;;  %s5930_s3 = inlined_call_operand.hbm [shape: bf16[4,32,32], index: 3, kind: input, shape index: {}]   ;;  %s5931_s4 = inlined_call_operand.vmem [shape: f32[32,18], index: 4, kind: input, shape index: {}]   ;;  %s5932_s5 = inlined_call_operand.vmem [shape: f32[32,3], index: 5, kind: input, shape index: {}]   ;;  %s5933_s6 = inlined_call_operand.vmem [shape: f32[2,32,31], index: 6, kind: output, shape index: {}]  }
   0x1   :  { %12 = vsyncpa [#allocation6], 0  ;;  %s5061_s21 = smov 0  }
   0x2 LB: > { %s5067_s22 = sadd.s32 4294967295, %s4990_s21   ;;  %p4085_p0 = scmp.ge.s32.totalorder %s4990_s21, 1  ;;  %s4990_s21 = sphi %s5061_s21, %s18_s21  }
   0x3   : > { %p180_p1 = scmp.lt.s32.totalorder %s4990_s21, 3  ;;  %p4638_p2 = scmp.eq.s32.totalorder %s5067_s22, 0 }
   0x4   : > { %s4992_s24 = smov [#allocation5]   ;;  %s4993_s26 = smov [#allocation3]  }
   0x5   : > { %p5072_p3 = pnand %p4085_p0, %p180_p1  ;;  %s205_s25 = sshll.u32 %s4992_s24, 4  ;;  %s206_s25 = int_to_ptr.vmem [resolvable:$true] %s205_s25 }
   0x6   : > { %s192_s27 = sshll.u32 %s4993_s26, 4  ;;  %s4994_s29 = smov [#allocation7]   ;;  %s193_s27 = int_to_ptr.vmem [resolvable:$true] %s192_s27 }
   0x7   : > { %p4628_p4 = pneg %p5072_p3  ;;  %s218_s30 = sshll.u32 %s4994_s29, 4  ;;  %s5084_s30 = int_to_ptr.vmem [resolvable:$true] %s218_s30 }
   0x8   : > { %s4909_s7 = scalar_lea.vmem %s206_s25, 768  ;;  %p4917_p10 = scmp.lt.s32.totalorder %s206_s25, %s206_s25 }
   0x9   : > { %p5080_p5 = pnand %p4638_p2, %p4628_p4  ;;  %p4910_p7 = scmp.ne.s32.totalorder %s206_s25, %s4909_s7 }
   0xa   : > { %p4918_p11 = scmp.lt.s32.totalorder %s4909_s7, %s4909_s7 }
   0xb   : > { %p4900_p6 = pneg %p5080_p5 }
   0xc   : > { %p4919_p12 = por %p4918_p11, %p4917_p10 }
   0xd   : > { %p4912_p8 = pnand %p4910_p7, %p4900_p6 }
   0xf   : > { %p4913_p9 = pneg %p4912_p8 }
  0x11   : > { %p4920_p13 = pnand %p4919_p12, %p4913_p9 }
  0x13   : > { %4923 = shalt.err (!%p4920_p13)
}
  0x14   : > { %s4995_s8 = smov 64   ;;  %s4996_s9 = smov 4  }
  0x15   : > { %4634 = dma.hbm_to_vmem [thread:$0]  (!%p5080_p5), %s5929_s2, 768, %s206_s25, [#allocation6], %s4995_s8, %s4995_s8, %s4996_s9  }
  0x16   : > { %s4935_s12 = scalar_lea.vmem %s193_s27, 2304  ;;  %p4943_p7 = scmp.lt.s32.totalorder %s193_s27, %s193_s27 }
  0x17   : > { %p4936_p0 = scmp.ne.s32.totalorder %s193_s27, %s4935_s12  ;;  %p4944_p8 = scmp.lt.s32.totalorder %s4935_s12, %s4935_s12 }
  0x19   : > { %p4938_p1 = pnand %p4936_p0, %p4900_p6  ;;  %p4945_p10 = por %p4944_p8, %p4943_p7 }
  0x1b   : > { %p4939_p4 = pneg %p4938_p1 }
  0x1d   : > { %p4946_p9 = pnand %p4945_p10, %p4939_p4 }
  0x1f   : > { %4949 = shalt.err (!%p4946_p9)
}
  0x20   : > { %4631 = dma.hbm_to_vmem [thread:$0]  (!%p5080_p5), %s5928_s1, 2304, %s193_s27, [#allocation4], %s4995_s8, %s4995_s8, %s4996_s9  }
  0x21   : > { %s4961_s15 = scalar_lea.vmem %s5084_s30, 1024  ;;  %p4969_p0 = scmp.lt.s32.totalorder %s5084_s30, %s5084_s30 }
  0x22   : > { %p4962_p11 = scmp.ne.s32.totalorder %s5084_s30, %s4961_s15  ;;  %p4970_p1 = scmp.lt.s32.totalorder %s4961_s15, %s4961_s15 }
  0x24   : > { %p4964_p12 = pnand %p4962_p11, %p4900_p6  ;;  %p4971_p4 = por %p4970_p1, %p4969_p0 }
  0x26   : > { %p4965_p13 = pneg %p4964_p12 }
  0x28   : > { %p4972_p7 = pnand %p4971_p4, %p4965_p13 }
  0x2a   : > { %4975 = shalt.err (!%p4972_p7)
}
  0x2b   : > { %4637 = dma.hbm_to_vmem [thread:$0]  (!%p5080_p5), %s5930_s3, 1024, %s5084_s30, [#allocation6], %s4995_s8, %s4995_s8, %s4996_s9  }
  0x2c   : > { %248 = sbr.rel (%p5072_p3) target bundleno = 6618 (0x19da), region = 44 }
  0x31   : > { %4981 = dma.done.wait (%p4638_p2), [#allocation4], 2304  }
  0x32   : > { %4983 = vsyncadd (%p4638_p2), [#allocation4], 4294964992 }
  0x33   : > { %4985 = dma.done.wait (%p4638_p2), [#allocation6], 1792  }
  0x34   : > { %4987 = vsyncadd (%p4638_p2), [#allocation6], 4294965504  ;;  %p286_p6 = scmp.lt.s32.totalorder %s5067_s22, 1  ;;  %vm297_vm0 = vcmask 35840   ;;  %vm306_vm1 = vcmask 339240   ;;  %v4997_v0 = vmov 0  }
  0x35   : > { %304 = vst.msk [vmem:[#allocation2 + $0x18] sm:$0xf] %vm297_vm0, %v4997_v0  ;;  %298 = vst.msk [vmem:[#allocation2] sm:$0xf] %vm297_vm0, %v4997_v0  ;;  %4687 = vset.pattern.permute.xlu1 %v4997_v0  ;;  %4686 = vset.pattern.permute.xlu0 %v4997_v0  ;;  %s4998_s24 = smov 101   ;;  %s4999_s25 = smov 5  }
  0x36   : > { %299 = vst.msk [vmem:[#allocation2 + $0x4] sm:$0xf] %vm297_vm0, %v4997_v0  ;;  %300 = vst.msk [vmem:[#allocation2 + $0x8] sm:$0xf] %vm297_vm0, %v4997_v0  ;;  %s5937_s22 = smov (!%p286_p6, %s5067_s22), 1  ;;  %vm347_vm2 = vcmask 298024  }
  0x37   : > { %301 = vst.msk [vmem:[#allocation2 + $0xc] sm:$0xf] %vm297_vm0, %v4997_v0  ;;  %302 = vst.msk [vmem:[#allocation2 + $0x10] sm:$0xf] %vm297_vm0, %v4997_v0  ;;  %s4242_s18 = sshll.u32 %s5937_s22, 5  ;;  %v4758_v13 = vld [vmem:[#allocation3 + $0x10] sm:$0xff]  }
  0x38   : > { %303 = vst.msk [vmem:[#allocation2 + $0x14] sm:$0xf] %vm297_vm0, %v4997_v0  ;;  %305 = vst.msk [vmem:[#allocation2 + $0x1c] sm:$0xf] %vm297_vm0, %v4997_v0  ;;  %s5165_s23 = scalar_lea.vmem %s5927_s0, %s4242_s18  ;;  %vm412_vm3 = vcmask 261120   ;;  %v4760_v16 = vld [vmem:[#allocation3] sm:$0xff]  }
  0x39   : > { %313 = vst.msk [vmem:[#allocation2 + $0x18] sm:$0xf] %vm306_vm1, %v4997_v0  ;;  %309 = vst.msk [vmem:[#allocation2 + $0x8] sm:$0xf] %vm306_vm1, %v4997_v0  ;;  %v317_v1 = vld [vmem:[%s5165_s23 + $0x10] sm:$0xff]  ;;  %v318_v2 = vld [vmem:[%s5165_s23 + $0x18] sm:$0xff]  ;;  %4364 = vmatprep.mubr.msk.bf16.mxu0 %vm412_vm3, %v4758_v13  ;;  %4372 = vmatprep.mubr.msk.bf16.mxu1 %vm412_vm3, %v4760_v16 }
  0x3a   : > { %307 = vst.msk [vmem:[#allocation2] sm:$0xf] %vm306_vm1, %v4997_v0  ;;  %308 = vst.msk [vmem:[#allocation2 + $0x4] sm:$0xf] %vm306_vm1, %v4997_v0  ;;  %v4246_v3 = vpack.c.bf16 %v317_v1, %v317_v1  ;;  %v316_v4 = vld [vmem:[%s5165_s23 + $0x8] sm:$0xff]  ;;  %v4247_v5 = vpack.c.bf16 %v318_v2, %v318_v2  ;;  %v315_v6 = vld [vmem:[%s5165_s23] sm:$0xff] }
  0x3b   : > { %310 = vst.msk [vmem:[#allocation2 + $0xc] sm:$0xf] %vm306_vm1, %v4997_v0  ;;  %311 = vst.msk [vmem:[#allocation2 + $0x10] sm:$0xf] %vm306_vm1, %v4997_v0  ;;  %v4245_v7 = vpack.c.bf16 %v316_v4, %v316_v4  ;;  %v4244_v8 = vpack.c.bf16 %v315_v6, %v315_v6  ;;  %s5000_s26 = smov 124   ;;  %s5001_s27 = smov 123  }
  0x3c   : > { %312 = vst.msk [vmem:[#allocation2 + $0x14] sm:$0xf] %vm306_vm1, %v4997_v0  ;;  %314 = vst.msk [vmem:[#allocation2 + $0x1c] sm:$0xf] %vm306_vm1, %v4997_v0  ;;  %356 = vrot.lane.b32.xlu1 %v4246_v3, %s4998_s24  ;;  %339 = vrot.lane.b32.xlu0 %v4246_v3, %s4999_s25  ;;  %s5002_s28 = smov 122   ;;  %v4759_v26 = vld [vmem:[#allocation3 + $0x18] sm:$0xff]  }
  0x3d   : > { %v4762_v28 = vld [vmem:[#allocation3 + $0x20] sm:$0xff]   ;;  %v4761_v30 = vld [vmem:[#allocation3 + $0x8] sm:$0xff]   ;;  %v5216_v36 = vld [vmem:[%s5931_s4 + $0x10] sm:$0xff]  ;;  %s5003_s13 = smov 32   ;;  %vm830_vm4 = vcmask 523264   ;;  %vm859_vm5 = vcmask 7168  }
  0x3e   : > { %v4763_v32 = vld [vmem:[#allocation3 + $0x28] sm:$0xff]   ;;  %v5222_v37 = vld [vmem:[%s5931_s4] sm:$0xff]  ;;  %v5228_v38 = vld [vmem:[%s5931_s4 + $0x18] sm:$0xff]  ;;  %s5010_s7 = smov 121  }
  0x3f   : > { %v5210_v35 = vld [vmem:[%s5931_s4 + $0x8] sm:$0xff] }
  0x40   : > { %358 = vrot.lane.b32.xlu1 %v4247_v5, %s4998_s24  ;;  %341 = vrot.lane.b32.xlu0 %v4247_v5, %s4999_s25 }
  0x44   : > { %337 = vrot.lane.b32.xlu1 %v4245_v7, %s4999_s25  ;;  %335 = vrot.lane.b32.xlu0 %v4244_v8, %s4999_s25 }
  0x48   : > { %354 = vrot.lane.b32.xlu1 %v4245_v7, %s4998_s24  ;;  %352 = vrot.lane.b32.xlu0 %v4244_v8, %s4998_s24 }
  0xae   : > { %v357_v9 = vpop.permute.xlu1 %356  ;;  %v340_v10 = vpop.permute.xlu0 %339 }
  0xaf   : > { %367 = vst.msk [vmem:[#allocation2 + $0x18] sm:$0xf] %vm347_vm2, %v357_v9  ;;  %350 = vst.msk [vmem:[#allocation2 + $0x8] sm:$0xf] %vm347_vm2, %v340_v10 }
  0xb2   : > { %v359_v11 = vpop.permute.xlu1 %358  ;;  %v342_v12 = vpop.permute.xlu0 %341 }
  0xb3   : > { %368 = vst.msk [vmem:[#allocation2 + $0x1c] sm:$0xf] %vm347_vm2, %v359_v11  ;;  %351 = vst.msk [vmem:[#allocation2 + $0xc] sm:$0xf] %vm347_vm2, %v342_v12 }
  0xb6   : > { %v338_v14 = vpop.permute.xlu1 %337  ;;  %v336_v15 = vpop.permute.xlu0 %335 }
  0xb7   : > { %349 = vst.msk [vmem:[#allocation2 + $0x4] sm:$0xf] %vm347_vm2, %v338_v14  ;;  %348 = vst.msk [vmem:[#allocation2] sm:$0xf] %vm347_vm2, %v336_v15 }
  0xba   : > { %v355_v17 = vpop.permute.xlu1 %354  ;;  %v353_v18 = vpop.permute.xlu0 %352  ;;  %v4754_v19 = vld [vmem:[#allocation2 + $0x18] sm:$0xff]   ;;  %v4755_v20 = vld [vmem:[#allocation2 + $0x8] sm:$0xff]  }
  0xbb   : > { %366 = vst.msk [vmem:[#allocation2 + $0x14] sm:$0xf] %vm347_vm2, %v355_v17  ;;  %365 = vst.msk [vmem:[#allocation2 + $0x10] sm:$0xf] %vm347_vm2, %v353_v18  ;;  %490 = vrot.lane.b32.xlu1 %v4754_v19, %s5000_s26  ;;  %408 = vrot.lane.b32.xlu0 %v4755_v20, %s5001_s27 }
  0xbe   : > { %v4756_v21 = vld [vmem:[#allocation2] sm:$0xff]  }
  0xbf   : > { %406 = vrot.lane.b32.xlu0 %v4756_v21, %s5001_s27 }
  0xc2   : > { %v4757_v22 = vld [vmem:[#allocation2 + $0x10] sm:$0xff]  }
  0xc3   : > { %488 = vrot.lane.b32.xlu1 %v4757_v22, %s5000_s26  ;;  %566 = vrot.lane.b32.xlu0 %v4754_v19, %s5001_s27 }
  0xc7   : > { %564 = vrot.lane.b32.xlu1 %v4757_v22, %s5001_s27  ;;  %729 = vrot.lane.b32.xlu0 %v4755_v20, %s5002_s28 }
  0xcb   : > { %727 = vrot.lane.b32.xlu1 %v4756_v21, %s5002_s28  ;;  %808 = vperm.xlu0 %4686, %v5222_v37  }
  0xcf   : > { %813 = vperm.xlu1 %4687, %v5210_v35   ;;  %823 = vperm.xlu0 %4686, %v5228_v38  }
  0xd3   : > { %818 = vperm.xlu1 %4687, %v5216_v36  }
 0x12d   : > { %v491_v23 = vpop.permute.xlu1 %490  ;;  %v409_v24 = vpop.permute.xlu0 %408 }
 0x12e   : > { %4368 = vmatprep.subr.bf16.mxu1 %v491_v23  ;;  %4360 = vmatprep.subr.bf16.mxu0 %v409_v24 }
 0x12f   : > { %4369 = vmatpush3.bf16.msra.mxu1 %v491_v23  ;;  %4361 = vmatpush3.bf16.msra.mxu0 %v409_v24 }
 0x131   : > { %v407_v25 = vpop.permute.xlu0 %406 }
 0x132   : > { %4362 = vmatprep.subr.bf16.mxu0 %v407_v25 }
 0x133   : > { %4363 = vmatpush3.bf16.msra.mxu0 %v407_v25 }
 0x135   : > { %v489_v27 = vpop.permute.xlu1 %488  ;;  %v567_v29 = vpop.permute.xlu0 %566 }
 0x136   : > { %4370 = vmatprep.subr.bf16.mxu1 %v489_v27  ;;  %4365 = vmatmul.mubr.msk.bf16.vlgmr.msra.gmra.mxu0 %vm412_vm3, %v4759_v26 }
 0x137   : > { %4376 = vmatprep.subr.bf16.mxu0 %v567_v29  ;;  %4371 = vmatpush3.bf16.msra.mxu1 %v489_v27 }
 0x138   : > { %4377 = vmatpush3.bf16.msra.mxu0 %v567_v29  ;;  %4384 = vmatprep.subr.bf16.mxu1 %v567_v29 }
 0x139   : > { %v565_v31 = vpop.permute.xlu1 %564  ;;  %4380 = vmatprep.mubr.msk.bf16.mxu0 %vm412_vm3, %v4762_v28  ;;  %v730_v33 = vpop.permute.xlu0 %729 }
 0x13a   : > { %4378 = vmatprep.subr.bf16.mxu0 %v565_v31  ;;  %4373 = vmatmul.mubr.msk.bf16.vlgmr.msra.gmra.mxu1 %vm412_vm3, %v4761_v30 }
 0x13b   : > { %4385 = vmatpush3.bf16.msra.mxu1 %v567_v29  ;;  %4388 = vmatprep.mubr.msk.bf16.mxu1 %vm412_vm3, %v4758_v13 }
 0x13c   : > { %4379 = vmatpush3.bf16.msra.mxu0 %v565_v31  ;;  %4386 = vmatprep.subr.bf16.mxu1 %v565_v31 }
 0x13d   : > { %4392 = vmatprep.subr.bf16.mxu0 %v409_v24  ;;  %v728_v34 = vpop.permute.xlu1 %727 }
 0x13f   : > { %4381 = vmatmul.mubr.msk.bf16.vlgmr.msra.gmra.mxu0 %vm412_vm3, %v4763_v32  ;;  %4387 = vmatpush3.bf16.msra.mxu1 %v565_v31 }
 0x140   : > { %4393 = vmatpush3.bf16.msra.mxu0 %v409_v24  ;;  %4400 = vmatprep.subr.bf16.mxu1 %v730_v33 }
 0x141   : > { %4394 = vmatprep.subr.bf16.mxu0 %v407_v25  ;;  %4396 = vmatprep.mubr.msk.bf16.mxu0 %vm412_vm3, %v4760_v16 }
 0x142   : > { %4389 = vmatmul.mubr.msk.bf16.vlgmr.msra.gmra.mxu1 %vm412_vm3, %v4759_v26 }
 0x143   : > { %4401 = vmatpush3.bf16.msra.mxu1 %v730_v33  ;;  %4404 = vmatprep.mubr.msk.bf16.mxu1 %vm412_vm3, %v4762_v28 }
 0x144   : > { %4395 = vmatpush3.bf16.msra.mxu0 %v407_v25  ;;  %4402 = vmatprep.subr.bf16.mxu1 %v728_v34 }
 0x146   : > { %v809_v17 = vpop.permute.xlu0 %808 }
 0x147   : > { %4397 = vmatmul.mubr.msk.bf16.vlgmr.msra.gmra.mxu0 %vm412_vm3, %v4761_v30  ;;  %4403 = vmatpush3.bf16.msra.mxu1 %v728_v34 }
 0x14a   : > { %4405 = vmatmul.mubr.msk.bf16.vlgmr.msra.gmra.mxu1 %vm412_vm3, %v4763_v32  ;;  %v814_v16 = vpop.permute.xlu1 %813  ;;  %v824_v19 = vpop.permute.xlu0 %823 }
 0x14e   : > { %v819_v18 = vpop.permute.xlu1 %818 }
 0x1f6   : > { %v4366_v39 = vpop.f32.mrf.mxu0 }
 0x1f8   : > { %v453_v40 = vpop.f32.mrf.mxu0 }
 0x1fa   : > { %v4374_v41 = vpop.f32.mrf.mxu1  ;;  %v4367_v42 = vpop.f32.mrf.mxu0 }
 0x1fb   : > { %v543_v43 = vadd.f32 %v4374_v41, %v4366_v39 }
 0x1fc   : > { %v456_v44 = vpop.f32.mrf.mxu0  ;;  %v534_v45 = vpop.f32.mrf.mxu1 }
 0x1fd   : > { %v535_v46 = vadd.f32 %v534_v45, %v453_v40 }
 0x1fe   : > { %v4375_v47 = vpop.f32.mrf.mxu1 }
 0x1ff   : > { %v4382_v48 = vpop.f32.mrf.mxu0  ;;  %v546_v49 = vadd.f32 %v4375_v47, %v4367_v42 }
 0x200   : > { %v627_v50 = vadd.f32 %v4382_v48, %v543_v43  ;;  %v537_v51 = vpop.f32.mrf.mxu1 }
 0x201   : > { %v610_v52 = vpop.f32.mrf.mxu0  ;;  %v538_v53 = vadd.f32 %v537_v51, %v456_v44 }
 0x202   : > { %v625_v54 = vadd.f32 %v610_v52, %v535_v46  ;;  %v4390_v56 = vpop.f32.mrf.mxu1 }
 0x203   : > { %v4383_v55 = vpop.f32.mrf.mxu0 }
 0x204   : > { %v628_v57 = vadd.f32 %v4383_v55, %v546_v49  ;;  %v663_v59 = vpop.f32.mrf.mxu1 }
 0x205   : > { %v613_v58 = vpop.f32.mrf.mxu0 }
 0x206   : > { %v626_v60 = vadd.f32 %v613_v58, %v538_v53  ;;  %v4391_v61 = vpop.f32.mrf.mxu1 }
 0x207   : > { %v4398_v62 = vpop.f32.mrf.mxu0 }
 0x208   : > { %v666_v63 = vpop.f32.mrf.mxu1  ;;  %v721_v9 = vadd.f32 %v4398_v62, %v4390_v56 }
 0x209   : > { %v712_v1 = vpop.f32.mrf.mxu0 }
 0x20a   : > { %v4406_v3 = vpop.f32.mrf.mxu1  ;;  %v713_v4 = vadd.f32 %v712_v1, %v663_v59 }
 0x20b   : > { %v4399_v2 = vpop.f32.mrf.mxu0  ;;  %v784_v12 = vadd.f32 %v4406_v3, %v721_v9 }
 0x20c   : > { %v767_v6 = vpop.f32.mrf.mxu1  ;;  %v724_v14 = vadd.f32 %v4399_v2, %v4391_v61 }
 0x20d   : > { %v715_v5 = vpop.f32.mrf.mxu0  ;;  %v782_v7 = vadd.f32 %v767_v6, %v713_v4  ;;  %v5005_v6 = vmov 2  }
 0x20e   : > { %v4407_v8 = vpop.f32.mrf.mxu1  ;;  %v716_v10 = vadd.f32 %v715_v5, %v666_v63  ;;  %v5004_v5 = vmov 1  }
 0x20f   : > { %790 = vrot.lane.b32.xlu1 %v782_v7, %s5003_s13  ;;  %v785_v15 = vadd.f32 %v4407_v8, %v724_v14  ;;  %4688 = vset.pattern.permute.xlu0 %v5004_v5 }
 0x210   : > { %v770_v11 = vpop.f32.mrf.mxu1  ;;  %4689 = vset.pattern.permute.xlu1 %v5004_v5 }
 0x211   : > { %v783_v13 = vadd.f32 %v770_v11, %v716_v10 }
 0x213   : > { %794 = vrot.lane.b32.xlu1 %v784_v12, %s5003_s13  ;;  %792 = vrot.lane.b32.xlu0 %v783_v13, %s5003_s13 }
 0x217   : > { %796 = vrot.lane.b32.xlu0 %v785_v15, %s5003_s13 }
 0x281   : > { %v791_v20 = vpop.permute.xlu1 %790 }
 0x282   : > { %v802_v21 = vsel %vm412_vm3, %v625_v54, %v791_v20 }
 0x283   : > { %v5236_v22 = vadd.f32 %v809_v17, %v802_v21 }
 0x285   : > { %v795_v23 = vpop.permute.xlu1 %794  ;;  %v793_v24 = vpop.permute.xlu0 %792  ;;  %v831_v25 = vsel %vm830_vm4, %v5236_v22, 0.0  ;;  %v843_v32 = vmul.f32 %v5236_v22, %v5236_v22 }
 0x286   : > { %v804_v26 = vsel %vm412_vm3, %v627_v50, %v795_v23  ;;  %v803_v27 = vsel %vm412_vm3, %v626_v60, %v793_v24  ;;  %832 = vadd.xlane.f32.xlu1 %v831_v25 }
 0x287   : > { %v5242_v28 = vadd.f32 %v819_v18, %v804_v26  ;;  %v5244_v29 = vadd.f32 %v814_v16, %v803_v27  ;;  %v847_v39 = vsel %vm830_vm4, %v843_v32, 0.0 }
 0x289   : > { %v797_v30 = vpop.permute.xlu0 %796  ;;  %v837_v31 = vsel %vm830_vm4, %v5242_v28, 0.0  ;;  %v844_v41 = vmul.f32 %v5244_v29, %v5244_v29  ;;  %v834_v42 = vsel %vm830_vm4, %v5244_v29, 0.0  ;;  %v845_v44 = vmul.f32 %v5242_v28, %v5242_v28 }
 0x28a   : > { %v805_v33 = vsel %vm412_vm3, %v628_v57, %v797_v30  ;;  %838 = vadd.xlane.f32.xlu0 %v837_v31 }
 0x28b   : > { %v5251_v34 = vadd.f32 %v824_v19, %v805_v33  ;;  %v850_v43 = vsel %vm830_vm4, %v844_v41, 0.0  ;;  %v853_v46 = vsel %vm830_vm4, %v845_v44, 0.0 }
 0x28d   : > { %v840_v40 = vsel %vm830_vm4, %v5251_v34, 0.0  ;;  %v846_v45 = vmul.f32 %v5251_v34, %v5251_v34 }
 0x28e   : > { %848 = vadd.xlane.f32.xlu0 %v847_v39  ;;  %841 = vadd.xlane.f32.xlu1 %v840_v40 }
 0x28f   : > { %v856_v47 = vsel %vm830_vm4, %v846_v45, 0.0 }
 0x292   : > { %835 = vadd.xlane.f32.xlu0 %v834_v42  ;;  %851 = vadd.xlane.f32.xlu1 %v850_v43 }
 0x296   : > { %854 = vadd.xlane.f32.xlu0 %v853_v46  ;;  %857 = vadd.xlane.f32.xlu1 %v856_v47 }
 0x30f   : > { %v833_v48 = vpop.xlane.xlu1 %832 }
 0x310   : > { %v860_v54 = vsel %vm859_vm5, %v833_v48, 0.0 }
 0x313   : > { %v839_v49 = vpop.xlane.xlu0 %838 }
 0x314   : > { %v890_v63 = vsel %vm859_vm5, %v839_v49, 0.0 }
 0x317   : > { %v842_v50 = vpop.xlane.xlu1 %841  ;;  %v849_v51 = vpop.xlane.xlu0 %848 }
 0x318   : > { %v874_v55 = vsel %vm859_vm5, %v849_v51, 0.0  ;;  %v891_v60 = vsel %vm859_vm5, %v842_v50, 0.0 }
 0x319   : > { %v892_v3 = vadd.f32 %v891_v60, %v890_v63  ;;  %v5006_v60 = vmov 3  }
 0x31b   : > { %v852_v52 = vpop.xlane.xlu1 %851  ;;  %v836_v53 = vpop.xlane.xlu0 %835 }
 0x31c   : > { %v875_v56 = vsel %vm859_vm5, %v852_v52, 0.0  ;;  %v861_v57 = vsel %vm859_vm5, %v836_v53, 0.0 }
 0x31d   : > { %v876_v58 = vadd.f32 %v875_v56, %v874_v55  ;;  %v862_v59 = vadd.f32 %v861_v57, %v860_v54 }
 0x31f   : > { %v858_v61 = vpop.xlane.xlu1 %857  ;;  %877 = vadd.xlane.f32.xlu1 %v876_v58  ;;  %863 = vadd.xlane.f32.xlu0 %v862_v59  ;;  %v855_v62 = vpop.xlane.xlu0 %854  ;;  %v4764_v59 = vld [vmem:[#allocation5] sm:$0xff]  }
 0x320   : > { %v905_v1 = vsel %vm859_vm5, %v858_v61, 0.0  ;;  %v904_v2 = vsel %vm859_vm5, %v855_v62, 0.0  ;;  %4412 = vmatprep.mubr.msk.bf16.mxu0 %vm412_vm3, %v4764_v59 }
 0x321   : > { %v906_v4 = vadd.f32 %v905_v1, %v904_v2 }
 0x323   : > { %893 = vadd.xlane.f32.xlu0 %v892_v3  ;;  %907 = vadd.xlane.f32.xlu1 %v906_v4 }
 0x334   : > { %965 = vperm.xlu1 %4689, %v5228_v38  }
 0x338   : > { %4691 = vset.pattern.permute.xlu1 %v5005_v6 }
 0x339   : > { %961 = vperm.xlu0 %4688, %v5216_v36   ;;  %985 = vperm.xlu1 %4691, %v5228_v38  }
 0x33d   : > { %4690 = vset.pattern.permute.xlu0 %v5005_v6  ;;  %4692 = vset.pattern.permute.xlu1 %v5004_v5 }
 0x33e   : > { %981 = vperm.xlu0 %4690, %v5216_v36   ;;  %953 = vperm.xlu1 %4692, %v5222_v37  }
 0x342   : > { %4694 = vset.pattern.permute.xlu0 %v4997_v0  ;;  %4693 = vset.pattern.permute.xlu1 %v4997_v0 }
 0x3a8   : > { %v878_v7 = vpop.xlane.xlu1 %877  ;;  %v864_v8 = vpop.xlane.xlu0 %863 }
 0x3a9   : > { %v879_v9 = vrot.slane %v878_v7, 4  ;;  %v865_v10 = vrot.slane %v864_v8, 4 }
 0x3ab   : > { %v880_v11 = vadd.f32 %v879_v9, %v878_v7  ;;  %v866_v12 = vadd.f32 %v865_v10, %v864_v8 }
 0x3ac   : > { %v908_v13 = vpop.xlane.xlu1 %907  ;;  %v894_v14 = vpop.xlane.xlu0 %893 }
 0x3ad   : > { %v909_v15 = vrot.slane %v908_v13, 4  ;;  %v895_v16 = vrot.slane %v894_v14, 4  ;;  %v867_v17 = vrot.slane %v866_v12, 2  ;;  %v881_v18 = vrot.slane %v880_v11, 2 }
 0x3af   : > { %v910_v19 = vadd.f32 %v909_v15, %v908_v13  ;;  %v896_v20 = vadd.f32 %v895_v16, %v894_v14  ;;  %v868_v21 = vadd.f32 %v867_v17, %v866_v12  ;;  %v882_v23 = vadd.f32 %v881_v18, %v880_v11 }
 0x3b0   : > { %v966_v61 = vpop.permute.xlu1 %965 }
 0x3b1   : > { %v869_v24 = vrot.slane %v868_v21, 1  ;;  %v883_v25 = vrot.slane %v882_v23, 1  ;;  %v897_v26 = vrot.slane %v896_v20, 2  ;;  %v911_v27 = vrot.slane %v910_v19, 2 }
 0x3b3   : > { %v870_v30 = vadd.f32 %v869_v24, %v868_v21  ;;  %v884_v31 = vadd.f32 %v883_v25, %v882_v23  ;;  %v898_v32 = vadd.f32 %v897_v26, %v896_v20  ;;  %v912_v33 = vadd.f32 %v911_v27, %v910_v19 }
 0x3b4   : > { %v986_v62 = vpop.permute.xlu1 %985  ;;  %v962_v63 = vpop.permute.xlu0 %961 }
 0x3b5   : > { %4560 = vpush %v870_v30  ;;  %v899_v39 = vrot.slane %v898_v32, 1  ;;  %v913_v40 = vrot.slane %v912_v33, 1 }
 0x3b6   : > { %4562 = vpush %v884_v31 }
 0x3b7   : > { %v900_v41 = vadd.f32 %v899_v39, %v898_v32  ;;  %v914_v42 = vadd.f32 %v913_v40, %v912_v33 }
 0x3b9   : > { %4564 = vpush %v900_v41  ;;  %v954_v1 = vpop.permute.xlu1 %953  ;;  %v982_v2 = vpop.permute.xlu0 %981 }
 0x3ba   : > { %4566 = vpush %v914_v42 }
 0x3e6   : > { %s4561_s14 = spop %4560 }
 0x3e7   : > { %v872_v43 = vstv %s4561_s14  ;;  %s4563_s15 = spop %4562 }
 0x3e8   : > { %v873_v44 = vmul.f32 0.0009765625, %v872_v43  ;;  %v886_v45 = vstv %s4563_s15 }
 0x3e9   : > { %v887_v47 = vmul.f32 0.0009765625, %v886_v45 }
 0x3ea   : > { %v888_v46 = vmul.f32 %v873_v44, %v873_v44  ;;  %922 = vperm.xlu1 %4693, %v873_v44   ;;  %s4565_s16 = spop %4564 }
 0x3eb   : > { %v902_v48 = vstv %s4565_s16  ;;  %s4567_s17 = spop %4566 }
 0x3ec   : > { %v889_v49 = vsub.f32 %v887_v47, %v888_v46  ;;  %v903_v50 = vmul.f32 0.0009765625, %v902_v48  ;;  %v916_v51 = vstv %s4567_s17 }
 0x3ed   : > { %v917_v54 = vmul.f32 0.0009765625, %v916_v51 }
 0x3ee   : > { %v934_v52 = vadd.f32 1e-05, %v889_v49  ;;  %v918_v53 = vmul.f32 %v903_v50, %v903_v50  ;;  %927 = vperm.xlu0 %4694, %v903_v50  }
 0x3f0   : > { %4802 = vrsqrt.f32 %v934_v52  ;;  %v919_v55 = vsub.f32 %v917_v54, %v918_v53 }
 0x3f2   : > { %v935_v56 = vadd.f32 1e-05, %v919_v55  ;;  %4695 = vset.pattern.permute.xlu0 %v5004_v5 }
 0x3f3   : > { %957 = vperm.xlu0 %4695, %v5210_v35  }
 0x3f4   : > { %4804 = vrsqrt.f32 %v935_v56 }
 0x3f7   : > { %4697 = vset.pattern.permute.xlu0 %v5006_v60 }
 0x3f8   : > { %1048 = vperm.xlu0 %4697, %v5222_v37  }
 0x3fc   : > { %1063 = vperm.xlu0 %4697, %v5228_v38  }
 0x3fd   : > { %v4803_v57 = vpop.eup %4802 }
 0x3fe   : > { %940 = vperm.xlu1 %4693, %v4803_v57  }
 0x400   : > { %4703 = vset.pattern.permute.xlu0 %v4997_v0 }
 0x401   : > { %v4805_v58 = vpop.eup %4804 }
 0x402   : > { %945 = vperm.xlu1 %4693, %v4805_v58  }
 0x406   : > { %4696 = vset.pattern.permute.xlu1 %v5005_v6 }
 0x407   : > { %973 = vperm.xlu1 %4696, %v5222_v37  }
 0x40b   : > { %977 = vperm.xlu1 %4696, %v5210_v35  }
 0x40f   : > { %4698 = vset.pattern.permute.xlu1 %v5006_v60 }
 0x410   : > { %1053 = vperm.xlu1 %4698, %v5210_v35  }
 0x414   : > { %1058 = vperm.xlu1 %4698, %v5216_v36  }
 0x465   : > { %v923_v3 = vpop.permute.xlu1 %922 }
 0x466   : > { %v930_v8 = vsub.f32 %v5236_v22, %v923_v3  ;;  %v931_v15 = vsub.f32 %v5244_v29, %v923_v3 }
 0x469   : > { %v928_v4 = vpop.permute.xlu0 %927 }
 0x46a   : > { %v932_v9 = vsub.f32 %v5242_v28, %v928_v4  ;;  %v933_v10 = vsub.f32 %v5251_v34, %v928_v4 }
 0x46e   : > { %v958_v20 = vpop.permute.xlu0 %957 }
 0x479   : > { %v941_v7 = vpop.permute.xlu1 %940 }
 0x47a   : > { %v948_v11 = vmul.f32 %v941_v7, %v930_v8  ;;  %v949_v18 = vmul.f32 %v941_v7, %v931_v15 }
 0x47c   : > { %v968_v19 = vmul.f32 %v954_v1, %v948_v11  ;;  %v969_v28 = vmul.f32 %v958_v20, %v949_v18  ;;  %v1049_v11 = vpop.permute.xlu0 %1048 }
 0x47d   : > { %v946_v12 = vpop.permute.xlu1 %945 }
 0x47e   : > { %v950_v13 = vmul.f32 %v946_v12, %v932_v9  ;;  %v951_v14 = vmul.f32 %v946_v12, %v933_v10  ;;  %v4765_v9 = vld [vmem:[#allocation5 + $0x8] sm:$0xff]  }
 0x480   : > { %v970_v16 = vmul.f32 %v962_v63, %v950_v13  ;;  %v971_v17 = vmul.f32 %v966_v61, %v951_v14  ;;  %v1064_v18 = vpop.permute.xlu0 %1063 }
 0x482   : > { %v990_v21 = vadd.f32 %v982_v2, %v970_v16  ;;  %v991_v23 = vadd.f32 %v986_v62, %v971_v17  ;;  %v974_v24 = vpop.permute.xlu1 %973 }
 0x483   : > { %v988_v25 = vadd.f32 %v974_v24, %v968_v19 }
 0x484   : > { %v996_v22 = vmul.f32 1.442695, %v990_v21  ;;  %v998_v26 = vmul.f32 1.442695, %v991_v23  ;;  %v1014_v29 = vmul.f32 0.5, %v990_v21  ;;  %v1015_v32 = vmul.f32 0.5, %v991_v23 }
 0x485   : > { %v992_v34 = vmul.f32 1.442695, %v988_v25  ;;  %v1012_v33 = vmul.f32 0.5, %v988_v25  ;;  %v1006_v40 = vand.u32 2147483647, %v990_v21  ;;  %vm1030_vm6 = vcmp.gt.f32.partialorder %v990_v21, 0.0 }
 0x486   : > { %v978_v27 = vpop.permute.xlu1 %977  ;;  %4806 = vpow2.f32 %v996_v22  ;;  %v1018_v39 = vadd.f32 1.0, %v1014_v29  ;;  %v1019_v41 = vadd.f32 1.0, %v1015_v32  ;;  %v1007_v43 = vand.u32 2147483647, %v991_v23 }
 0x487   : > { %v989_v30 = vadd.f32 %v978_v27, %v969_v28  ;;  %4808 = vpow2.f32 %v998_v26  ;;  %v1016_v45 = vadd.f32 1.0, %v1012_v33  ;;  %v1004_v49 = vand.u32 2147483647, %v988_v25 }
 0x488   : > { %4810 = vpow2.f32 %v992_v34  ;;  %v1022_v48 = vmul.f32 %v1018_v39, %v990_v21  ;;  %vm1010_vm7 = vcmp.lt.f32.partialorder %v1006_v40, 0.001  ;;  %v1023_v52 = vmul.f32 %v1019_v41, %v991_v23 }
 0x489   : > { %v994_v31 = vmul.f32 1.442695, %v989_v30  ;;  %v1013_v42 = vmul.f32 0.5, %v989_v30  ;;  %vm1011_vm8 = vcmp.lt.f32.partialorder %v1007_v43, 0.001  ;;  %vm1031_vm9 = vcmp.gt.f32.partialorder %v991_v23, 0.0 }
 0x48a   : > { %v1005_v56 = vand.u32 2147483647, %v989_v30  ;;  %v1020_v59 = vmul.f32 %v1016_v45, %v988_v25  ;;  %vm1008_vm10 = vcmp.lt.f32.partialorder %v1004_v49, 0.001  ;;  %vm1028_vm12 = vcmp.gt.f32.partialorder %v988_v25, 0.0 }
 0x48b   : > { %4812 = vpow2.f32 %v994_v31  ;;  %v1017_v53 = vadd.f32 1.0, %v1013_v42  ;;  %vm1029_vm13 = vcmp.gt.f32.partialorder %v989_v30, 0.0  ;;  %v1054_v10 = vpop.permute.xlu1 %1053 }
 0x48c   : > { %vm1009_vm11 = vcmp.lt.f32.partialorder %v1005_v56, 0.001 }
 0x48d   : > { %v1021_v1 = vmul.f32 %v1017_v53, %v989_v30 }
 0x48f   : > { %v1059_v12 = vpop.permute.xlu1 %1058 }
 0x493   : > { %v4807_v44 = vpop.eup %4806 }
 0x494   : > { %v4809_v46 = vpop.eup %4808  ;;  %v4126_v47 = vadd.f32 -1.0, %v4807_v44 }
 0x495   : > { %v4811_v50 = vpop.eup %4810  ;;  %v4127_v51 = vadd.f32 -1.0, %v4809_v46 }
 0x496   : > { %v1026_v54 = vsel %vm1010_vm7, %v1022_v48, %v4126_v47  ;;  %v4124_v55 = vadd.f32 -1.0, %v4811_v50 }
 0x497   : > { %v1027_v57 = vsel %vm1011_vm8, %v1023_v52, %v4127_v51  ;;  %v1034_v58 = vsel %vm1030_vm6, %v990_v21, %v1026_v54 }
 0x498   : > { %v4813_v60 = vpop.eup %4812  ;;  %v1035_v61 = vsel %vm1031_vm9, %v991_v23, %v1027_v57  ;;  %v1024_v2 = vsel %vm1008_vm10, %v1020_v59, %v4124_v55  ;;  %v5008_v59 = vmov 5  }
 0x499   : > { %v1045_v62 = vpack.c.bf16 %v1035_v61, %v1034_v58  ;;  %v4125_v63 = vadd.f32 -1.0, %v4813_v60  ;;  %v1032_v4 = vsel %vm1028_vm12, %v988_v25, %v1024_v2  ;;  %v5007_v58 = vmov 4  }
 0x49a   : > { %4699 = vset.pattern.permute.xlu1 %v5007_v58 }
 0x49b   : > { %4408 = vmatprep.subr.bf16.mxu0 %v1045_v62  ;;  %v1025_v3 = vsel %vm1009_vm11, %v1021_v1, %v4125_v63 }
 0x49c   : > { %4409 = vmatpush3.bf16.msra.mxu0 %v1045_v62  ;;  %v1033_v7 = vsel %vm1029_vm13, %v989_v30, %v1025_v3 }
 0x49d   : > { %v1044_v8 = vpack.c.bf16 %v1033_v7, %v1032_v4 }
 0x49f   : > { %4410 = vmatprep.subr.bf16.mxu0 %v1044_v8 }
 0x4a0   : > { %4411 = vmatpush3.bf16.msra.mxu0 %v1044_v8 }
 0x4a3   : > { %4413 = vmatmul.mubr.msk.bf16.vlgmr.msra.gmra.mxu0 %vm412_vm3, %v4765_v9 }
 0x563   : > { %v4414_v13 = vpop.f32.mrf.mxu0 }
 0x564   : > { %v5303_v14 = vadd.f32 %v4414_v13, %v1059_v12 }
 0x565   : > { %v1116_v15 = vpop.f32.mrf.mxu0 }
 0x566   : > { %v5305_v16 = vadd.f32 %v1116_v15, %v1049_v11  ;;  %v1137_v17 = vsel %vm830_vm4, %v5303_v14, 0.0  ;;  %v1145_v34 = vmul.f32 %v5303_v14, %v5303_v14 }
 0x567   : > { %1138 = vadd.xlane.f32.xlu0 %v1137_v17  ;;  %v4415_v19 = vpop.f32.mrf.mxu0 }
 0x568   : > { %v5309_v20 = vadd.f32 %v4415_v19, %v1064_v18  ;;  %v1131_v21 = vsel %vm830_vm4, %v5305_v16, 0.0  ;;  %v1143_v23 = vmul.f32 %v5305_v16, %v5305_v16  ;;  %v1153_v29 = vsel %vm830_vm4, %v1145_v34, 0.0 }
 0x569   : > { %v1119_v24 = vpop.f32.mrf.mxu0  ;;  %1132 = vadd.xlane.f32.xlu1 %v1131_v21 }
 0x56a   : > { %v5315_v25 = vadd.f32 %v1119_v24, %v1054_v10  ;;  %v1147_v22 = vsel %vm830_vm4, %v1143_v23, 0.0  ;;  %v1140_v26 = vsel %vm830_vm4, %v5309_v20, 0.0  ;;  %v1146_v31 = vmul.f32 %v5309_v20, %v5309_v20 }
 0x56b   : > { %1148 = vadd.xlane.f32.xlu0 %v1147_v22 }
 0x56c   : > { %v1144_v28 = vmul.f32 %v5315_v25, %v5315_v25  ;;  %v1134_v27 = vsel %vm830_vm4, %v5315_v25, 0.0  ;;  %v1156_v32 = vsel %vm830_vm4, %v1146_v31, 0.0 }
 0x56d   : > { %1141 = vadd.xlane.f32.xlu1 %v1140_v26 }
 0x56e   : > { %v1150_v30 = vsel %vm830_vm4, %v1144_v28, 0.0 }
 0x56f   : > { %1135 = vadd.xlane.f32.xlu0 %v1134_v27 }
 0x571   : > { %1151 = vadd.xlane.f32.xlu1 %v1150_v30 }
 0x573   : > { %1154 = vadd.xlane.f32.xlu0 %v1153_v29 }
 0x575   : > { %1157 = vadd.xlane.f32.xlu1 %v1156_v32 }
 0x5f0   : > { %v1139_v33 = vpop.xlane.xlu0 %1138 }
 0x5f1   : > { %v1189_v52 = vsel %vm859_vm5, %v1139_v33, 0.0 }
 0x5f2   : > { %v1133_v39 = vpop.xlane.xlu1 %1132 }
 0x5f3   : > { %v1159_v43 = vsel %vm859_vm5, %v1133_v39, 0.0 }
 0x5f4   : > { %v1149_v40 = vpop.xlane.xlu0 %1148 }
 0x5f5   : > { %v1173_v47 = vsel %vm859_vm5, %v1149_v40, 0.0 }
 0x5f6   : > { %v1142_v41 = vpop.xlane.xlu1 %1141 }
 0x5f7   : > { %v1190_v48 = vsel %vm859_vm5, %v1142_v41, 0.0 }
 0x5f8   : > { %v1136_v42 = vpop.xlane.xlu0 %1135  ;;  %v1191_v54 = vadd.f32 %v1190_v48, %v1189_v52 }
 0x5f9   : > { %v1160_v44 = vsel %vm859_vm5, %v1136_v42, 0.0 }
 0x5fa   : > { %v1152_v45 = vpop.xlane.xlu1 %1151  ;;  %v1161_v46 = vadd.f32 %v1160_v44, %v1159_v43 }
 0x5fb   : > { %v1174_v49 = vsel %vm859_vm5, %v1152_v45, 0.0 }
 0x5fc   : > { %1162 = vadd.xlane.f32.xlu0 %v1161_v46  ;;  %v1155_v50 = vpop.xlane.xlu0 %1154  ;;  %v1175_v51 = vadd.f32 %v1174_v49, %v1173_v47 }
 0x5fd   : > { %v1203_v55 = vsel %vm859_vm5, %v1155_v50, 0.0 }
 0x5fe   : > { %v1158_v53 = vpop.xlane.xlu1 %1157  ;;  %1176 = vadd.xlane.f32.xlu1 %v1175_v51 }
 0x5ff   : > { %v1204_v56 = vsel %vm859_vm5, %v1158_v53, 0.0 }
 0x600   : > { %1192 = vadd.xlane.f32.xlu0 %v1191_v54  ;;  %v1205_v57 = vadd.f32 %v1204_v56, %v1203_v55 }
 0x602   : > { %1206 = vadd.xlane.f32.xlu1 %v1205_v57 }
 0x613   : > { %1260 = vperm.xlu1 %4699, %v5216_v36  }
 0x617   : > { %1264 = vperm.xlu1 %4699, %v5228_v38  }
 0x61b   : > { %4700 = vset.pattern.permute.xlu1 %v5008_v59 }
 0x61c   : > { %1280 = vperm.xlu1 %4700, %v5216_v36  }
 0x620   : > { %1284 = vperm.xlu1 %4700, %v5228_v38  }
 0x624   : > { %4701 = vset.pattern.permute.xlu1 %v5007_v58 }
 0x625   : > { %1252 = vperm.xlu1 %4701, %v5222_v37  }
 0x629   : > { %4702 = vset.pattern.permute.xlu1 %v4997_v0 }
 0x685   : > { %v1163_v60 = vpop.xlane.xlu0 %1162 }
 0x686   : > { %v1164_v61 = vrot.slane %v1163_v60, 4 }
 0x687   : > { %v1177_v62 = vpop.xlane.xlu1 %1176 }
 0x688   : > { %v1165_v63 = vadd.f32 %v1164_v61, %v1163_v60  ;;  %v1178_v1 = vrot.slane %v1177_v62, 4 }
 0x689   : > { %v1193_v2 = vpop.xlane.xlu0 %1192 }
 0x68a   : > { %v1179_v3 = vadd.f32 %v1178_v1, %v1177_v62  ;;  %v1194_v4 = vrot.slane %v1193_v2, 4  ;;  %v1166_v7 = vrot.slane %v1165_v63, 2 }
 0x68b   : > { %v1207_v8 = vpop.xlane.xlu1 %1206 }
 0x68c   : > { %v1195_v9 = vadd.f32 %v1194_v4, %v1193_v2  ;;  %v1208_v36 = vrot.slane %v1207_v8, 4  ;;  %v1167_v10 = vadd.f32 %v1166_v7, %v1165_v63  ;;  %v1180_v38 = vrot.slane %v1179_v3, 2 }
 0x68e   : > { %v1209_v11 = vadd.f32 %v1208_v36, %v1207_v8  ;;  %v1168_v12 = vrot.slane %v1167_v10, 1  ;;  %v1181_v13 = vadd.f32 %v1180_v38, %v1179_v3  ;;  %v1196_v15 = vrot.slane %v1195_v9, 2 }
 0x68f   : > { %v1261_v49 = vpop.permute.xlu1 %1260 }
 0x690   : > { %v1169_v17 = vadd.f32 %v1168_v12, %v1167_v10  ;;  %v1182_v18 = vrot.slane %v1181_v13, 1  ;;  %v1197_v19 = vadd.f32 %v1196_v15, %v1195_v9  ;;  %v1210_v21 = vrot.slane %v1209_v11, 2 }
 0x692   : > { %4568 = vpush %v1169_v17  ;;  %v1183_v23 = vadd.f32 %v1182_v18, %v1181_v13  ;;  %v1198_v24 = vrot.slane %v1197_v19, 1  ;;  %v1211_v22 = vadd.f32 %v1210_v21, %v1209_v11 }
 0x693   : > { %v1265_v50 = vpop.permute.xlu1 %1264 }
 0x694   : > { %4570 = vpush %v1183_v23  ;;  %v1199_v26 = vadd.f32 %v1198_v24, %v1197_v19  ;;  %v1212_v28 = vrot.slane %v1211_v22, 1 }
 0x696   : > { %4572 = vpush %v1199_v26  ;;  %v1213_v27 = vadd.f32 %v1212_v28, %v1211_v22 }
 0x697   : > { %v1281_v51 = vpop.permute.xlu1 %1280 }
 0x698   : > { %4574 = vpush %v1213_v27 }
 0x69b   : > { %v1285_v52 = vpop.permute.xlu1 %1284 }
 0x6a0   : > { %v1253_v53 = vpop.permute.xlu1 %1252 }
 0x6c3   : > { %s4569_s19 = spop %4568 }
 0x6c4   : > { %v1171_v34 = vstv %s4569_s19 }
 0x6c5   : > { %v1172_v30 = vmul.f32 0.0009765625, %v1171_v34  ;;  %s4571_s20 = spop %4570 }
 0x6c6   : > { %v1185_v31 = vstv %s4571_s20 }
 0x6c7   : > { %v1187_v29 = vmul.f32 %v1172_v30, %v1172_v30  ;;  %v1186_v32 = vmul.f32 0.0009765625, %v1185_v31  ;;  %1221 = vperm.xlu1 %4702, %v1172_v30   ;;  %s4573_s29 = spop %4572 }
 0x6c8   : > { %v1201_v33 = vstv %s4573_s29 }
 0x6c9   : > { %v1188_v39 = vsub.f32 %v1186_v32, %v1187_v29  ;;  %v1202_v40 = vmul.f32 0.0009765625, %v1201_v33  ;;  %s4575_s30 = spop %4574 }
 0x6ca   : > { %v1215_v41 = vstv %s4575_s30 }
 0x6cb   : > { %v1233_v42 = vadd.f32 1e-05, %v1188_v39  ;;  %v1217_v43 = vmul.f32 %v1202_v40, %v1202_v40  ;;  %v1216_v44 = vmul.f32 0.0009765625, %v1215_v41  ;;  %1226 = vperm.xlu0 %4703, %v1202_v40  }
 0x6cd   : > { %4814 = vrsqrt.f32 %v1233_v42  ;;  %v1218_v45 = vsub.f32 %v1216_v44, %v1217_v43 }
 0x6cf   : > { %v1234_v46 = vadd.f32 1e-05, %v1218_v45  ;;  %4704 = vset.pattern.permute.xlu0 %v5007_v58 }
 0x6d0   : > { %1256 = vperm.xlu0 %4704, %v5210_v35  }
 0x6d1   : > { %4816 = vrsqrt.f32 %v1234_v46  ;;  %v4886_v46 = vld [vmem:[%s5165_s23] sm:$0xff] }
 0x6da   : > { %v4815_v47 = vpop.eup %4814 }
 0x6db   : > { %1239 = vperm.xlu1 %4702, %v4815_v47  }
 0x6de   : > { %v4817_v48 = vpop.eup %4816 }
 0x6df   : > { %1244 = vperm.xlu1 %4702, %v4817_v48  }
 0x6e3   : > { %4705 = vset.pattern.permute.xlu1 %v5008_v59 }
 0x6e4   : > { %1272 = vperm.xlu1 %4705, %v5222_v37  }
 0x6e8   : > { %1276 = vperm.xlu1 %4705, %v5210_v35  }
 0x742   : > { %v1222_v54 = vpop.permute.xlu1 %1221 }
 0x743   : > { %v1229_v57 = vsub.f32 %v5305_v16, %v1222_v54  ;;  %v1230_v35 = vsub.f32 %v5315_v25, %v1222_v54 }
 0x746   : > { %v1227_v55 = vpop.permute.xlu0 %1226 }
 0x747   : > { %v1231_v58 = vsub.f32 %v5303_v14, %v1227_v55  ;;  %v1232_v60 = vsub.f32 %v5309_v20, %v1227_v55 }
 0x74b   : > { %v1257_v4 = vpop.permute.xlu0 %1256 }
 0x756   : > { %v1240_v56 = vpop.permute.xlu1 %1239 }
 0x757   : > { %v1247_v61 = vmul.f32 %v1240_v56, %v1229_v57  ;;  %v1248_v2 = vmul.f32 %v1240_v56, %v1230_v35  ;;  %v4888_v57 = vld [vmem:[%s5165_s23 + $0x8] sm:$0xff] }
 0x759   : > { %v1267_v3 = vmul.f32 %v1253_v53, %v1247_v61  ;;  %v1268_v10 = vmul.f32 %v1257_v4, %v1248_v2  ;;  %v4770_v4 = vld [vmem:[#allocation3 + $0x40] sm:$0xff]  }
 0x75a   : > { %v1245_v59 = vpop.permute.xlu1 %1244  ;;  %4420 = vmatprep.mubr.msk.bf16.mxu1 %vm412_vm3, %v4770_v4 }
 0x75b   : > { %v1249_v62 = vmul.f32 %v1245_v59, %v1231_v58  ;;  %v1250_v37 = vmul.f32 %v1245_v59, %v1232_v60  ;;  %v4889_v59 = vld [vmem:[%s5165_s23 + $0x18] sm:$0xff] }
 0x75d   : > { %v1269_v63 = vmul.f32 %v1261_v49, %v1249_v62  ;;  %v1270_v1 = vmul.f32 %v1265_v50, %v1250_v37 }
 0x75f   : > { %v1289_v7 = vadd.f32 %v1281_v51, %v1269_v63  ;;  %v1290_v8 = vadd.f32 %v1285_v52, %v1270_v1  ;;  %v1273_v9 = vpop.permute.xlu1 %1272  ;;  %v4887_v52 = vld [vmem:[%s5165_s23 + $0x10] sm:$0xff]  ;;  %s5009_s23 = smov 125  }
 0x760   : > { %v1287_v36 = vadd.f32 %v1273_v9, %v1267_v3  ;;  %v4772_v9 = vld [vmem:[#allocation3 + $0x30] sm:$0xff]  }
 0x761   : > { %v1295_v16 = vmul.f32 1.442695, %v1289_v7  ;;  %v1297_v20 = vmul.f32 1.442695, %v1290_v8  ;;  %v1313_v25 = vmul.f32 0.5, %v1289_v7  ;;  %v1314_v15 = vmul.f32 0.5, %v1290_v8  ;;  %4428 = vmatprep.mubr.msk.bf16.mxu0 %vm412_vm3, %v4772_v9 }
 0x762   : > { %v1291_v14 = vmul.f32 1.442695, %v1287_v36  ;;  %v1311_v13 = vmul.f32 0.5, %v1287_v36  ;;  %v1305_v19 = vand.u32 2147483647, %v1289_v7  ;;  %vm1327_vm0 = vcmp.gt.f32.partialorder %v1287_v36, 0.0 }
 0x763   : > { %v1277_v38 = vpop.permute.xlu1 %1276  ;;  %4818 = vpow2.f32 %v1295_v16  ;;  %v1317_v17 = vadd.f32 1.0, %v1313_v25  ;;  %v1303_v23 = vand.u32 2147483647, %v1287_v36  ;;  %v1318_v22 = vadd.f32 1.0, %v1314_v15  ;;  %v4771_v25 = vld [vmem:[#allocation3 + $0x48] sm:$0xff]  }
 0x764   : > { %v1288_v11 = vadd.f32 %v1277_v38, %v1268_v10  ;;  %4820 = vpow2.f32 %v1291_v14  ;;  %v1315_v18 = vadd.f32 1.0, %v1311_v13  ;;  %v1306_v34 = vand.u32 2147483647, %v1290_v8  ;;  %v4774_v13 = vld [vmem:[#allocation3 + $0x50] sm:$0xff]  }
 0x765   : > { %4822 = vpow2.f32 %v1297_v20  ;;  %v1321_v27 = vmul.f32 %v1317_v17, %v1289_v7  ;;  %vm1309_vm14 = vcmp.lt.f32.partialorder %v1305_v19, 0.001  ;;  %vm1307_vm15 = vcmp.lt.f32.partialorder %v1303_v23, 0.001  ;;  %v4775_v23 = vld [vmem:[#allocation3 + $0x58] sm:$0xff]  }
 0x766   : > { %v1293_v12 = vmul.f32 1.442695, %v1288_v11  ;;  %v1312_v21 = vmul.f32 0.5, %v1288_v11  ;;  %v1319_v29 = vmul.f32 %v1315_v18, %v1287_v36  ;;  %v1304_v39 = vand.u32 2147483647, %v1288_v11  ;;  %v4773_v18 = vld [vmem:[#allocation3 + $0x38] sm:$0xff]  }
 0x767   : > { %vm1329_vm1 = vcmp.gt.f32.partialorder %v1289_v7, 0.0  ;;  %v1322_v42 = vmul.f32 %v1318_v22, %v1290_v8  ;;  %vm1310_vm6 = vcmp.lt.f32.partialorder %v1306_v34, 0.001  ;;  %vm1328_vm8 = vcmp.gt.f32.partialorder %v1288_v11, 0.0 }
 0x768   : > { %4824 = vpow2.f32 %v1293_v12  ;;  %v1316_v32 = vadd.f32 1.0, %v1312_v21  ;;  %vm1308_vm7 = vcmp.lt.f32.partialorder %v1304_v39, 0.001  ;;  %vm1330_vm9 = vcmp.gt.f32.partialorder %v1290_v8, 0.0 }
 0x769   : > { %v5011_v34 = vmov 6  }
 0x76a   : > { %v1320_v49 = vmul.f32 %v1316_v32, %v1288_v11  ;;  %4707 = vset.pattern.permute.xlu1 %v5011_v34  ;;  %4706 = vset.pattern.permute.xlu0 %v5011_v34  ;;  %v5434_v32 = vld [vmem:[%s5931_s4 + $0x18] sm:$0xff] }
 0x770   : > { %v4819_v24 = vpop.eup %4818 }
 0x771   : > { %v4821_v26 = vpop.eup %4820  ;;  %v4134_v28 = vadd.f32 -1.0, %v4819_v24 }
 0x772   : > { %v4823_v30 = vpop.eup %4822  ;;  %v4132_v31 = vadd.f32 -1.0, %v4821_v26 }
 0x773   : > { %v1325_v33 = vsel %vm1309_vm14, %v1321_v27, %v4134_v28  ;;  %v4135_v40 = vadd.f32 -1.0, %v4823_v30  ;;  %v5416_v30 = vld [vmem:[%s5931_s4 + $0x8] sm:$0xff] }
 0x774   : > { %v1323_v41 = vsel %vm1307_vm15, %v1319_v29, %v4132_v31  ;;  %v1333_v45 = vsel %vm1329_vm1, %v1289_v7, %v1325_v33  ;;  %v5422_v31 = vld [vmem:[%s5931_s4] sm:$0xff]  ;;  %v5428_v29 = vld [vmem:[%s5931_s4 + $0x10] sm:$0xff] }
 0x775   : > { %v4825_v43 = vpop.eup %4824  ;;  %v1331_v44 = vsel %vm1327_vm0, %v1287_v36, %v1323_v41  ;;  %v1326_v50 = vsel %vm1310_vm6, %v1322_v42, %v4135_v40  ;;  %v5363_v53 = vadd.f32 %v4887_v52, %v1333_v45 }
 0x776   : > { %v5358_v47 = vadd.f32 %v4886_v46, %v1331_v44  ;;  %v4133_v48 = vadd.f32 -1.0, %v4825_v43  ;;  %v1334_v56 = vsel %vm1330_vm9, %v1290_v8, %v1326_v50 }
 0x777   : > { %v4250_v60 = vpack.c.bf16 %v5363_v53, %v5363_v53  ;;  %v5374_v62 = vadd.f32 %v4889_v59, %v1334_v56 }
 0x778   : > { %v4248_v51 = vpack.c.bf16 %v5358_v47, %v5358_v47  ;;  %v1324_v54 = vsel %vm1308_vm7, %v1320_v49, %v4133_v48 }
 0x779   : > { %v1332_v55 = vsel %vm1328_vm8, %v1288_v11, %v1324_v54  ;;  %v4251_v37 = vpack.c.bf16 %v5374_v62, %v5374_v62 }
 0x77a   : > { %1351 = vrot.lane.b32.xlu0 %v4248_v51, %s4999_s25  ;;  %v5367_v58 = vadd.f32 %v4888_v57, %v1332_v55 }
 0x77c   : > { %v4249_v61 = vpack.c.bf16 %v5367_v58, %v5367_v58 }
 0x77e   : > { %1355 = vrot.lane.b32.xlu0 %v4250_v60, %s4999_s25  ;;  %1353 = vrot.lane.b32.xlu1 %v4249_v61, %s4999_s25 }
 0x782   : > { %1371 = vrot.lane.b32.xlu0 %v4250_v60, %s4998_s24  ;;  %1357 = vrot.lane.b32.xlu1 %v4251_v37, %s4999_s25 }
 0x786   : > { %1367 = vrot.lane.b32.xlu0 %v4248_v51, %s4998_s24  ;;  %1373 = vrot.lane.b32.xlu1 %v4251_v37, %s4998_s24 }
 0x78a   : > { %1369 = vrot.lane.b32.xlu1 %v4249_v61, %s4998_s24 }
 0x7ec   : > { %v1352_v35 = vpop.permute.xlu0 %1351 }
 0x7ed   : > { %1363 = vst.msk [vmem:[#allocation2] sm:$0xf] %vm347_vm2, %v1352_v35 }
 0x7f0   : > { %v1356_v63 = vpop.permute.xlu0 %1355  ;;  %v1354_v1 = vpop.permute.xlu1 %1353 }
 0x7f1   : > { %1365 = vst.msk [vmem:[#allocation2 + $0x8] sm:$0xf] %vm347_vm2, %v1356_v63  ;;  %1364 = vst.msk [vmem:[#allocation2 + $0x4] sm:$0xf] %vm347_vm2, %v1354_v1 }
 0x7f4   : > { %v1372_v2 = vpop.permute.xlu0 %1371  ;;  %v1358_v3 = vpop.permute.xlu1 %1357 }
 0x7f5   : > { %1381 = vst.msk [vmem:[#allocation2 + $0x18] sm:$0xf] %vm347_vm2, %v1372_v2  ;;  %1366 = vst.msk [vmem:[#allocation2 + $0xc] sm:$0xf] %vm347_vm2, %v1358_v3 }
 0x7f8   : > { %v1368_v7 = vpop.permute.xlu0 %1367  ;;  %v1374_v8 = vpop.permute.xlu1 %1373  ;;  %v4767_v10 = vld [vmem:[#allocation2] sm:$0xff]  }
 0x7f9   : > { %1379 = vst.msk [vmem:[#allocation2 + $0x10] sm:$0xf] %vm347_vm2, %v1368_v7  ;;  %1382 = vst.msk [vmem:[#allocation2 + $0x1c] sm:$0xf] %vm347_vm2, %v1374_v8 }
 0x7fc   : > { %v1370_v36 = vpop.permute.xlu1 %1369  ;;  %v4766_v16 = vld [vmem:[#allocation2 + $0x8] sm:$0xff]  }
 0x7fd   : > { %1380 = vst.msk [vmem:[#allocation2 + $0x14] sm:$0xf] %vm347_vm2, %v1370_v36  ;;  %1423 = vrot.lane.b32.xlu0 %v4766_v16, %s5001_s27 }
 0x800   : > { %v4768_v14 = vld [vmem:[#allocation2 + $0x18] sm:$0xff]  }
 0x801   : > { %1421 = vrot.lane.b32.xlu0 %v4767_v10, %s5001_s27  ;;  %1504 = vrot.lane.b32.xlu1 %v4768_v14, %s5009_s23 }
 0x804   : > { %v4769_v38 = vld [vmem:[#allocation2 + $0x10] sm:$0xff]  }
 0x805   : > { %1580 = vrot.lane.b32.xlu0 %v4768_v14, %s5002_s28  ;;  %1502 = vrot.lane.b32.xlu1 %v4769_v38, %s5009_s23 }
 0x809   : > { %1578 = vrot.lane.b32.xlu0 %v4769_v38, %s5002_s28  ;;  %1645 = vrot.lane.b32.xlu1 %v4768_v14, %s5001_s27 }
 0x80d   : > { %1700 = vrot.lane.b32.xlu0 %v4766_v16, %s5000_s26  ;;  %1643 = vrot.lane.b32.xlu1 %v4769_v38, %s5001_s27 }
 0x811   : > { %1698 = vrot.lane.b32.xlu0 %v4767_v10, %s5000_s26  ;;  %1755 = vrot.lane.b32.xlu1 %v4766_v16, %s5010_s7 }
 0x815   : > { %1753 = vrot.lane.b32.xlu1 %v4767_v10, %s5010_s7  ;;  %1833 = vperm.xlu0 %4706, %v5422_v31  }
 0x819   : > { %1837 = vperm.xlu1 %4707, %v5416_v30   ;;  %1845 = vperm.xlu0 %4706, %v5434_v32  }
 0x81d   : > { %1841 = vperm.xlu1 %4707, %v5428_v29   ;;  %4711 = vset.pattern.permute.xlu0 %v4997_v0 }
 0x86f   : > { %v1424_v20 = vpop.permute.xlu0 %1423 }
 0x870   : > { %4416 = vmatprep.subr.bf16.mxu1 %v1424_v20 }
 0x871   : > { %4417 = vmatpush3.bf16.msra.mxu1 %v1424_v20 }
 0x873   : > { %v1422_v11 = vpop.permute.xlu0 %1421  ;;  %v1505_v12 = vpop.permute.xlu1 %1504 }
 0x874   : > { %4418 = vmatprep.subr.bf16.mxu1 %v1422_v11  ;;  %4424 = vmatprep.subr.bf16.mxu0 %v1505_v12 }
 0x875   : > { %4419 = vmatpush3.bf16.msra.mxu1 %v1422_v11  ;;  %4425 = vmatpush3.bf16.msra.mxu0 %v1505_v12 }
 0x877   : > { %v1581_v15 = vpop.permute.xlu0 %1580  ;;  %v1503_v17 = vpop.permute.xlu1 %1502 }
 0x878   : > { %4421 = vmatmul.mubr.msk.bf16.vlgmr.msra.gmra.mxu1 %vm412_vm3, %v4771_v25  ;;  %4426 = vmatprep.subr.bf16.mxu0 %v1503_v17 }
 0x879   : > { %4432 = vmatprep.subr.bf16.mxu1 %v1581_v15  ;;  %4427 = vmatpush3.bf16.msra.mxu0 %v1503_v17 }
 0x87a   : > { %4433 = vmatpush3.bf16.msra.mxu1 %v1581_v15  ;;  %4436 = vmatprep.mubr.msk.bf16.mxu1 %vm412_vm3, %v4774_v13 }
 0x87b   : > { %v1579_v19 = vpop.permute.xlu0 %1578  ;;  %v1646_v21 = vpop.permute.xlu1 %1645 }
 0x87c   : > { %4429 = vmatmul.mubr.msk.bf16.vlgmr.msra.gmra.mxu0 %vm412_vm3, %v4773_v18  ;;  %4434 = vmatprep.subr.bf16.mxu1 %v1579_v19 }
 0x87d   : > { %4440 = vmatprep.subr.bf16.mxu0 %v1646_v21  ;;  %4444 = vmatprep.mubr.msk.bf16.mxu0 %vm412_vm3, %v4770_v4 }
 0x87e   : > { %4435 = vmatpush3.bf16.msra.mxu1 %v1579_v19  ;;  %4441 = vmatpush3.bf16.msra.mxu0 %v1646_v21 }
 0x87f   : > { %v1701_v24 = vpop.permute.xlu0 %1700  ;;  %v1644_v22 = vpop.permute.xlu1 %1643 }
 0x880   : > { %4442 = vmatprep.subr.bf16.mxu0 %v1644_v22  ;;  %4448 = vmatprep.subr.bf16.mxu1 %v1701_v24 }
 0x881   : > { %4437 = vmatmul.mubr.msk.bf16.vlgmr.msra.gmra.mxu1 %vm412_vm3, %v4775_v23 }
 0x882   : > { %4443 = vmatpush3.bf16.msra.mxu0 %v1644_v22  ;;  %4449 = vmatpush3.bf16.msra.mxu1 %v1701_v24 }
 0x883   : > { %v1699_v26 = vpop.permute.xlu0 %1698  ;;  %v1756_v28 = vpop.permute.xlu1 %1755  ;;  %4452 = vmatprep.mubr.msk.bf16.mxu1 %vm412_vm3, %v4772_v9 }
 0x884   : > { %4450 = vmatprep.subr.bf16.mxu1 %v1699_v26  ;;  %4456 = vmatprep.subr.bf16.mxu0 %v1756_v28 }
 0x885   : > { %4445 = vmatmul.mubr.msk.bf16.vlgmr.msra.gmra.mxu0 %vm412_vm3, %v4771_v25 }
 0x886   : > { %4451 = vmatpush3.bf16.msra.mxu1 %v1699_v26  ;;  %4457 = vmatpush3.bf16.msra.mxu0 %v1756_v28 }
 0x887   : > { %v1754_v27 = vpop.permute.xlu1 %1753  ;;  %4460 = vmatprep.mubr.msk.bf16.mxu0 %vm412_vm3, %v4774_v13 }
 0x888   : > { %4458 = vmatprep.subr.bf16.mxu0 %v1754_v27 }
 0x889   : > { %4453 = vmatmul.mubr.msk.bf16.vlgmr.msra.gmra.mxu1 %vm412_vm3, %v4773_v18 }
 0x88a   : > { %4459 = vmatpush3.bf16.msra.mxu0 %v1754_v27 }
 0x88d   : > { %4461 = vmatmul.mubr.msk.bf16.vlgmr.msra.gmra.mxu0 %vm412_vm3, %v4775_v23 }
 0x890   : > { %v1834_v15 = vpop.permute.xlu0 %1833 }
 0x894   : > { %v1838_v13 = vpop.permute.xlu1 %1837  ;;  %v1846_v18 = vpop.permute.xlu0 %1845 }
 0x898   : > { %v1842_v17 = vpop.permute.xlu1 %1841 }
 0x938   : > { %v4422_v33 = vpop.f32.mrf.mxu1 }
 0x93a   : > { %v1467_v39 = vpop.f32.mrf.mxu1 }
 0x93c   : > { %v4423_v40 = vpop.f32.mrf.mxu1  ;;  %v4430_v41 = vpop.f32.mrf.mxu0 }
 0x93d   : > { %v1557_v42 = vadd.f32 %v4430_v41, %v4422_v33 }
 0x93e   : > { %v1470_v43 = vpop.f32.mrf.mxu1  ;;  %v1548_v44 = vpop.f32.mrf.mxu0 }
 0x93f   : > { %v1549_v45 = vadd.f32 %v1548_v44, %v1467_v39 }
 0x940   : > { %v4431_v46 = vpop.f32.mrf.mxu0 }
 0x941   : > { %v4438_v48 = vpop.f32.mrf.mxu1  ;;  %v1560_v49 = vadd.f32 %v4431_v46, %v4423_v40 }
 0x942   : > { %v1641_v50 = vadd.f32 %v4438_v48, %v1557_v42  ;;  %v1551_v51 = vpop.f32.mrf.mxu0 }
 0x943   : > { %v1552_v52 = vadd.f32 %v1551_v51, %v1470_v43  ;;  %v1624_v54 = vpop.f32.mrf.mxu1 }
 0x944   : > { %v1639_v55 = vadd.f32 %v1624_v54, %v1549_v45 }
 0x945   : > { %v4439_v56 = vpop.f32.mrf.mxu1  ;;  %v4446_v57 = vpop.f32.mrf.mxu0 }
 0x946   : > { %v1642_v60 = vadd.f32 %v4439_v56, %v1560_v49 }
 0x947   : > { %v1627_v61 = vpop.f32.mrf.mxu1  ;;  %v1683_v59 = vpop.f32.mrf.mxu0 }
 0x948   : > { %v1640_v37 = vadd.f32 %v1627_v61, %v1552_v52 }
 0x949   : > { %v4447_v35 = vpop.f32.mrf.mxu0  ;;  %v4454_v63 = vpop.f32.mrf.mxu1 }
 0x94a   : > { %v1747_v10 = vadd.f32 %v4454_v63, %v4446_v57 }
 0x94b   : > { %v1686_v1 = vpop.f32.mrf.mxu0  ;;  %v1738_v2 = vpop.f32.mrf.mxu1 }
 0x94c   : > { %v1739_v7 = vadd.f32 %v1738_v2, %v1683_v59 }
 0x94d   : > { %v4455_v3 = vpop.f32.mrf.mxu1  ;;  %v4462_v4 = vpop.f32.mrf.mxu0 }
 0x94e   : > { %v1810_v20 = vadd.f32 %v4462_v4, %v1747_v10  ;;  %v1750_v12 = vadd.f32 %v4455_v3, %v4447_v35 }
 0x94f   : > { %v1741_v8 = vpop.f32.mrf.mxu1  ;;  %v1793_v9 = vpop.f32.mrf.mxu0 }
 0x950   : > { %v1808_v36 = vadd.f32 %v1793_v9, %v1739_v7  ;;  %v1742_v14 = vadd.f32 %v1741_v8, %v1686_v1 }
 0x951   : > { %v4463_v16 = vpop.f32.mrf.mxu0 }
 0x952   : > { %1816 = vrot.lane.b32.xlu1 %v1808_v36, %s5003_s13  ;;  %v1811_v25 = vadd.f32 %v4463_v16, %v1750_v12 }
 0x953   : > { %v1796_v38 = vpop.f32.mrf.mxu0 }
 0x954   : > { %v1809_v11 = vadd.f32 %v1796_v38, %v1742_v14  ;;  %v5012_v38 = vmov 7  }
 0x955   : > { %4708 = vset.pattern.permute.xlu1 %v5012_v38 }
 0x956   : > { %1820 = vrot.lane.b32.xlu1 %v1810_v20, %s5003_s13  ;;  %1818 = vrot.lane.b32.xlu0 %v1809_v11, %s5003_s13  ;;  %v5013_v20 = vmov 8  }
 0x95a   : > { %1822 = vrot.lane.b32.xlu0 %v1811_v25, %s5003_s13 }
 0x9c4   : > { %v1817_v19 = vpop.permute.xlu1 %1816 }
 0x9c5   : > { %v1828_v21 = vsel %vm412_vm3, %v1639_v55, %v1817_v19 }
 0x9c6   : > { %v5443_v23 = vadd.f32 %v1834_v15, %v1828_v21 }
 0x9c8   : > { %v1819_v24 = vpop.permute.xlu0 %1818  ;;  %v1821_v22 = vpop.permute.xlu1 %1820  ;;  %v1852_v26 = vsel %vm830_vm4, %v5443_v23, 0.0  ;;  %v1864_v41 = vmul.f32 %v5443_v23, %v5443_v23 }
 0x9c9   : > { %v1829_v28 = vsel %vm412_vm3, %v1640_v37, %v1819_v24  ;;  %v1830_v27 = vsel %vm412_vm3, %v1641_v50, %v1821_v22  ;;  %1853 = vadd.xlane.f32.xlu1 %v1852_v26 }
 0x9ca   : > { %v5449_v34 = vadd.f32 %v1842_v17, %v1830_v27  ;;  %v5451_v33 = vadd.f32 %v1838_v13, %v1829_v28  ;;  %v1868_v45 = vsel %vm830_vm4, %v1864_v41, 0.0 }
 0x9cc   : > { %v1823_v39 = vpop.permute.xlu0 %1822  ;;  %v1858_v40 = vsel %vm830_vm4, %v5449_v34, 0.0  ;;  %v1865_v46 = vmul.f32 %v5451_v33, %v5451_v33  ;;  %v1855_v49 = vsel %vm830_vm4, %v5451_v33, 0.0  ;;  %v1866_v51 = vmul.f32 %v5449_v34, %v5449_v34 }
 0x9cd   : > { %v1831_v42 = vsel %vm412_vm3, %v1642_v60, %v1823_v39  ;;  %1859 = vadd.xlane.f32.xlu0 %v1858_v40 }
 0x9ce   : > { %v5458_v43 = vadd.f32 %v1846_v18, %v1831_v42  ;;  %v1871_v48 = vsel %vm830_vm4, %v1865_v46, 0.0  ;;  %v1874_v54 = vsel %vm830_vm4, %v1866_v51, 0.0 }
 0x9d0   : > { %v1861_v44 = vsel %vm830_vm4, %v5458_v43, 0.0  ;;  %v1867_v50 = vmul.f32 %v5458_v43, %v5458_v43 }
 0x9d1   : > { %1862 = vadd.xlane.f32.xlu1 %v1861_v44  ;;  %1869 = vadd.xlane.f32.xlu0 %v1868_v45 }
 0x9d2   : > { %v1877_v52 = vsel %vm830_vm4, %v1867_v50, 0.0 }
 0x9d5   : > { %1872 = vadd.xlane.f32.xlu1 %v1871_v48  ;;  %1856 = vadd.xlane.f32.xlu0 %v1855_v49 }
 0x9d9   : > { %1878 = vadd.xlane.f32.xlu1 %v1877_v52  ;;  %1875 = vadd.xlane.f32.xlu0 %v1874_v54 }
 0xa52   : > { %v1854_v55 = vpop.xlane.xlu1 %1853 }
 0xa53   : > { %v1880_v37 = vsel %vm859_vm5, %v1854_v55, 0.0 }
 0xa56   : > { %v1860_v56 = vpop.xlane.xlu0 %1859 }
 0xa57   : > { %v1910_v9 = vsel %vm859_vm5, %v1860_v56, 0.0 }
 0xa5a   : > { %v1870_v57 = vpop.xlane.xlu0 %1869  ;;  %v1863_v60 = vpop.xlane.xlu1 %1862 }
 0xa5b   : > { %v1894_v35 = vsel %vm859_vm5, %v1870_v57, 0.0  ;;  %v1911_v4 = vsel %vm859_vm5, %v1863_v60, 0.0 }
 0xa5c   : > { %v1912_v10 = vadd.f32 %v1911_v4, %v1910_v9  ;;  %v4776_v9 = vld [vmem:[#allocation5 + $0x10] sm:$0xff]  }
 0xa5d   : > { %4468 = vmatprep.mubr.msk.bf16.mxu1 %vm412_vm3, %v4776_v9 }
 0xa5e   : > { %v1857_v61 = vpop.xlane.xlu0 %1856  ;;  %v1873_v59 = vpop.xlane.xlu1 %1872 }
 0xa5f   : > { %v1881_v63 = vsel %vm859_vm5, %v1857_v61, 0.0  ;;  %v1895_v1 = vsel %vm859_vm5, %v1873_v59, 0.0 }
 0xa60   : > { %v1882_v2 = vadd.f32 %v1881_v63, %v1880_v37  ;;  %v1896_v3 = vadd.f32 %v1895_v1, %v1894_v35 }
 0xa62   : > { %v1876_v7 = vpop.xlane.xlu0 %1875  ;;  %1883 = vadd.xlane.f32.xlu0 %v1882_v2  ;;  %1897 = vadd.xlane.f32.xlu1 %v1896_v3  ;;  %v1879_v8 = vpop.xlane.xlu1 %1878 }
 0xa63   : > { %v1924_v36 = vsel %vm859_vm5, %v1876_v7, 0.0  ;;  %v1925_v16 = vsel %vm859_vm5, %v1879_v8, 0.0 }
 0xa64   : > { %v1926_v14 = vadd.f32 %v1925_v16, %v1924_v36  ;;  %v5501_v36 = vld [vmem:[%s5931_s4] sm:$0xff]  ;;  %v5014_v16 = vmov 9  }
 0xa66   : > { %1913 = vadd.xlane.f32.xlu0 %v1912_v10  ;;  %1927 = vadd.xlane.f32.xlu1 %v1926_v14  ;;  %v5506_v10 = vld [vmem:[%s5931_s4 + $0x10] sm:$0xff] }
 0xa77   : > { %1981 = vperm.xlu1 %4708, %v5428_v29  }
 0xa7b   : > { %1985 = vperm.xlu1 %4708, %v5434_v32  }
 0xa7f   : > { %4709 = vset.pattern.permute.xlu1 %v5013_v20 }
 0xa80   : > { %2001 = vperm.xlu1 %4709, %v5428_v29  }
 0xa84   : > { %2005 = vperm.xlu1 %4709, %v5434_v32  }
 0xa88   : > { %4710 = vset.pattern.permute.xlu1 %v4997_v0 }
 0xaeb   : > { %v1884_v11 = vpop.xlane.xlu0 %1883  ;;  %v1898_v12 = vpop.xlane.xlu1 %1897 }
 0xaec   : > { %v1885_v25 = vrot.slane %v1884_v11, 4  ;;  %v1899_v13 = vrot.slane %v1898_v12, 4 }
 0xaee   : > { %v1886_v15 = vadd.f32 %v1885_v25, %v1884_v11  ;;  %v1900_v17 = vadd.f32 %v1899_v13, %v1898_v12 }
 0xaef   : > { %v1914_v18 = vpop.xlane.xlu0 %1913  ;;  %v1928_v19 = vpop.xlane.xlu1 %1927 }
 0xaf0   : > { %v1915_v21 = vrot.slane %v1914_v18, 4  ;;  %v1929_v24 = vrot.slane %v1928_v19, 4  ;;  %v1887_v22 = vrot.slane %v1886_v15, 2  ;;  %v1901_v26 = vrot.slane %v1900_v17, 2 }
 0xaf2   : > { %v1916_v28 = vadd.f32 %v1915_v21, %v1914_v18  ;;  %v1930_v27 = vadd.f32 %v1929_v24, %v1928_v19  ;;  %v1888_v39 = vadd.f32 %v1887_v22, %v1886_v15  ;;  %v1902_v29 = vadd.f32 %v1901_v26, %v1900_v17 }
 0xaf3   : > { %v1982_v14 = vpop.permute.xlu1 %1981 }
 0xaf4   : > { %v1889_v40 = vrot.slane %v1888_v39, 1  ;;  %v1903_v32 = vrot.slane %v1902_v29, 1  ;;  %v1917_v41 = vrot.slane %v1916_v28, 2  ;;  %v1931_v42 = vrot.slane %v1930_v27, 2 }
 0xaf6   : > { %v1890_v44 = vadd.f32 %v1889_v40, %v1888_v39  ;;  %v1904_v45 = vadd.f32 %v1903_v32, %v1902_v29  ;;  %v1918_v46 = vadd.f32 %v1917_v41, %v1916_v28  ;;  %v1932_v48 = vadd.f32 %v1931_v42, %v1930_v27 }
 0xaf8   : > { %4576 = vpush %v1890_v44  ;;  %v1919_v49 = vrot.slane %v1918_v46, 1  ;;  %v1933_v50 = vrot.slane %v1932_v48, 1 }
 0xaf9   : > { %4578 = vpush %v1904_v45 }
 0xafa   : > { %v1920_v51 = vadd.f32 %v1919_v49, %v1918_v46  ;;  %v1934_v52 = vadd.f32 %v1933_v50, %v1932_v48 }
 0xafc   : > { %4580 = vpush %v1920_v51 }
 0xafd   : > { %4582 = vpush %v1934_v52 }
 0xb29   : > { %s4577_s16 = spop %4576 }
 0xb2a   : > { %v1892_v54 = vstv %s4577_s16  ;;  %s4579_s17 = spop %4578  ;;  %s5017_s16 = smov 119  }
 0xb2b   : > { %v1893_v55 = vmul.f32 0.0009765625, %v1892_v54  ;;  %v1906_v56 = vstv %s4579_s17  ;;  %s5018_s17 = smov 118  }
 0xb2c   : > { %v1907_v60 = vmul.f32 0.0009765625, %v1906_v56 }
 0xb2d   : > { %v1908_v57 = vmul.f32 %v1893_v55, %v1893_v55  ;;  %1942 = vperm.xlu1 %4710, %v1893_v55   ;;  %s4581_s19 = spop %4580 }
 0xb2e   : > { %v1922_v61 = vstv %s4581_s19  ;;  %s4583_s20 = spop %4582  ;;  %s5019_s19 = smov 127  }
 0xb2f   : > { %v1909_v59 = vsub.f32 %v1907_v60, %v1908_v57  ;;  %v1923_v37 = vmul.f32 0.0009765625, %v1922_v61  ;;  %v1936_v35 = vstv %s4583_s20 }
 0xb30   : > { %v1937_v2 = vmul.f32 0.0009765625, %v1936_v35 }
 0xb31   : > { %v1954_v63 = vadd.f32 1e-05, %v1909_v59  ;;  %v1938_v1 = vmul.f32 %v1923_v37, %v1923_v37  ;;  %1947 = vperm.xlu0 %4711, %v1923_v37  }
 0xb33   : > { %4826 = vrsqrt.f32 %v1954_v63  ;;  %v1939_v3 = vsub.f32 %v1937_v2, %v1938_v1 }
 0xb35   : > { %v1955_v4 = vadd.f32 1e-05, %v1939_v3  ;;  %4712 = vset.pattern.permute.xlu0 %v5012_v38 }
 0xb36   : > { %1973 = vperm.xlu0 %4712, %v5422_v31  }
 0xb37   : > { %4828 = vrsqrt.f32 %v1955_v4 }
 0xb3a   : > { %4715 = vset.pattern.permute.xlu0 %v5013_v20 }
 0xb3b   : > { %1997 = vperm.xlu0 %4715, %v5416_v30  }
 0xb3f   : > { %4717 = vset.pattern.permute.xlu0 %v5014_v16 }
 0xb40   : > { %v4827_v7 = vpop.eup %4826  ;;  %2079 = vperm.xlu0 %4717, %v5506_v10  }
 0xb41   : > { %1960 = vperm.xlu1 %4710, %v4827_v7  }
 0xb44   : > { %v4829_v8 = vpop.eup %4828  ;;  %4722 = vset.pattern.permute.xlu0 %v4997_v0 }
 0xb45   : > { %1965 = vperm.xlu1 %4710, %v4829_v8  }
 0xb49   : > { %4713 = vset.pattern.permute.xlu1 %v5012_v38  ;;  %v1986_v38 = vpop.permute.xlu1 %1985 }
 0xb4a   : > { %1977 = vperm.xlu1 %4713, %v5416_v30   ;;  %v5513_v30 = vld [vmem:[%s5931_s4 + $0x8] sm:$0xff] }
 0xb4e   : > { %4714 = vset.pattern.permute.xlu1 %v5013_v20  ;;  %v2002_v20 = vpop.permute.xlu1 %2001 }
 0xb4f   : > { %1993 = vperm.xlu1 %4714, %v5422_v31   ;;  %v5520_v31 = vld [vmem:[%s5931_s4 + $0x18] sm:$0xff] }
 0xb52   : > { %v2006_v11 = vpop.permute.xlu1 %2005 }
 0xb53   : > { %4716 = vset.pattern.permute.xlu1 %v5014_v16 }
 0xb54   : > { %2069 = vperm.xlu1 %4716, %v5501_v36  }
 0xb58   : > { %2074 = vperm.xlu1 %4716, %v5513_v30  }
 0xb5c   : > { %2084 = vperm.xlu1 %4716, %v5520_v31  }
 0xba8   : > { %v1943_v12 = vpop.permute.xlu1 %1942 }
 0xba9   : > { %v1951_v22 = vsub.f32 %v5451_v33, %v1943_v12  ;;  %v1950_v26 = vsub.f32 %v5443_v23, %v1943_v12 }
 0xbac   : > { %v1948_v25 = vpop.permute.xlu0 %1947 }
 0xbad   : > { %v1952_v15 = vsub.f32 %v5449_v34, %v1948_v25  ;;  %v1953_v17 = vsub.f32 %v5458_v43, %v1948_v25 }
 0xbb1   : > { %v1974_v19 = vpop.permute.xlu0 %1973 }
 0xbb6   : > { %v1998_v42 = vpop.permute.xlu0 %1997 }
 0xbbc   : > { %v1961_v13 = vpop.permute.xlu1 %1960 }
 0xbbd   : > { %v1969_v39 = vmul.f32 %v1961_v13, %v1951_v22  ;;  %v1968_v29 = vmul.f32 %v1961_v13, %v1950_v26  ;;  %v4777_v22 = vld [vmem:[#allocation5 + $0x18] sm:$0xff]  }
 0xbbf   : > { %v1988_v46 = vmul.f32 %v1974_v19, %v1968_v29 }
 0xbc0   : > { %v1966_v18 = vpop.permute.xlu1 %1965 }
 0xbc1   : > { %v1970_v21 = vmul.f32 %v1966_v18, %v1952_v15  ;;  %v1971_v24 = vmul.f32 %v1966_v18, %v1953_v17 }
 0xbc3   : > { %v1990_v28 = vmul.f32 %v1982_v14, %v1970_v21  ;;  %v1991_v27 = vmul.f32 %v1986_v38, %v1971_v24 }
 0xbc5   : > { %v2010_v40 = vadd.f32 %v2002_v20, %v1990_v28  ;;  %v2011_v32 = vadd.f32 %v2006_v11, %v1991_v27  ;;  %v1978_v41 = vpop.permute.xlu1 %1977  ;;  %v2080_v27 = vpop.permute.xlu0 %2079 }
 0xbc6   : > { %v1989_v44 = vmul.f32 %v1978_v41, %v1969_v39 }
 0xbc7   : > { %v2016_v34 = vmul.f32 1.442695, %v2010_v40  ;;  %v2018_v45 = vmul.f32 1.442695, %v2011_v32  ;;  %v2034_v23 = vmul.f32 0.5, %v2010_v40  ;;  %v2035_v51 = vmul.f32 0.5, %v2011_v32 }
 0xbc8   : > { %v2009_v43 = vadd.f32 %v1998_v42, %v1989_v44  ;;  %v2026_v55 = vand.u32 2147483647, %v2010_v40  ;;  %v2027_v57 = vand.u32 2147483647, %v2011_v32  ;;  %vm2050_vm12 = vcmp.gt.f32.partialorder %v2010_v40, 0.0 }
 0xbc9   : > { %4830 = vpow2.f32 %v2016_v34  ;;  %v2038_v52 = vadd.f32 1.0, %v2034_v23  ;;  %v2039_v56 = vadd.f32 1.0, %v2035_v51  ;;  %vm2051_vm13 = vcmp.gt.f32.partialorder %v2011_v32, 0.0 }
 0xbca   : > { %v1994_v48 = vpop.permute.xlu1 %1993  ;;  %4832 = vpow2.f32 %v2018_v45  ;;  %v2014_v33 = vmul.f32 1.442695, %v2009_v43  ;;  %v2033_v54 = vmul.f32 0.5, %v2009_v43  ;;  %vm2030_vm10 = vcmp.lt.f32.partialorder %v2026_v55, 0.001 }
 0xbcb   : > { %v2008_v49 = vadd.f32 %v1994_v48, %v1988_v46  ;;  %v2042_v35 = vmul.f32 %v2038_v52, %v2010_v40  ;;  %v2043_v2 = vmul.f32 %v2039_v56, %v2011_v32  ;;  %v2025_v3 = vand.u32 2147483647, %v2009_v43 }
 0xbcc   : > { %4834 = vpow2.f32 %v2014_v33  ;;  %v2037_v63 = vadd.f32 1.0, %v2033_v54  ;;  %vm2031_vm11 = vcmp.lt.f32.partialorder %v2027_v57, 0.001  ;;  %vm2049_vm1 = vcmp.gt.f32.partialorder %v2009_v43, 0.0 }
 0xbcd   : > { %v2012_v50 = vmul.f32 1.442695, %v2008_v49  ;;  %v2032_v60 = vmul.f32 0.5, %v2008_v49  ;;  %v2024_v14 = vand.u32 2147483647, %v2008_v49  ;;  %vm2048_vm0 = vcmp.gt.f32.partialorder %v2008_v49, 0.0 }
 0xbce   : > { %v2041_v11 = vmul.f32 %v2037_v63, %v2009_v43  ;;  %vm2029_vm14 = vcmp.lt.f32.partialorder %v2025_v3, 0.001 }
 0xbcf   : > { %4836 = vpow2.f32 %v2012_v50  ;;  %v2036_v7 = vadd.f32 1.0, %v2032_v60  ;;  %vm2028_vm15 = vcmp.lt.f32.partialorder %v2024_v14, 0.001  ;;  %v2070_v26 = vpop.permute.xlu1 %2069 }
 0xbd1   : > { %v2040_v15 = vmul.f32 %v2036_v7, %v2008_v49 }
 0xbd3   : > { %v2075_v28 = vpop.permute.xlu1 %2074 }
 0xbd6   : > { %v4831_v61 = vpop.eup %4830 }
 0xbd7   : > { %v4833_v59 = vpop.eup %4832  ;;  %v4164_v37 = vadd.f32 -1.0, %v4831_v61  ;;  %v2085_v42 = vpop.permute.xlu1 %2084 }
 0xbd8   : > { %v4165_v1 = vadd.f32 -1.0, %v4833_v59 }
 0xbd9   : > { %v2046_v4 = vsel %vm2030_vm10, %v2042_v35, %v4164_v37  ;;  %v4835_v8 = vpop.eup %4834 }
 0xbda   : > { %v2047_v9 = vsel %vm2031_vm11, %v2043_v2, %v4165_v1  ;;  %v2054_v16 = vsel %vm2050_vm12, %v2010_v40, %v2046_v4  ;;  %v4163_v20 = vadd.f32 -1.0, %v4835_v8 }
 0xbdb   : > { %v2055_v38 = vsel %vm2051_vm13, %v2011_v32, %v2047_v9 }
 0xbdc   : > { %v4837_v12 = vpop.eup %4836  ;;  %v2066_v25 = vpack.c.bf16 %v2055_v38, %v2054_v16  ;;  %v2045_v17 = vsel %vm2029_vm14, %v2041_v11, %v4163_v20 }
 0xbdd   : > { %v4162_v13 = vadd.f32 -1.0, %v4837_v12  ;;  %v2053_v21 = vsel %vm2049_vm1, %v2009_v43, %v2045_v17 }
 0xbde   : > { %4464 = vmatprep.subr.bf16.mxu1 %v2066_v25 }
 0xbdf   : > { %4465 = vmatpush3.bf16.msra.mxu1 %v2066_v25  ;;  %v2044_v18 = vsel %vm2028_vm15, %v2040_v15, %v4162_v13  ;;  %v5015_v25 = vmov 10   ;;  %v5016_v13 = vmov 11  }
 0xbe0   : > { %v2052_v19 = vsel %vm2048_vm0, %v2008_v49, %v2044_v18  ;;  %4718 = vset.pattern.permute.xlu1 %v5015_v25 }
 0xbe1   : > { %v2065_v24 = vpack.c.bf16 %v2053_v21, %v2052_v19 }
 0xbe3   : > { %4466 = vmatprep.subr.bf16.mxu1 %v2065_v24 }
 0xbe4   : > { %4467 = vmatpush3.bf16.msra.mxu1 %v2065_v24 }
 0xbe7   : > { %4469 = vmatmul.mubr.msk.bf16.vlgmr.msra.gmra.mxu1 %vm412_vm3, %v4777_v22 }
 0xca7   : > { %v4470_v39 = vpop.f32.mrf.mxu1 }
 0xca8   : > { %v5528_v29 = vadd.f32 %v4470_v39, %v2080_v27 }
 0xca9   : > { %v2137_v40 = vpop.f32.mrf.mxu1 }
 0xcaa   : > { %v5530_v32 = vadd.f32 %v2137_v40, %v2070_v26  ;;  %v2158_v41 = vsel %vm830_vm4, %v5528_v29, 0.0  ;;  %v2166_v51 = vmul.f32 %v5528_v29, %v5528_v29 }
 0xcab   : > { %2159 = vadd.xlane.f32.xlu0 %v2158_v41  ;;  %v4471_v44 = vpop.f32.mrf.mxu1 }
 0xcac   : > { %v5534_v34 = vadd.f32 %v4471_v44, %v2085_v42  ;;  %v2152_v45 = vsel %vm830_vm4, %v5530_v32, 0.0  ;;  %v2164_v43 = vmul.f32 %v5530_v32, %v5530_v32  ;;  %v2174_v55 = vsel %vm830_vm4, %v2166_v51, 0.0 }
 0xcad   : > { %v2140_v46 = vpop.f32.mrf.mxu1  ;;  %2153 = vadd.xlane.f32.xlu1 %v2152_v45 }
 0xcae   : > { %v5540_v48 = vadd.f32 %v2140_v46, %v2075_v28  ;;  %v2168_v49 = vsel %vm830_vm4, %v2164_v43, 0.0  ;;  %v2161_v33 = vsel %vm830_vm4, %v5534_v34, 0.0  ;;  %v2167_v54 = vmul.f32 %v5534_v34, %v5534_v34 }
 0xcaf   : > { %2169 = vadd.xlane.f32.xlu0 %v2168_v49 }
 0xcb0   : > { %v2165_v50 = vmul.f32 %v5540_v48, %v5540_v48  ;;  %v2155_v23 = vsel %vm830_vm4, %v5540_v48, 0.0  ;;  %v2177_v56 = vsel %vm830_vm4, %v2167_v54, 0.0 }
 0xcb1   : > { %2162 = vadd.xlane.f32.xlu1 %v2161_v33 }
 0xcb2   : > { %v2171_v52 = vsel %vm830_vm4, %v2165_v50, 0.0 }
 0xcb3   : > { %2156 = vadd.xlane.f32.xlu0 %v2155_v23 }
 0xcb5   : > { %2172 = vadd.xlane.f32.xlu1 %v2171_v52 }
 0xcb7   : > { %2175 = vadd.xlane.f32.xlu0 %v2174_v55 }
 0xcb9   : > { %2178 = vadd.xlane.f32.xlu1 %v2177_v56 }
 0xd34   : > { %v2160_v57 = vpop.xlane.xlu0 %2159 }
 0xd35   : > { %v2210_v16 = vsel %vm859_vm5, %v2160_v57, 0.0 }
 0xd36   : > { %v2154_v60 = vpop.xlane.xlu1 %2153 }
 0xd37   : > { %v2180_v35 = vsel %vm859_vm5, %v2154_v60, 0.0 }
 0xd38   : > { %v2170_v61 = vpop.xlane.xlu0 %2169 }
 0xd39   : > { %v2194_v3 = vsel %vm859_vm5, %v2170_v61, 0.0 }
 0xd3a   : > { %v2163_v59 = vpop.xlane.xlu1 %2162 }
 0xd3b   : > { %v2211_v4 = vsel %vm859_vm5, %v2163_v59, 0.0 }
 0xd3c   : > { %v2157_v37 = vpop.xlane.xlu0 %2156  ;;  %v2212_v14 = vadd.f32 %v2211_v4, %v2210_v16 }
 0xd3d   : > { %v2181_v63 = vsel %vm859_vm5, %v2157_v37, 0.0 }
 0xd3e   : > { %v2182_v1 = vadd.f32 %v2181_v63, %v2180_v35  ;;  %v2173_v2 = vpop.xlane.xlu1 %2172 }
 0xd3f   : > { %v2195_v7 = vsel %vm859_vm5, %v2173_v2, 0.0 }
 0xd40   : > { %v2196_v8 = vadd.f32 %v2195_v7, %v2194_v3  ;;  %v2176_v9 = vpop.xlane.xlu0 %2175  ;;  %2183 = vadd.xlane.f32.xlu0 %v2182_v1 }
 0xd41   : > { %v2224_v20 = vsel %vm859_vm5, %v2176_v9, 0.0 }
 0xd42   : > { %2197 = vadd.xlane.f32.xlu1 %v2196_v8  ;;  %v2179_v38 = vpop.xlane.xlu1 %2178 }
 0xd43   : > { %v2225_v11 = vsel %vm859_vm5, %v2179_v38, 0.0 }
 0xd44   : > { %v2226_v12 = vadd.f32 %v2225_v11, %v2224_v20  ;;  %2213 = vadd.xlane.f32.xlu0 %v2212_v14 }
 0xd46   : > { %2227 = vadd.xlane.f32.xlu1 %v2226_v12 }
 0xd57   : > { %2281 = vperm.xlu1 %4718, %v5506_v10  }
 0xd5b   : > { %2285 = vperm.xlu1 %4718, %v5520_v31  }
 0xd5f   : > { %4719 = vset.pattern.permute.xlu1 %v5016_v13 }
 0xd60   : > { %2301 = vperm.xlu1 %4719, %v5506_v10  }
 0xd64   : > { %2305 = vperm.xlu1 %4719, %v5520_v31  }
 0xd68   : > { %4720 = vset.pattern.permute.xlu1 %v5015_v25 }
 0xd69   : > { %2273 = vperm.xlu1 %4720, %v5501_v36  }
 0xd6d   : > { %4721 = vset.pattern.permute.xlu1 %v4997_v0 }
 0xdc9   : > { %v2184_v15 = vpop.xlane.xlu0 %2183 }
 0xdca   : > { %v2185_v17 = vrot.slane %v2184_v15, 4 }
 0xdcb   : > { %v2198_v18 = vpop.xlane.xlu1 %2197 }
 0xdcc   : > { %v2186_v19 = vadd.f32 %v2185_v17, %v2184_v15  ;;  %v2199_v21 = vrot.slane %v2198_v18, 4 }
 0xdcd   : > { %v2214_v24 = vpop.xlane.xlu0 %2213 }
 0xdce   : > { %v2200_v22 = vadd.f32 %v2199_v21, %v2198_v18  ;;  %v2215_v26 = vrot.slane %v2214_v24, 4  ;;  %v2187_v28 = vrot.slane %v2186_v19, 2 }
 0xdcf   : > { %v2228_v27 = vpop.xlane.xlu1 %2227 }
 0xdd0   : > { %v2216_v39 = vadd.f32 %v2215_v26, %v2214_v24  ;;  %v2229_v40 = vrot.slane %v2228_v27, 4  ;;  %v2188_v41 = vadd.f32 %v2187_v28, %v2186_v19  ;;  %v2201_v42 = vrot.slane %v2200_v22, 2 }
 0xdd2   : > { %v2230_v44 = vadd.f32 %v2229_v40, %v2228_v27  ;;  %v2189_v45 = vrot.slane %v2188_v41, 1  ;;  %v2202_v43 = vadd.f32 %v2201_v42, %v2200_v22  ;;  %v2217_v46 = vrot.slane %v2216_v39, 2 }
 0xdd3   : > { %v2282_v20 = vpop.permute.xlu1 %2281 }
 0xdd4   : > { %v2190_v49 = vadd.f32 %v2189_v45, %v2188_v41  ;;  %v2203_v33 = vrot.slane %v2202_v43, 1  ;;  %v2218_v50 = vadd.f32 %v2217_v46, %v2216_v39  ;;  %v2231_v23 = vrot.slane %v2230_v44, 2 }
 0xdd6   : > { %4584 = vpush %v2190_v49  ;;  %v2204_v51 = vadd.f32 %v2203_v33, %v2202_v43  ;;  %v2219_v52 = vrot.slane %v2218_v50, 1  ;;  %v2232_v54 = vadd.f32 %v2231_v23, %v2230_v44 }
 0xdd7   : > { %v2286_v11 = vpop.permute.xlu1 %2285 }
 0xdd8   : > { %4586 = vpush %v2204_v51  ;;  %v2220_v55 = vadd.f32 %v2219_v52, %v2218_v50  ;;  %v2233_v56 = vrot.slane %v2232_v54, 1 }
 0xdda   : > { %4588 = vpush %v2220_v55  ;;  %v2234_v57 = vadd.f32 %v2233_v56, %v2232_v54 }
 0xddb   : > { %v2302_v12 = vpop.permute.xlu1 %2301 }
 0xddc   : > { %4590 = vpush %v2234_v57 }
 0xddf   : > { %v2306_v15 = vpop.permute.xlu1 %2305 }
 0xde4   : > { %v2274_v17 = vpop.permute.xlu1 %2273 }
 0xe07   : > { %s4585_s11 = spop %4584 }
 0xe08   : > { %v2192_v60 = vstv %s4585_s11 }
 0xe09   : > { %v2193_v61 = vmul.f32 0.0009765625, %v2192_v60  ;;  %s4587_s12 = spop %4586 }
 0xe0a   : > { %v2206_v59 = vstv %s4587_s12 }
 0xe0b   : > { %v2208_v37 = vmul.f32 %v2193_v61, %v2193_v61  ;;  %v2207_v35 = vmul.f32 0.0009765625, %v2206_v59  ;;  %2242 = vperm.xlu1 %4721, %v2193_v61   ;;  %s4589_s14 = spop %4588 }
 0xe0c   : > { %v2222_v63 = vstv %s4589_s14 }
 0xe0d   : > { %v2209_v1 = vsub.f32 %v2207_v35, %v2208_v37  ;;  %v2223_v2 = vmul.f32 0.0009765625, %v2222_v63  ;;  %s4591_s15 = spop %4590 }
 0xe0e   : > { %v2236_v3 = vstv %s4591_s15 }
 0xe0f   : > { %v2254_v4 = vadd.f32 1e-05, %v2209_v1  ;;  %v2238_v7 = vmul.f32 %v2223_v2, %v2223_v2  ;;  %v2237_v8 = vmul.f32 0.0009765625, %v2236_v3  ;;  %2247 = vperm.xlu0 %4722, %v2223_v2  }
 0xe11   : > { %4838 = vrsqrt.f32 %v2254_v4  ;;  %v2239_v9 = vsub.f32 %v2237_v8, %v2238_v7 }
 0xe13   : > { %v2255_v16 = vadd.f32 1e-05, %v2239_v9  ;;  %4723 = vset.pattern.permute.xlu0 %v5015_v25 }
 0xe14   : > { %2277 = vperm.xlu0 %4723, %v5513_v30  }
 0xe15   : > { %4840 = vrsqrt.f32 %v2255_v16 }
 0xe1e   : > { %v4839_v14 = vpop.eup %4838 }
 0xe1f   : > { %2260 = vperm.xlu1 %4721, %v4839_v14  }
 0xe22   : > { %v4841_v38 = vpop.eup %4840 }
 0xe23   : > { %2265 = vperm.xlu1 %4721, %v4841_v38  }
 0xe27   : > { %4724 = vset.pattern.permute.xlu1 %v5016_v13 }
 0xe28   : > { %2293 = vperm.xlu1 %4724, %v5501_v36  }
 0xe2c   : > { %2297 = vperm.xlu1 %4724, %v5513_v30  }
 0xe86   : > { %v2243_v18 = vpop.permute.xlu1 %2242 }
 0xe87   : > { %v2250_v21 = vsub.f32 %v5530_v32, %v2243_v18  ;;  %v2251_v39 = vsub.f32 %v5540_v48, %v2243_v18 }
 0xe8a   : > { %v2248_v25 = vpop.permute.xlu0 %2247 }
 0xe8b   : > { %v2252_v24 = vsub.f32 %v5528_v29, %v2248_v25  ;;  %v2253_v22 = vsub.f32 %v5534_v34, %v2248_v25 }
 0xe8f   : > { %v2278_v45 = vpop.permute.xlu0 %2277 }
 0xe9a   : > { %v2261_v19 = vpop.permute.xlu1 %2260 }
 0xe9b   : > { %v2268_v26 = vmul.f32 %v2261_v19, %v2250_v21  ;;  %v2269_v42 = vmul.f32 %v2261_v19, %v2251_v39 }
 0xe9d   : > { %v2288_v44 = vmul.f32 %v2274_v17, %v2268_v26  ;;  %v2289_v50 = vmul.f32 %v2278_v45, %v2269_v42  ;;  %v4784_v42 = vld [vmem:[#allocation3 + $0x70] sm:$0xff]  }
 0xe9e   : > { %v2266_v13 = vpop.permute.xlu1 %2265  ;;  %4476 = vmatprep.mubr.msk.bf16.mxu0 %vm412_vm3, %v4784_v42 }
 0xe9f   : > { %v2270_v28 = vmul.f32 %v2266_v13, %v2252_v24  ;;  %v2271_v27 = vmul.f32 %v2266_v13, %v2253_v22 }
 0xea1   : > { %v2290_v40 = vmul.f32 %v2282_v20, %v2270_v28  ;;  %v2291_v41 = vmul.f32 %v2286_v11, %v2271_v27 }
 0xea3   : > { %v2310_v43 = vadd.f32 %v2302_v12, %v2290_v40  ;;  %v2311_v46 = vadd.f32 %v2306_v15, %v2291_v41  ;;  %v2294_v49 = vpop.permute.xlu1 %2293 }
 0xea4   : > { %v2308_v33 = vadd.f32 %v2294_v49, %v2288_v44 }
 0xea5   : > { %v2318_v32 = vmul.f32 1.442695, %v2311_v46  ;;  %v2316_v23 = vmul.f32 1.442695, %v2310_v43  ;;  %v2335_v48 = vmul.f32 0.5, %v2311_v46  ;;  %v2334_v55 = vmul.f32 0.5, %v2310_v43 }
 0xea6   : > { %v2312_v29 = vmul.f32 1.442695, %v2308_v33  ;;  %v2332_v54 = vmul.f32 0.5, %v2308_v33  ;;  %v2327_v56 = vand.u32 2147483647, %v2311_v46  ;;  %vm2351_vm7 = vcmp.gt.f32.partialorder %v2311_v46, 0.0 }
 0xea7   : > { %v2298_v34 = vpop.permute.xlu1 %2297  ;;  %4842 = vpow2.f32 %v2318_v32  ;;  %v2339_v57 = vadd.f32 1.0, %v2335_v48  ;;  %v2338_v59 = vadd.f32 1.0, %v2334_v55  ;;  %v2324_v37 = vand.u32 2147483647, %v2308_v33  ;;  %v4785_v48 = vld [vmem:[#allocation3 + $0x78] sm:$0xff]  }
 0xea8   : > { %4844 = vpow2.f32 %v2312_v29  ;;  %v2309_v51 = vadd.f32 %v2298_v34, %v2289_v50  ;;  %v2336_v60 = vadd.f32 1.0, %v2332_v54  ;;  %v2326_v63 = vand.u32 2147483647, %v2310_v43  ;;  %v4783_v34 = vld [vmem:[#allocation3 + $0x68] sm:$0xff]   ;;  %v4786_v54 = vld [vmem:[#allocation3 + $0x80] sm:$0xff]  }
 0xea9   : > { %4846 = vpow2.f32 %v2316_v23  ;;  %vm2331_vm6 = vcmp.lt.f32.partialorder %v2327_v56, 0.001  ;;  %v2343_v3 = vmul.f32 %v2339_v57, %v2311_v46  ;;  %v2342_v20 = vmul.f32 %v2338_v59, %v2310_v43 }
 0xeaa   : > { %v2314_v52 = vmul.f32 1.442695, %v2309_v51  ;;  %v2333_v61 = vmul.f32 0.5, %v2309_v51  ;;  %v2340_v8 = vmul.f32 %v2336_v60, %v2308_v33  ;;  %v2325_v9 = vand.u32 2147483647, %v2309_v51 }
 0xeab   : > { %vm2328_vm8 = vcmp.lt.f32.partialorder %v2324_v37, 0.001  ;;  %vm2330_vm9 = vcmp.lt.f32.partialorder %v2326_v63, 0.001  ;;  %vm2350_vm10 = vcmp.gt.f32.partialorder %v2310_v43, 0.0  ;;  %vm2348_vm11 = vcmp.gt.f32.partialorder %v2308_v33, 0.0 }
 0xeac   : > { %4848 = vpow2.f32 %v2314_v52  ;;  %v2337_v16 = vadd.f32 1.0, %v2333_v61  ;;  %vm2329_vm12 = vcmp.lt.f32.partialorder %v2325_v9, 0.001  ;;  %vm2349_vm13 = vcmp.gt.f32.partialorder %v2309_v51, 0.0  ;;  %v4787_v61 = vld [vmem:[#allocation3 + $0x88] sm:$0xff]  }
 0xeae   : > { %v2341_v24 = vmul.f32 %v2337_v16, %v2309_v51 }
 0xeb4   : > { %v4843_v35 = vpop.eup %4842 }
 0xeb5   : > { %v4845_v1 = vpop.eup %4844  ;;  %v4173_v2 = vadd.f32 -1.0, %v4843_v35 }
 0xeb6   : > { %v4847_v4 = vpop.eup %4846  ;;  %v4170_v7 = vadd.f32 -1.0, %v4845_v1  ;;  %v5020_v1 = vmov 12  }
 0xeb7   : > { %v2347_v14 = vsel %vm2331_vm6, %v2343_v3, %v4173_v2  ;;  %v4172_v38 = vadd.f32 -1.0, %v4847_v4  ;;  %4726 = vset.pattern.permute.xlu1 %v5020_v1  ;;  %4725 = vset.pattern.permute.xlu0 %v5020_v1 }
 0xeb8   : > { %v2355_v11 = vsel %vm2351_vm7, %v2311_v46, %v2347_v14  ;;  %v2344_v12 = vsel %vm2328_vm8, %v2340_v8, %v4170_v7 }
 0xeb9   : > { %v4849_v15 = vpop.eup %4848  ;;  %v5583_v17 = vadd.f32 %v2355_v11, %v5374_v62  ;;  %v2346_v18 = vsel %vm2330_vm9, %v2342_v20, %v4172_v38  ;;  %v2352_v19 = vsel %vm2348_vm11, %v2308_v33, %v2344_v12 }
 0xeba   : > { %v2354_v25 = vsel %vm2350_vm10, %v2310_v43, %v2346_v18  ;;  %v4171_v21 = vadd.f32 -1.0, %v4849_v15  ;;  %v5594_v28 = vadd.f32 %v2352_v19, %v5358_v47 }
 0xebb   : > { %v4255_v22 = vpack.c.bf16 %v5583_v17, %v5583_v17  ;;  %v5588_v26 = vadd.f32 %v2354_v25, %v5363_v53 }
 0xebc   : > { %v2345_v13 = vsel %vm2329_vm12, %v2341_v24, %v4171_v21  ;;  %v4252_v40 = vpack.c.bf16 %v5594_v28, %v5594_v28 }
 0xebd   : > { %2378 = vrot.lane.b32.xlu1 %v4255_v22, %s4999_s25  ;;  %v4254_v62 = vpack.c.bf16 %v5588_v26, %v5588_v26  ;;  %v2353_v27 = vsel %vm2349_vm13, %v2309_v51, %v2345_v13 }
 0xebe   : > { %v5597_v39 = vadd.f32 %v2353_v27, %v5367_v58  ;;  %v5610_v58 = vld [vmem:[#allocation3 + $0x60] sm:$0xff]  }
 0xebf   : > { %2376 = vrot.lane.b32.xlu0 %v4254_v62, %s4999_s25  ;;  %4484 = vmatprep.mubr.msk.bf16.mxu1 %vm412_vm3, %v5610_v58 }
 0xec0   : > { %v4253_v53 = vpack.c.bf16 %v5597_v39, %v5597_v39 }
 0xec2   : > { %2374 = vrot.lane.b32.xlu1 %v4253_v53, %s4999_s25 }
 0xec3   : > { %2372 = vrot.lane.b32.xlu0 %v4252_v40, %s4999_s25 }
 0xec6   : > { %2394 = vrot.lane.b32.xlu1 %v4255_v22, %s4998_s24 }
 0xec7   : > { %2392 = vrot.lane.b32.xlu0 %v4254_v62, %s4998_s24 }
 0xeca   : > { %2390 = vrot.lane.b32.xlu1 %v4253_v53, %s4998_s24 }
 0xecb   : > { %2388 = vrot.lane.b32.xlu0 %v4252_v40, %s4998_s24 }
 0xf2f   : > { %v2379_v47 = vpop.permute.xlu1 %2378 }
 0xf30   : > { %2387 = vst.msk [vmem:[#allocation2 + $0xc] sm:$0xf] %vm347_vm2, %v2379_v47 }
 0xf31   : > { %v2377_v41 = vpop.permute.xlu0 %2376 }
 0xf32   : > { %2386 = vst.msk [vmem:[#allocation2 + $0x8] sm:$0xf] %vm347_vm2, %v2377_v41 }
 0xf34   : > { %v2375_v44 = vpop.permute.xlu1 %2374 }
 0xf35   : > { %v2373_v45 = vpop.permute.xlu0 %2372  ;;  %2385 = vst.msk [vmem:[#allocation2 + $0x4] sm:$0xf] %vm347_vm2, %v2375_v44 }
 0xf36   : > { %2384 = vst.msk [vmem:[#allocation2] sm:$0xf] %vm347_vm2, %v2373_v45 }
 0xf38   : > { %v2395_v43 = vpop.permute.xlu1 %2394 }
 0xf39   : > { %v2393_v46 = vpop.permute.xlu0 %2392  ;;  %2403 = vst.msk [vmem:[#allocation2 + $0x1c] sm:$0xf] %vm347_vm2, %v2395_v43  ;;  %v4778_v49 = vld [vmem:[#allocation2 + $0x8] sm:$0xff]  }
 0xf3a   : > { %2402 = vst.msk [vmem:[#allocation2 + $0x18] sm:$0xf] %vm347_vm2, %v2393_v46  ;;  %2444 = vrot.lane.b32.xlu0 %v4778_v49, %s5001_s27 }
 0xf3c   : > { %v2391_v33 = vpop.permute.xlu1 %2390 }
 0xf3d   : > { %v2389_v32 = vpop.permute.xlu0 %2388  ;;  %2401 = vst.msk [vmem:[#allocation2 + $0x14] sm:$0xf] %vm347_vm2, %v2391_v33  ;;  %v4779_v50 = vld [vmem:[#allocation2] sm:$0xff]  }
 0xf3e   : > { %2400 = vst.msk [vmem:[#allocation2 + $0x10] sm:$0xf] %vm347_vm2, %v2389_v32  ;;  %2442 = vrot.lane.b32.xlu1 %v4779_v50, %s5001_s27 }
 0xf41   : > { %v4780_v29 = vld [vmem:[#allocation2 + $0x18] sm:$0xff]  }
 0xf42   : > { %2662 = vrot.lane.b32.xlu1 %v4780_v29, %s5001_s27  ;;  %2597 = vrot.lane.b32.xlu0 %v4780_v29, %s5017_s16 }
 0xf43   : > { %4480 = vmatprep.subr.bf16.mxu1 %v4780_v29 }
 0xf44   : > { %4481 = vmatpush3.bf16.msra.mxu1 %v4780_v29 }
 0xf45   : > { %v4781_v23 = vld [vmem:[#allocation2 + $0x10] sm:$0xff]  }
 0xf46   : > { %2660 = vrot.lane.b32.xlu1 %v4781_v23, %s5001_s27  ;;  %2595 = vrot.lane.b32.xlu0 %v4781_v23, %s5017_s16 }
 0xf47   : > { %4482 = vmatprep.subr.bf16.mxu1 %v4781_v23 }
 0xf48   : > { %4483 = vmatpush3.bf16.msra.mxu1 %v4781_v23 }
 0xf4a   : > { %2772 = vrot.lane.b32.xlu1 %v4778_v49, %s5018_s17  ;;  %2717 = vrot.lane.b32.xlu0 %v4778_v49, %s5019_s19 }
 0xf4b   : > { %4485 = vmatmul.mubr.msk.bf16.vlgmr.msra.gmra.mxu1 %vm412_vm3, %v4783_v34 }
 0xf4c   : > { %4500 = vmatprep.mubr.msk.bf16.mxu1 %vm412_vm3, %v4784_v42 }
 0xf4e   : > { %2770 = vrot.lane.b32.xlu1 %v4779_v50, %s5018_s17  ;;  %2715 = vrot.lane.b32.xlu0 %v4779_v50, %s5019_s19 }
 0xf52   : > { %2854 = vperm.xlu1 %4726, %v5513_v30   ;;  %2850 = vperm.xlu0 %4725, %v5501_v36  }
 0xf56   : > { %2858 = vperm.xlu1 %4726, %v5506_v10   ;;  %2862 = vperm.xlu0 %4725, %v5520_v31  }
 0xf5a   : > { %4730 = vset.pattern.permute.xlu0 %v4997_v0 }
 0xfac   : > { %v2445_v51 = vpop.permute.xlu0 %2444 }
 0xfad   : > { %4472 = vmatprep.subr.bf16.mxu0 %v2445_v51 }
 0xfae   : > { %4473 = vmatpush3.bf16.msra.mxu0 %v2445_v51 }
 0xfb0   : > { %v2443_v52 = vpop.permute.xlu1 %2442 }
 0xfb1   : > { %4474 = vmatprep.subr.bf16.mxu0 %v2443_v52 }
 0xfb2   : > { %4475 = vmatpush3.bf16.msra.mxu0 %v2443_v52 }
 0xfb4   : > { %v2598_v55 = vpop.permute.xlu0 %2597  ;;  %v2663_v56 = vpop.permute.xlu1 %2662 }
 0xfb5   : > { %4477 = vmatmul.mubr.msk.bf16.vlgmr.msra.gmra.mxu0 %vm412_vm3, %v4785_v48  ;;  %4488 = vmatprep.subr.bf16.mxu0 %v2598_v55 }
 0xfb6   : > { %4496 = vmatprep.subr.bf16.mxu1 %v2663_v56  ;;  %4489 = vmatpush3.bf16.msra.mxu0 %v2598_v55 }
 0xfb7   : > { %4497 = vmatpush3.bf16.msra.mxu1 %v2663_v56  ;;  %4492 = vmatprep.mubr.msk.bf16.mxu0 %vm412_vm3, %v4786_v54 }
 0xfb8   : > { %v2596_v57 = vpop.permute.xlu0 %2595  ;;  %v2661_v60 = vpop.permute.xlu1 %2660 }
 0xfb9   : > { %4490 = vmatprep.subr.bf16.mxu0 %v2596_v57  ;;  %4498 = vmatprep.subr.bf16.mxu1 %v2661_v60 }
 0xfba   : > { %4491 = vmatpush3.bf16.msra.mxu0 %v2596_v57 }
 0xfbb   : > { %4499 = vmatpush3.bf16.msra.mxu1 %v2661_v60 }
 0xfbc   : > { %v2718_v59 = vpop.permute.xlu0 %2717  ;;  %v2773_v37 = vpop.permute.xlu1 %2772 }
 0xfbd   : > { %4493 = vmatmul.mubr.msk.bf16.vlgmr.msra.gmra.mxu0 %vm412_vm3, %v4787_v61  ;;  %4504 = vmatprep.subr.bf16.mxu0 %v2718_v59 }
 0xfbe   : > { %4501 = vmatmul.mubr.msk.bf16.vlgmr.msra.gmra.mxu1 %vm412_vm3, %v4785_v48  ;;  %4512 = vmatprep.subr.bf16.mxu1 %v2773_v37 }
 0xfbf   : > { %4505 = vmatpush3.bf16.msra.mxu0 %v2718_v59  ;;  %4513 = vmatpush3.bf16.msra.mxu1 %v2773_v37 }
 0xfc0   : > { %v2716_v35 = vpop.permute.xlu0 %2715  ;;  %v2771_v63 = vpop.permute.xlu1 %2770  ;;  %4508 = vmatprep.mubr.msk.bf16.mxu0 %vm412_vm3, %v5610_v58  ;;  %4516 = vmatprep.mubr.msk.bf16.mxu1 %vm412_vm3, %v4786_v54 }
 0xfc1   : > { %4506 = vmatprep.subr.bf16.mxu0 %v2716_v35  ;;  %4514 = vmatprep.subr.bf16.mxu1 %v2771_v63 }
 0xfc3   : > { %4507 = vmatpush3.bf16.msra.mxu0 %v2716_v35  ;;  %4515 = vmatpush3.bf16.msra.mxu1 %v2771_v63 }
 0xfc6   : > { %4509 = vmatmul.mubr.msk.bf16.vlgmr.msra.gmra.mxu0 %vm412_vm3, %v4783_v34  ;;  %4517 = vmatmul.mubr.msk.bf16.vlgmr.msra.gmra.mxu1 %vm412_vm3, %v4787_v61 }
 0xfcd   : > { %v2855_v29 = vpop.permute.xlu1 %2854  ;;  %v2851_v23 = vpop.permute.xlu0 %2850 }
 0xfd1   : > { %v2859_v34 = vpop.permute.xlu1 %2858  ;;  %v2863_v51 = vpop.permute.xlu0 %2862 }
0x100b   : > { %v4486_v2 = vpop.f32.mrf.mxu1 }
0x100d   : > { %v2565_v3 = vpop.f32.mrf.mxu1 }
0x100f   : > { %v4487_v7 = vpop.f32.mrf.mxu1 }
0x1011   : > { %v2568_v16 = vpop.f32.mrf.mxu1 }
0x1075   : > { %v4478_v4 = vpop.f32.mrf.mxu0 }
0x1076   : > { %v2574_v38 = vadd.f32 %v4486_v2, %v4478_v4 }
0x1077   : > { %v2488_v8 = vpop.f32.mrf.mxu0 }
0x1078   : > { %v2566_v30 = vadd.f32 %v2565_v3, %v2488_v8 }
0x1079   : > { %v4479_v9 = vpop.f32.mrf.mxu0 }
0x107a   : > { %v2577_v10 = vadd.f32 %v4487_v7, %v4479_v9 }
0x107b   : > { %v2491_v14 = vpop.f32.mrf.mxu0 }
0x107c   : > { %v2569_v20 = vadd.f32 %v2568_v16, %v2491_v14 }
0x107d   : > { %v4494_v11 = vpop.f32.mrf.mxu0 }
0x107e   : > { %v2658_v12 = vadd.f32 %v4494_v11, %v2574_v38  ;;  %v4502_v36 = vpop.f32.mrf.mxu1 }
0x107f   : > { %v2641_v15 = vpop.f32.mrf.mxu0 }
0x1080   : > { %v2656_v18 = vadd.f32 %v2641_v15, %v2566_v30  ;;  %v2700_v31 = vpop.f32.mrf.mxu1 }
0x1081   : > { %v4495_v25 = vpop.f32.mrf.mxu0 }
0x1082   : > { %v2659_v19 = vadd.f32 %v4495_v25, %v2577_v10  ;;  %v4503_v21 = vpop.f32.mrf.mxu1 }
0x1083   : > { %v2644_v24 = vpop.f32.mrf.mxu0 }
0x1084   : > { %v2657_v22 = vadd.f32 %v2644_v24, %v2569_v20  ;;  %v2703_v13 = vpop.f32.mrf.mxu1 }
0x1086   : > { %v4510_v62 = vpop.f32.mrf.mxu0  ;;  %v4518_v27 = vpop.f32.mrf.mxu1 }
0x1087   : > { %v2764_v42 = vadd.f32 %v4510_v62, %v4502_v36 }
0x1088   : > { %v2755_v53 = vpop.f32.mrf.mxu0  ;;  %v2810_v40 = vpop.f32.mrf.mxu1 }
0x1089   : > { %v2756_v47 = vadd.f32 %v2755_v53, %v2700_v31  ;;  %v2827_v49 = vadd.f32 %v4518_v27, %v2764_v42  ;;  %v5021_v42 = vmov 13  }
0x108a   : > { %v4511_v58 = vpop.f32.mrf.mxu0  ;;  %v4519_v41 = vpop.f32.mrf.mxu1  ;;  %4727 = vset.pattern.permute.xlu1 %v5021_v42 }
0x108b   : > { %v2825_v44 = vadd.f32 %v2810_v40, %v2756_v47  ;;  %v2767_v33 = vadd.f32 %v4511_v58, %v4503_v21 }
0x108c   : > { %v2758_v45 = vpop.f32.mrf.mxu0  ;;  %v2813_v46 = vpop.f32.mrf.mxu1 }
0x108d   : > { %v2759_v43 = vadd.f32 %v2758_v45, %v2703_v13  ;;  %2833 = vrot.lane.b32.xlu1 %v2825_v44, %s5003_s13  ;;  %v2828_v50 = vadd.f32 %v4519_v41, %v2767_v33  ;;  %v4894_v44 = vld [vmem:[%s5931_s4 + $0x10] sm:$0xff]  ;;  %v4895_v45 = vld [vmem:[%s5931_s4 + $0x18] sm:$0xff] }
0x108f   : > { %v2826_v32 = vadd.f32 %v2813_v46, %v2759_v43  ;;  %v5022_v43 = vmov 14  }
0x1091   : > { %2837 = vrot.lane.b32.xlu1 %v2827_v49, %s5003_s13  ;;  %2835 = vrot.lane.b32.xlu0 %v2826_v32, %s5003_s13 }
0x1095   : > { %2839 = vrot.lane.b32.xlu0 %v2828_v50, %s5003_s13  ;;  %s5914_s13 = scalar_lea.vmem %s5933_s6, %s4242_s18 }
0x10ff   : > { %v2834_v52 = vpop.permute.xlu1 %2833 }
0x1100   : > { %v2845_v48 = vsel %vm412_vm3, %v2656_v18, %v2834_v52 }
0x1101   : > { %v5648_v54 = vadd.f32 %v2851_v23, %v2845_v48 }
0x1103   : > { %v2836_v55 = vpop.permute.xlu0 %2835  ;;  %v2838_v56 = vpop.permute.xlu1 %2837  ;;  %v2869_v57 = vsel %vm830_vm4, %v5648_v54, 0.0  ;;  %v2881_v1 = vmul.f32 %v5648_v54, %v5648_v54 }
0x1104   : > { %v2846_v60 = vsel %vm412_vm3, %v2657_v22, %v2836_v55  ;;  %v2847_v61 = vsel %vm412_vm3, %v2658_v12, %v2838_v56  ;;  %2870 = vadd.xlane.f32.xlu1 %v2869_v57 }
0x1105   : > { %v5654_v59 = vadd.f32 %v2859_v34, %v2847_v61  ;;  %v5656_v37 = vadd.f32 %v2855_v29, %v2846_v60  ;;  %v2885_v7 = vsel %vm830_vm4, %v2881_v1, 0.0 }
0x1107   : > { %v2840_v35 = vpop.permute.xlu0 %2839  ;;  %v2875_v63 = vsel %vm830_vm4, %v5654_v59, 0.0  ;;  %v2882_v8 = vmul.f32 %v5656_v37, %v5656_v37  ;;  %v2872_v16 = vsel %vm830_vm4, %v5656_v37, 0.0  ;;  %v2883_v38 = vmul.f32 %v5654_v59, %v5654_v59 }
0x1108   : > { %v2848_v2 = vsel %vm412_vm3, %v2659_v19, %v2840_v35  ;;  %2876 = vadd.xlane.f32.xlu0 %v2875_v63 }
0x1109   : > { %v5663_v3 = vadd.f32 %v2863_v51, %v2848_v2  ;;  %v2888_v9 = vsel %vm830_vm4, %v2882_v8, 0.0  ;;  %v2891_v11 = vsel %vm830_vm4, %v2883_v38, 0.0 }
0x110b   : > { %v2878_v4 = vsel %vm830_vm4, %v5663_v3, 0.0  ;;  %v2884_v14 = vmul.f32 %v5663_v3, %v5663_v3 }
0x110c   : > { %2879 = vadd.xlane.f32.xlu1 %v2878_v4  ;;  %2886 = vadd.xlane.f32.xlu0 %v2885_v7 }
0x110d   : > { %v2894_v20 = vsel %vm830_vm4, %v2884_v14, 0.0 }
0x1110   : > { %2889 = vadd.xlane.f32.xlu1 %v2888_v9  ;;  %2873 = vadd.xlane.f32.xlu0 %v2872_v16 }
0x1114   : > { %2895 = vadd.xlane.f32.xlu1 %v2894_v20  ;;  %2892 = vadd.xlane.f32.xlu0 %v2891_v11 }
0x118d   : > { %v2871_v30 = vpop.xlane.xlu1 %2870 }
0x118e   : > { %v2897_v31 = vsel %vm859_vm5, %v2871_v30, 0.0 }
0x1191   : > { %v2877_v12 = vpop.xlane.xlu0 %2876 }
0x1192   : > { %v2927_v53 = vsel %vm859_vm5, %v2877_v12, 0.0 }
0x1195   : > { %v2887_v36 = vpop.xlane.xlu0 %2886  ;;  %v2880_v15 = vpop.xlane.xlu1 %2879 }
0x1196   : > { %v2911_v25 = vsel %vm859_vm5, %v2887_v36, 0.0  ;;  %v2928_v13 = vsel %vm859_vm5, %v2880_v15, 0.0 }
0x1197   : > { %v2929_v58 = vadd.f32 %v2928_v13, %v2927_v53 }
0x1199   : > { %v2874_v10 = vpop.xlane.xlu0 %2873  ;;  %v2890_v18 = vpop.xlane.xlu1 %2889 }
0x119a   : > { %v2898_v19 = vsel %vm859_vm5, %v2874_v10, 0.0  ;;  %v2912_v21 = vsel %vm859_vm5, %v2890_v18, 0.0 }
0x119b   : > { %v2899_v24 = vadd.f32 %v2898_v19, %v2897_v31  ;;  %v2913_v22 = vadd.f32 %v2912_v21, %v2911_v25 }
0x119d   : > { %v2893_v62 = vpop.xlane.xlu0 %2892  ;;  %2900 = vadd.xlane.f32.xlu0 %v2899_v24  ;;  %2914 = vadd.xlane.f32.xlu1 %v2913_v22  ;;  %v2896_v27 = vpop.xlane.xlu1 %2895 }
0x119e   : > { %v2941_v40 = vsel %vm859_vm5, %v2893_v62, 0.0  ;;  %v2942_v47 = vsel %vm859_vm5, %v2896_v27, 0.0  ;;  %v4896_v62 = vld [vmem:[%s5931_s4] sm:$0xff]  ;;  %v4897_v27 = vld [vmem:[%s5931_s4 + $0x8] sm:$0xff] }
0x119f   : > { %v2943_v41 = vadd.f32 %v2942_v47, %v2941_v40  ;;  %v4788_v47 = vld [vmem:[#allocation5 + $0x20] sm:$0xff]  }
0x11a0   : > { %4524 = vmatprep.mubr.msk.bf16.mxu0 %vm412_vm3, %v4788_v47 }
0x11a1   : > { %2930 = vadd.xlane.f32.xlu0 %v2929_v58  ;;  %2944 = vadd.xlane.f32.xlu1 %v2943_v41  ;;  %v5710_v58 = vld [vmem:[%s5931_s4] sm:$0xff]  ;;  %v5023_v41 = vmov 15  }
0x11b2   : > { %2998 = vperm.xlu1 %4727, %v4894_v44  }
0x11b6   : > { %3002 = vperm.xlu1 %4727, %v4895_v45  }
0x11ba   : > { %4728 = vset.pattern.permute.xlu1 %v5022_v43 }
0x11bb   : > { %3018 = vperm.xlu1 %4728, %v4894_v44   ;;  %v5715_v44 = vld [vmem:[%s5931_s4 + $0x10] sm:$0xff] }
0x11bf   : > { %3022 = vperm.xlu1 %4728, %v4895_v45   ;;  %v5729_v45 = vld [vmem:[%s5931_s4 + $0x18] sm:$0xff] }
0x11c3   : > { %4729 = vset.pattern.permute.xlu1 %v4997_v0 }
0x1226   : > { %v2901_v46 = vpop.xlane.xlu0 %2900  ;;  %v2915_v49 = vpop.xlane.xlu1 %2914 }
0x1227   : > { %v2902_v33 = vrot.slane %v2901_v46, 4  ;;  %v2916_v32 = vrot.slane %v2915_v49, 4 }
0x1229   : > { %v2903_v50 = vadd.f32 %v2902_v33, %v2901_v46  ;;  %v2917_v29 = vadd.f32 %v2916_v32, %v2915_v49 }
0x122a   : > { %v2931_v23 = vpop.xlane.xlu0 %2930  ;;  %v2945_v34 = vpop.xlane.xlu1 %2944 }
0x122b   : > { %v2904_v51 = vrot.slane %v2903_v50, 2  ;;  %v2932_v52 = vrot.slane %v2931_v23, 4  ;;  %v2946_v48 = vrot.slane %v2945_v34, 4  ;;  %v2918_v55 = vrot.slane %v2917_v29, 2 }
0x122d   : > { %v2933_v56 = vadd.f32 %v2932_v52, %v2931_v23  ;;  %v2947_v57 = vadd.f32 %v2946_v48, %v2945_v34  ;;  %v2905_v60 = vadd.f32 %v2904_v51, %v2903_v50  ;;  %v2919_v61 = vadd.f32 %v2918_v55, %v2917_v29 }
0x122f   : > { %v2934_v35 = vrot.slane %v2933_v56, 2  ;;  %v2906_v63 = vrot.slane %v2905_v60, 1  ;;  %v2920_v1 = vrot.slane %v2919_v61, 1  ;;  %v2948_v2 = vrot.slane %v2947_v57, 2 }
0x1231   : > { %v2907_v4 = vadd.f32 %v2906_v63, %v2905_v60  ;;  %v2921_v7 = vadd.f32 %v2920_v1, %v2919_v61  ;;  %v2935_v8 = vadd.f32 %v2934_v35, %v2933_v56  ;;  %v2949_v9 = vadd.f32 %v2948_v2, %v2947_v57 }
0x1233   : > { %4592 = vpush %v2907_v4  ;;  %v2936_v16 = vrot.slane %v2935_v8, 1  ;;  %v2950_v14 = vrot.slane %v2949_v9, 1 }
0x1234   : > { %4594 = vpush %v2921_v7 }
0x1235   : > { %v2937_v38 = vadd.f32 %v2936_v16, %v2935_v8  ;;  %v2951_v20 = vadd.f32 %v2950_v14, %v2949_v9 }
0x1237   : > { %4596 = vpush %v2937_v38 }
0x1238   : > { %4598 = vpush %v2951_v20 }
0x1264   : > { %s4593_s23 = spop %4592 }
0x1265   : > { %v2909_v11 = vstv %s4593_s23  ;;  %s4595_s7 = spop %4594 }
0x1266   : > { %v2910_v30 = vmul.f32 0.0009765625, %v2909_v11  ;;  %v2923_v12 = vstv %s4595_s7 }
0x1267   : > { %v2924_v15 = vmul.f32 0.0009765625, %v2923_v12 }
0x1268   : > { %v2925_v36 = vmul.f32 %v2910_v30, %v2910_v30  ;;  %2959 = vperm.xlu1 %4729, %v2910_v30   ;;  %s4597_s26 = spop %4596 }
0x1269   : > { %v2939_v10 = vstv %s4597_s26  ;;  %s4599_s8 = spop %4598 }
0x126a   : > { %v2926_v18 = vsub.f32 %v2924_v15, %v2925_v36  ;;  %v2940_v31 = vmul.f32 0.0009765625, %v2939_v10  ;;  %v2953_v25 = vstv %s4599_s8 }
0x126b   : > { %v2954_v24 = vmul.f32 0.0009765625, %v2953_v25 }
0x126c   : > { %v2971_v19 = vadd.f32 1e-05, %v2926_v18  ;;  %v2955_v21 = vmul.f32 %v2940_v31, %v2940_v31  ;;  %2964 = vperm.xlu0 %4730, %v2940_v31  }
0x126e   : > { %4850 = vrsqrt.f32 %v2971_v19  ;;  %v2956_v22 = vsub.f32 %v2954_v24, %v2955_v21 }
0x1270   : > { %v2972_v13 = vadd.f32 1e-05, %v2956_v22  ;;  %4731 = vset.pattern.permute.xlu0 %v5021_v42 }
0x1271   : > { %2990 = vperm.xlu0 %4731, %v4896_v62  }
0x1272   : > { %4852 = vrsqrt.f32 %v2972_v13 }
0x1275   : > { %4734 = vset.pattern.permute.xlu0 %v5022_v43 }
0x1276   : > { %3014 = vperm.xlu0 %4734, %v4897_v27  }
0x127a   : > { %4736 = vset.pattern.permute.xlu0 %v5023_v41 }
0x127b   : > { %v4851_v53 = vpop.eup %4850  ;;  %3096 = vperm.xlu0 %4736, %v5715_v44  }
0x127c   : > { %2977 = vperm.xlu1 %4729, %v4851_v53  }
0x127f   : > { %v4853_v40 = vpop.eup %4852  ;;  %4741 = vset.pattern.permute.xlu0 %v4997_v0 }
0x1280   : > { %2982 = vperm.xlu1 %4729, %v4853_v40  }
0x1284   : > { %4732 = vset.pattern.permute.xlu1 %v5021_v42  ;;  %v5722_v42 = vld [vmem:[%s5931_s4 + $0x8] sm:$0xff] }
0x1285   : > { %2994 = vperm.xlu1 %4732, %v4897_v27  }
0x1289   : > { %4733 = vset.pattern.permute.xlu1 %v5022_v43  ;;  %v2999_v43 = vpop.permute.xlu1 %2998 }
0x128a   : > { %3010 = vperm.xlu1 %4733, %v4896_v62  }
0x128d   : > { %v3003_v46 = vpop.permute.xlu1 %3002 }
0x128e   : > { %4735 = vset.pattern.permute.xlu1 %v5023_v41 }
0x128f   : > { %3086 = vperm.xlu1 %4735, %v5710_v58  }
0x1291   : > { %v3019_v49 = vpop.permute.xlu1 %3018 }
0x1293   : > { %3091 = vperm.xlu1 %4735, %v5722_v42  }
0x1295   : > { %v3023_v33 = vpop.permute.xlu1 %3022 }
0x1297   : > { %3101 = vperm.xlu1 %4735, %v5729_v45  }
0x12e3   : > { %v2960_v32 = vpop.permute.xlu1 %2959 }
0x12e4   : > { %v2968_v56 = vsub.f32 %v5656_v37, %v2960_v32  ;;  %v2967_v57 = vsub.f32 %v5648_v54, %v2960_v32 }
0x12e7   : > { %v2965_v50 = vpop.permute.xlu0 %2964 }
0x12e8   : > { %v2969_v23 = vsub.f32 %v5654_v59, %v2965_v50  ;;  %v2970_v34 = vsub.f32 %v5663_v3, %v2965_v50 }
0x12ec   : > { %v2991_v52 = vpop.permute.xlu0 %2990 }
0x12f1   : > { %v3015_v7 = vpop.permute.xlu0 %3014 }
0x12f7   : > { %v2978_v29 = vpop.permute.xlu1 %2977 }
0x12f8   : > { %v2986_v35 = vmul.f32 %v2978_v29, %v2968_v56  ;;  %v2985_v63 = vmul.f32 %v2978_v29, %v2967_v57  ;;  %v4789_v56 = vld [vmem:[#allocation5 + $0x28] sm:$0xff]  }
0x12fa   : > { %v3005_v16 = vmul.f32 %v2991_v52, %v2985_v63 }
0x12fb   : > { %v2983_v51 = vpop.permute.xlu1 %2982 }
0x12fc   : > { %v2987_v48 = vmul.f32 %v2983_v51, %v2969_v23  ;;  %v2988_v55 = vmul.f32 %v2983_v51, %v2970_v34 }
0x12fe   : > { %v3007_v60 = vmul.f32 %v2999_v43, %v2987_v48  ;;  %v3008_v61 = vmul.f32 %v3003_v46, %v2988_v55 }
0x1300   : > { %v3027_v1 = vadd.f32 %v3019_v49, %v3007_v60  ;;  %v3028_v2 = vadd.f32 %v3023_v33, %v3008_v61  ;;  %v2995_v4 = vpop.permute.xlu1 %2994  ;;  %v3097_v61 = vpop.permute.xlu0 %3096 }
0x1301   : > { %v3006_v8 = vmul.f32 %v2995_v4, %v2986_v35 }
0x1302   : > { %v3033_v59 = vmul.f32 1.442695, %v3027_v1  ;;  %v3035_v9 = vmul.f32 1.442695, %v3028_v2  ;;  %v3051_v54 = vmul.f32 0.5, %v3027_v1  ;;  %v3052_v11 = vmul.f32 0.5, %v3028_v2 }
0x1303   : > { %v3026_v3 = vadd.f32 %v3015_v7, %v3006_v8  ;;  %v3043_v36 = vand.u32 2147483647, %v3027_v1  ;;  %v3044_v10 = vand.u32 2147483647, %v3028_v2  ;;  %vm3067_vm0 = vcmp.gt.f32.partialorder %v3027_v1, 0.0 }
0x1304   : > { %4854 = vpow2.f32 %v3033_v59  ;;  %v3055_v30 = vadd.f32 1.0, %v3051_v54  ;;  %v3056_v15 = vadd.f32 1.0, %v3052_v11  ;;  %vm3068_vm1 = vcmp.gt.f32.partialorder %v3028_v2, 0.0 }
0x1305   : > { %v3011_v14 = vpop.permute.xlu1 %3010  ;;  %4856 = vpow2.f32 %v3035_v9  ;;  %v3031_v37 = vmul.f32 1.442695, %v3026_v3  ;;  %v3050_v12 = vmul.f32 0.5, %v3026_v3  ;;  %vm3047_vm14 = vcmp.lt.f32.partialorder %v3043_v36, 0.001 }
0x1306   : > { %v3025_v38 = vadd.f32 %v3011_v14, %v3005_v16  ;;  %v3059_v21 = vmul.f32 %v3055_v30, %v3027_v1  ;;  %v3060_v13 = vmul.f32 %v3056_v15, %v3028_v2  ;;  %v3042_v62 = vand.u32 2147483647, %v3026_v3 }
0x1307   : > { %4858 = vpow2.f32 %v3031_v37  ;;  %v3054_v24 = vadd.f32 1.0, %v3050_v12  ;;  %vm3048_vm15 = vcmp.lt.f32.partialorder %v3044_v10, 0.001  ;;  %vm3066_vm9 = vcmp.gt.f32.partialorder %v3026_v3, 0.0 }
0x1308   : > { %v3029_v20 = vmul.f32 1.442695, %v3025_v38  ;;  %v3049_v18 = vmul.f32 0.5, %v3025_v38  ;;  %v3041_v43 = vand.u32 2147483647, %v3025_v38  ;;  %vm3065_vm8 = vcmp.gt.f32.partialorder %v3025_v38, 0.0 }
0x1309   : > { %v3058_v33 = vmul.f32 %v3054_v24, %v3026_v3  ;;  %vm3046_vm6 = vcmp.lt.f32.partialorder %v3042_v62, 0.001 }
0x130a   : > { %4860 = vpow2.f32 %v3029_v20  ;;  %v3053_v53 = vadd.f32 1.0, %v3049_v18  ;;  %vm3045_vm7 = vcmp.lt.f32.partialorder %v3041_v43, 0.001  ;;  %v3087_v57 = vpop.permute.xlu1 %3086 }
0x130c   : > { %v3057_v23 = vmul.f32 %v3053_v53, %v3025_v38 }
0x130e   : > { %v3092_v60 = vpop.permute.xlu1 %3091 }
0x1311   : > { %v4855_v31 = vpop.eup %4854 }
0x1312   : > { %v4857_v25 = vpop.eup %4856  ;;  %v4202_v19 = vadd.f32 -1.0, %v4855_v31  ;;  %v3102_v7 = vpop.permute.xlu1 %3101 }
0x1313   : > { %v4203_v22 = vadd.f32 -1.0, %v4857_v25 }
0x1314   : > { %v3063_v27 = vsel %vm3047_vm14, %v3059_v21, %v4202_v19  ;;  %v4859_v40 = vpop.eup %4858 }
0x1315   : > { %v3064_v47 = vsel %vm3048_vm15, %v3060_v13, %v4203_v22  ;;  %v3071_v41 = vsel %vm3067_vm0, %v3027_v1, %v3063_v27  ;;  %v4201_v49 = vadd.f32 -1.0, %v4859_v40 }
0x1316   : > { %v3072_v46 = vsel %vm3068_vm1, %v3028_v2, %v3064_v47 }
0x1317   : > { %v4861_v32 = vpop.eup %4860  ;;  %v3083_v50 = vpack.c.bf16 %v3072_v46, %v3071_v41  ;;  %v3062_v34 = vsel %vm3046_vm6, %v3058_v33, %v4201_v49 }
0x1318   : > { %v4200_v29 = vadd.f32 -1.0, %v4861_v32  ;;  %v3070_v48 = vsel %vm3066_vm9, %v3026_v3, %v3062_v34 }
0x1319   : > { %4520 = vmatprep.subr.bf16.mxu0 %v3083_v50 }
0x131a   : > { %4521 = vmatpush3.bf16.msra.mxu0 %v3083_v50  ;;  %v3061_v51 = vsel %vm3045_vm7, %v3057_v23, %v4200_v29  ;;  %v5024_v50 = vmov 16   ;;  %v5025_v29 = vmov 17  }
0x131b   : > { %v3069_v52 = vsel %vm3065_vm8, %v3025_v38, %v3061_v51  ;;  %4737 = vset.pattern.permute.xlu1 %v5024_v50 }
0x131c   : > { %v3082_v55 = vpack.c.bf16 %v3070_v48, %v3069_v52 }
0x131e   : > { %4522 = vmatprep.subr.bf16.mxu0 %v3082_v55 }
0x131f   : > { %4523 = vmatpush3.bf16.msra.mxu0 %v3082_v55 }
0x1322   : > { %4525 = vmatmul.mubr.msk.bf16.vlgmr.msra.gmra.mxu0 %vm412_vm3, %v4789_v56 }
0x13e2   : > { %v4526_v35 = vpop.f32.mrf.mxu0 }
0x13e3   : > { %v5737_v63 = vadd.f32 %v4526_v35, %v3097_v61 }
0x13e4   : > { %v3154_v1 = vpop.f32.mrf.mxu0 }
0x13e5   : > { %v5739_v2 = vadd.f32 %v3154_v1, %v3087_v57  ;;  %v3175_v4 = vsel %vm830_vm4, %v5737_v63, 0.0  ;;  %v3183_v11 = vmul.f32 %v5737_v63, %v5737_v63 }
0x13e6   : > { %3176 = vadd.xlane.f32.xlu0 %v3175_v4  ;;  %v4527_v8 = vpop.f32.mrf.mxu0 }
0x13e7   : > { %v5743_v59 = vadd.f32 %v4527_v8, %v3102_v7  ;;  %v3169_v9 = vsel %vm830_vm4, %v5739_v2, 0.0  ;;  %v3181_v3 = vmul.f32 %v5739_v2, %v5739_v2  ;;  %v3191_v36 = vsel %vm830_vm4, %v3183_v11, 0.0 }
0x13e8   : > { %v3157_v16 = vpop.f32.mrf.mxu0  ;;  %3170 = vadd.xlane.f32.xlu1 %v3169_v9 }
0x13e9   : > { %v5749_v14 = vadd.f32 %v3157_v16, %v3092_v60  ;;  %v3185_v38 = vsel %vm830_vm4, %v3181_v3, 0.0  ;;  %v3178_v37 = vsel %vm830_vm4, %v5743_v59, 0.0  ;;  %v3184_v12 = vmul.f32 %v5743_v59, %v5743_v59 }
0x13ea   : > { %3186 = vadd.xlane.f32.xlu0 %v3185_v38 }
0x13eb   : > { %v3182_v20 = vmul.f32 %v5749_v14, %v5749_v14  ;;  %v3172_v54 = vsel %vm830_vm4, %v5749_v14, 0.0  ;;  %v3194_v15 = vsel %vm830_vm4, %v3184_v12, 0.0 }
0x13ec   : > { %3179 = vadd.xlane.f32.xlu1 %v3178_v37 }
0x13ed   : > { %v3188_v30 = vsel %vm830_vm4, %v3182_v20, 0.0 }
0x13ee   : > { %3173 = vadd.xlane.f32.xlu0 %v3172_v54 }
0x13f0   : > { %3189 = vadd.xlane.f32.xlu1 %v3188_v30 }
0x13f2   : > { %3192 = vadd.xlane.f32.xlu0 %v3191_v36 }
0x13f4   : > { %3195 = vadd.xlane.f32.xlu1 %v3194_v15 }
0x146f   : > { %v3177_v10 = vpop.xlane.xlu0 %3176 }
0x1470   : > { %v3227_v41 = vsel %vm859_vm5, %v3177_v10, 0.0 }
0x1471   : > { %v3171_v18 = vpop.xlane.xlu1 %3170 }
0x1472   : > { %v3197_v21 = vsel %vm859_vm5, %v3171_v18, 0.0 }
0x1473   : > { %v3187_v31 = vpop.xlane.xlu0 %3186 }
0x1474   : > { %v3211_v62 = vsel %vm859_vm5, %v3187_v31, 0.0 }
0x1475   : > { %v3180_v25 = vpop.xlane.xlu1 %3179 }
0x1476   : > { %v3228_v27 = vsel %vm859_vm5, %v3180_v25, 0.0 }
0x1477   : > { %v3174_v19 = vpop.xlane.xlu0 %3173  ;;  %v3229_v43 = vadd.f32 %v3228_v27, %v3227_v41 }
0x1478   : > { %v3198_v24 = vsel %vm859_vm5, %v3174_v19, 0.0 }
0x1479   : > { %v3199_v22 = vadd.f32 %v3198_v24, %v3197_v21  ;;  %v3190_v13 = vpop.xlane.xlu1 %3189 }
0x147a   : > { %v3212_v53 = vsel %vm859_vm5, %v3190_v13, 0.0 }
0x147b   : > { %v3213_v40 = vadd.f32 %v3212_v53, %v3211_v62  ;;  %v3193_v47 = vpop.xlane.xlu0 %3192  ;;  %3200 = vadd.xlane.f32.xlu0 %v3199_v22 }
0x147c   : > { %v3241_v49 = vsel %vm859_vm5, %v3193_v47, 0.0 }
0x147d   : > { %3214 = vadd.xlane.f32.xlu1 %v3213_v40  ;;  %v3196_v46 = vpop.xlane.xlu1 %3195 }
0x147e   : > { %v3242_v33 = vsel %vm859_vm5, %v3196_v46, 0.0 }
0x147f   : > { %v3243_v32 = vadd.f32 %v3242_v33, %v3241_v49  ;;  %3230 = vadd.xlane.f32.xlu0 %v3229_v43 }
0x1481   : > { %3244 = vadd.xlane.f32.xlu1 %v3243_v32 }
0x1492   : > { %3298 = vperm.xlu1 %4737, %v5715_v44  }
0x1496   : > { %3302 = vperm.xlu1 %4737, %v5729_v45  }
0x149a   : > { %4738 = vset.pattern.permute.xlu1 %v5025_v29 }
0x149b   : > { %3318 = vperm.xlu1 %4738, %v5715_v44  }
0x149f   : > { %3322 = vperm.xlu1 %4738, %v5729_v45  }
0x14a3   : > { %4739 = vset.pattern.permute.xlu1 %v5024_v50 }
0x14a4   : > { %3290 = vperm.xlu1 %4739, %v5710_v58  }
0x14a8   : > { %4740 = vset.pattern.permute.xlu1 %v4997_v0 }
0x1504   : > { %v3201_v23 = vpop.xlane.xlu0 %3200 }
0x1505   : > { %v3202_v34 = vrot.slane %v3201_v23, 4 }
0x1506   : > { %v3215_v51 = vpop.xlane.xlu1 %3214 }
0x1507   : > { %v3203_v52 = vadd.f32 %v3202_v34, %v3201_v23  ;;  %v3216_v48 = vrot.slane %v3215_v51, 4 }
0x1508   : > { %v3231_v55 = vpop.xlane.xlu0 %3230 }
0x1509   : > { %v3204_v56 = vrot.slane %v3203_v52, 2  ;;  %v3217_v57 = vadd.f32 %v3216_v48, %v3215_v51  ;;  %v3232_v60 = vrot.slane %v3231_v55, 4 }
0x150a   : > { %v3245_v61 = vpop.xlane.xlu1 %3244 }
0x150b   : > { %v3218_v35 = vrot.slane %v3217_v57, 2  ;;  %v3233_v44 = vadd.f32 %v3232_v60, %v3231_v55  ;;  %v3246_v1 = vrot.slane %v3245_v61, 4  ;;  %v3205_v45 = vadd.f32 %v3204_v56, %v3203_v52 }
0x150d   : > { %v3234_v4 = vrot.slane %v3233_v44, 2  ;;  %v3247_v7 = vadd.f32 %v3246_v1, %v3245_v61  ;;  %v3206_v8 = vrot.slane %v3205_v45, 1  ;;  %v3219_v9 = vadd.f32 %v3218_v35, %v3217_v57 }
0x150e   : > { %v3299_v43 = vpop.permute.xlu1 %3298 }
0x150f   : > { %v3248_v3 = vrot.slane %v3247_v7, 2  ;;  %v3207_v16 = vadd.f32 %v3206_v8, %v3205_v45  ;;  %v3220_v38 = vrot.slane %v3219_v9, 1  ;;  %v3235_v37 = vadd.f32 %v3234_v4, %v3233_v44 }
0x1511   : > { %4600 = vpush %v3207_v16  ;;  %v3221_v20 = vadd.f32 %v3220_v38, %v3219_v9  ;;  %v3236_v54 = vrot.slane %v3235_v37, 1  ;;  %v3249_v11 = vadd.f32 %v3248_v3, %v3247_v7 }
0x1512   : > { %v3303_v46 = vpop.permute.xlu1 %3302 }
0x1513   : > { %4602 = vpush %v3221_v20  ;;  %v3237_v30 = vadd.f32 %v3236_v54, %v3235_v37  ;;  %v3250_v12 = vrot.slane %v3249_v11, 1 }
0x1515   : > { %4604 = vpush %v3237_v30  ;;  %v3251_v36 = vadd.f32 %v3250_v12, %v3249_v11 }
0x1516   : > { %v3319_v49 = vpop.permute.xlu1 %3318 }
0x1517   : > { %4606 = vpush %v3251_v36 }
0x151a   : > { %v3323_v33 = vpop.permute.xlu1 %3322 }
0x151f   : > { %v3291_v32 = vpop.permute.xlu1 %3290 }
0x1542   : > { %s4601_s30 = spop %4600 }
0x1543   : > { %v3209_v15 = vstv %s4601_s30 }
0x1544   : > { %v3210_v10 = vmul.f32 0.0009765625, %v3209_v15  ;;  %s4603_s23 = spop %4602 }
0x1545   : > { %v3223_v18 = vstv %s4603_s23 }
0x1546   : > { %v3225_v31 = vmul.f32 %v3210_v10, %v3210_v10  ;;  %v3224_v25 = vmul.f32 0.0009765625, %v3223_v18  ;;  %3259 = vperm.xlu1 %4740, %v3210_v10   ;;  %s4605_s7 = spop %4604 }
0x1547   : > { %v3239_v19 = vstv %s4605_s7 }
0x1548   : > { %v3226_v21 = vsub.f32 %v3224_v25, %v3225_v31  ;;  %v3240_v24 = vmul.f32 0.0009765625, %v3239_v19  ;;  %s4607_s26 = spop %4606 }
0x1549   : > { %v3253_v22 = vstv %s4607_s26 }
0x154a   : > { %v3271_v13 = vadd.f32 1e-05, %v3226_v21  ;;  %v3255_v62 = vmul.f32 %v3240_v24, %v3240_v24  ;;  %v3254_v27 = vmul.f32 0.0009765625, %v3253_v22  ;;  %3264 = vperm.xlu0 %4741, %v3240_v24  }
0x154c   : > { %4862 = vrsqrt.f32 %v3271_v13  ;;  %v3256_v53 = vsub.f32 %v3254_v27, %v3255_v62 }
0x154e   : > { %v3272_v40 = vadd.f32 1e-05, %v3256_v53  ;;  %4742 = vset.pattern.permute.xlu0 %v5024_v50 }
0x154f   : > { %3294 = vperm.xlu0 %4742, %v5722_v42  }
0x1550   : > { %4864 = vrsqrt.f32 %v3272_v40 }
0x1553   : > { %4744 = vset.pattern.permute.xlu0 %v4997_v0 }
0x1559   : > { %v4863_v47 = vpop.eup %4862 }
0x155a   : > { %3277 = vperm.xlu1 %4740, %v4863_v47  }
0x155d   : > { %v4865_v41 = vpop.eup %4864 }
0x155e   : > { %3282 = vperm.xlu1 %4740, %v4865_v41  }
0x1562   : > { %4743 = vset.pattern.permute.xlu1 %v5025_v29 }
0x1563   : > { %3310 = vperm.xlu1 %4743, %v5710_v58  }
0x1567   : > { %3314 = vperm.xlu1 %4743, %v5722_v42  }
0x156b   : > { %4745 = vset.pattern.permute.xlu1 %v4997_v0 }
0x15c1   : > { %v3260_v50 = vpop.permute.xlu1 %3259 }
0x15c2   : > { %v3267_v51 = vsub.f32 %v5739_v2, %v3260_v50  ;;  %v3268_v56 = vsub.f32 %v5749_v14, %v3260_v50 }
0x15c5   : > { %v3265_v23 = vpop.permute.xlu0 %3264 }
0x15c6   : > { %v3269_v52 = vsub.f32 %v5737_v63, %v3265_v23  ;;  %v3270_v29 = vsub.f32 %v5743_v59, %v3265_v23 }
0x15ca   : > { %v3295_v44 = vpop.permute.xlu0 %3294 }
0x15d5   : > { %v3278_v34 = vpop.permute.xlu1 %3277 }
0x15d6   : > { %v3285_v48 = vmul.f32 %v3278_v34, %v3267_v51  ;;  %v3286_v61 = vmul.f32 %v3278_v34, %v3268_v56 }
0x15d8   : > { %v3305_v35 = vmul.f32 %v3291_v32, %v3285_v48  ;;  %v3306_v8 = vmul.f32 %v3295_v44, %v3286_v61 }
0x15d9   : > { %v3283_v58 = vpop.permute.xlu1 %3282 }
0x15da   : > { %v3287_v55 = vmul.f32 %v3283_v58, %v3269_v52  ;;  %v3288_v42 = vmul.f32 %v3283_v58, %v3270_v29 }
0x15dc   : > { %v3307_v57 = vmul.f32 %v3299_v43, %v3287_v55  ;;  %v3308_v60 = vmul.f32 %v3303_v46, %v3288_v42 }
0x15de   : > { %v3327_v1 = vadd.f32 %v3319_v49, %v3307_v57  ;;  %v3328_v45 = vadd.f32 %v3323_v33, %v3308_v60  ;;  %v3311_v4 = vpop.permute.xlu1 %3310  ;;  %v4794_v57 = vld [vmem:[#allocation7 + $0x10] sm:$0xff]  }
0x15df   : > { %v3325_v7 = vadd.f32 %v3311_v4, %v3305_v35  ;;  %4532 = vmatprep.mubr.msk.bf16.mxu1 %vm412_vm3, %v4794_v57  ;;  %v4796_v35 = vld [vmem:[#allocation7] sm:$0xff]  }
0x15e0   : > { %v3333_v2 = vmul.f32 1.442695, %v3327_v1  ;;  %v3335_v59 = vmul.f32 1.442695, %v3328_v45  ;;  %v3351_v14 = vmul.f32 0.5, %v3327_v1  ;;  %v3352_v37 = vmul.f32 0.5, %v3328_v45  ;;  %4540 = vmatprep.mubr.msk.bf16.mxu0 %vm412_vm3, %v4796_v35 }
0x15e1   : > { %v3329_v63 = vmul.f32 1.442695, %v3325_v7  ;;  %v3349_v38 = vmul.f32 0.5, %v3325_v7  ;;  %v3343_v11 = vand.u32 2147483647, %v3327_v1  ;;  %vm3365_vm11 = vcmp.gt.f32.partialorder %v3325_v7, 0.0 }
0x15e2   : > { %v3315_v9 = vpop.permute.xlu1 %3314  ;;  %4866 = vpow2.f32 %v3333_v2  ;;  %v3355_v20 = vadd.f32 1.0, %v3351_v14  ;;  %v3341_v12 = vand.u32 2147483647, %v3325_v7  ;;  %v3356_v15 = vadd.f32 1.0, %v3352_v37  ;;  %v5825_v2 = vld [vmem:[%s5932_s5] sm:$0xff]  ;;  %v4795_v14 = vld [vmem:[#allocation7 + $0x18] sm:$0xff]  }
0x15e3   : > { %4868 = vpow2.f32 %v3329_v63  ;;  %v3326_v3 = vadd.f32 %v3315_v9, %v3306_v8  ;;  %v3353_v54 = vadd.f32 1.0, %v3349_v38  ;;  %v3344_v25 = vand.u32 2147483647, %v3328_v45  ;;  %v5832_v8 = vld [vmem:[%s5932_s5 + $0x8] sm:$0xff]  ;;  %v5837_v63 = vld [vmem:[%s5932_s5 + $0x18] sm:$0xff]  ;;  %v5844_v9 = vld [vmem:[%s5932_s5 + $0x10] sm:$0xff] }
0x15e4   : > { %4870 = vpow2.f32 %v3335_v59  ;;  %v3359_v31 = vmul.f32 %v3355_v20, %v3327_v1  ;;  %vm3347_vm4 = vcmp.lt.f32.partialorder %v3343_v11, 0.001  ;;  %vm3345_vm10 = vcmp.lt.f32.partialorder %v3341_v12, 0.001  ;;  %v4798_v38 = vld [vmem:[#allocation7 + $0x20] sm:$0xff]   ;;  %v4799_v12 = vld [vmem:[#allocation7 + $0x28] sm:$0xff]  }
0x15e5   : > { %v3331_v16 = vmul.f32 1.442695, %v3326_v3  ;;  %v3350_v30 = vmul.f32 0.5, %v3326_v3  ;;  %v3357_v24 = vmul.f32 %v3353_v54, %v3325_v7  ;;  %v3342_v62 = vand.u32 2147483647, %v3326_v3  ;;  %v4797_v54 = vld [vmem:[#allocation7 + $0x8] sm:$0xff]  }
0x15e6   : > { %vm3367_vm12 = vcmp.gt.f32.partialorder %v3327_v1, 0.0  ;;  %v3360_v40 = vmul.f32 %v3356_v15, %v3328_v45  ;;  %vm3348_vm13 = vcmp.lt.f32.partialorder %v3344_v25, 0.001  ;;  %vm3366_vm15 = vcmp.gt.f32.partialorder %v3326_v3, 0.0  ;;  %v4801_v15 = vld [vmem:[#allocation7 + $0x38] sm:$0xff]  }
0x15e7   : > { %4872 = vpow2.f32 %v3331_v16  ;;  %v3354_v22 = vadd.f32 1.0, %v3350_v30  ;;  %vm3346_vm14 = vcmp.lt.f32.partialorder %v3342_v62, 0.001  ;;  %vm3368_vm0 = vcmp.gt.f32.partialorder %v3328_v45, 0.0 }
0x15e9   : > { %v3358_v33 = vmul.f32 %v3354_v22, %v3326_v3 }
0x15ef   : > { %v4867_v36 = vpop.eup %4866 }
0x15f0   : > { %v4869_v10 = vpop.eup %4868  ;;  %v4210_v18 = vadd.f32 -1.0, %v4867_v36 }
0x15f1   : > { %v4871_v19 = vpop.eup %4870  ;;  %v4208_v21 = vadd.f32 -1.0, %v4869_v10 }
0x15f2   : > { %v3363_v13 = vsel %vm3347_vm4, %v3359_v31, %v4210_v18  ;;  %v4211_v27 = vadd.f32 -1.0, %v4871_v19 }
0x15f3   : > { %v3361_v53 = vsel %vm3345_vm10, %v3357_v24, %v4208_v21  ;;  %v3371_v43 = vsel %vm3367_vm12, %v3327_v1, %v3363_v13 }
0x15f4   : > { %v4873_v47 = vpop.eup %4872  ;;  %v3369_v41 = vsel %vm3365_vm11, %v3325_v7, %v3361_v53  ;;  %v3364_v32 = vsel %vm3348_vm13, %v3360_v40, %v4211_v27  ;;  %v3375_v23 = vadd.f32 %v3371_v43, %v5588_v26 }
0x15f5   : > { %v3373_v46 = vadd.f32 %v3369_v41, %v5594_v28  ;;  %v4209_v49 = vadd.f32 -1.0, %v4873_v47  ;;  %v3372_v52 = vsel %vm3368_vm0, %v3328_v45, %v3364_v32 }
0x15f6   : > { %v4258_v48 = vpack.c.bf16 %v3375_v23, %v3375_v23  ;;  %v3376_v28 = vadd.f32 %v3372_v52, %v5583_v17 }
0x15f7   : > { %v4256_v50 = vpack.c.bf16 %v3373_v46, %v3373_v46  ;;  %v3362_v34 = vsel %vm3346_vm14, %v3358_v33, %v4209_v49 }
0x15f8   : > { %v3370_v51 = vsel %vm3366_vm15, %v3326_v3, %v3362_v34  ;;  %v4259_v55 = vpack.c.bf16 %v3376_v28, %v3376_v28 }
0x15f9   : > { %3405 = vrot.lane.b32.xlu0 %v4256_v50, %s4998_s24  ;;  %v3374_v29 = vadd.f32 %v3370_v51, %v5597_v39 }
0x15fb   : > { %v4257_v58 = vpack.c.bf16 %v3374_v29, %v3374_v29 }
0x15fd   : > { %3409 = vrot.lane.b32.xlu0 %v4258_v48, %s4998_s24  ;;  %3407 = vrot.lane.b32.xlu1 %v4257_v58, %s4998_s24 }
0x1601   : > { %3393 = vrot.lane.b32.xlu0 %v4258_v48, %s4999_s25  ;;  %3411 = vrot.lane.b32.xlu1 %v4259_v55, %s4998_s24 }
0x1605   : > { %3389 = vrot.lane.b32.xlu0 %v4256_v50, %s4999_s25  ;;  %3395 = vrot.lane.b32.xlu1 %v4259_v55, %s4999_s25 }
0x1609   : > { %3391 = vrot.lane.b32.xlu1 %v4257_v58, %s4999_s25 }
0x166b   : > { %v3406_v26 = vpop.permute.xlu0 %3405 }
0x166c   : > { %3417 = vst.msk [vmem:[#allocation2 + $0x10] sm:$0xf] %vm347_vm2, %v3406_v26 }
0x166f   : > { %v3410_v39 = vpop.permute.xlu0 %3409  ;;  %v3408_v17 = vpop.permute.xlu1 %3407 }
0x1670   : > { %3419 = vst.msk [vmem:[#allocation2 + $0x18] sm:$0xf] %vm347_vm2, %v3410_v39  ;;  %3418 = vst.msk [vmem:[#allocation2 + $0x14] sm:$0xf] %vm347_vm2, %v3408_v17 }
0x1673   : > { %v3394_v42 = vpop.permute.xlu0 %3393  ;;  %v3412_v56 = vpop.permute.xlu1 %3411 }
0x1674   : > { %3403 = vst.msk [vmem:[#allocation2 + $0x8] sm:$0xf] %vm347_vm2, %v3394_v42  ;;  %3420 = vst.msk [vmem:[#allocation2 + $0x1c] sm:$0xf] %vm347_vm2, %v3412_v56 }
0x1677   : > { %v3390_v60 = vpop.permute.xlu0 %3389  ;;  %v3396_v61 = vpop.permute.xlu1 %3395  ;;  %v4791_v45 = vld [vmem:[#allocation2 + $0x10] sm:$0xff]  }
0x1678   : > { %3401 = vst.msk [vmem:[#allocation2] sm:$0xf] %vm347_vm2, %v3390_v60  ;;  %3404 = vst.msk [vmem:[#allocation2 + $0xc] sm:$0xf] %vm347_vm2, %v3396_v61 }
0x167b   : > { %v3392_v44 = vpop.permute.xlu1 %3391  ;;  %v4790_v1 = vld [vmem:[#allocation2 + $0x18] sm:$0xff]  }
0x167c   : > { %3402 = vst.msk [vmem:[#allocation2 + $0x4] sm:$0xf] %vm347_vm2, %v3392_v44  ;;  %3460 = vrot.lane.b32.xlu0 %v4790_v1, %s5001_s27  ;;  %vm3788_vm2 = vcmask 252928  }
0x167f   : > { %v4792_v4 = vld [vmem:[#allocation2 + $0x8] sm:$0xff]  }
0x1680   : > { %3458 = vrot.lane.b32.xlu0 %v4791_v45, %s5001_s27  ;;  %3541 = vrot.lane.b32.xlu1 %v4792_v4, %s5001_s27 }
0x1683   : > { %v4793_v7 = vld [vmem:[#allocation2] sm:$0xff]  }
0x1684   : > { %3617 = vrot.lane.b32.xlu0 %v4792_v4, %s5002_s28  ;;  %3539 = vrot.lane.b32.xlu1 %v4793_v7, %s5001_s27 }
0x1688   : > { %3615 = vrot.lane.b32.xlu0 %v4793_v7, %s5002_s28  ;;  %3697 = vrot.lane.b32.xlu1 %v4790_v1, %s5002_s28 }
0x168c   : > { %3695 = vrot.lane.b32.xlu1 %v4791_v45, %s5002_s28  ;;  %3766 = vperm.xlu0 %4744, %v5825_v2  }
0x1690   : > { %3771 = vperm.xlu1 %4745, %v5832_v8   ;;  %3781 = vperm.xlu0 %4744, %v5837_v63  }
0x1694   : > { %3776 = vperm.xlu1 %4745, %v5844_v9   ;;  %4747 = vset.pattern.permute.xlu0 %v5004_v5 }
0x1698   : > { %4746 = vset.pattern.permute.xlu1 %v5004_v5  ;;  %v4800_v5 = vld [vmem:[#allocation7 + $0x30] sm:$0xff]  }
0x16ee   : > { %v3461_v59 = vpop.permute.xlu0 %3460 }
0x16ef   : > { %4528 = vmatprep.subr.bf16.mxu1 %v3461_v59 }
0x16f0   : > { %4529 = vmatpush3.bf16.msra.mxu1 %v3461_v59 }
0x16f2   : > { %v3459_v3 = vpop.permute.xlu0 %3458  ;;  %v3542_v16 = vpop.permute.xlu1 %3541 }
0x16f3   : > { %4530 = vmatprep.subr.bf16.mxu1 %v3459_v3  ;;  %4536 = vmatprep.subr.bf16.mxu0 %v3542_v16 }
0x16f4   : > { %4531 = vmatpush3.bf16.msra.mxu1 %v3459_v3  ;;  %4537 = vmatpush3.bf16.msra.mxu0 %v3542_v16 }
0x16f6   : > { %v3618_v37 = vpop.permute.xlu0 %3617  ;;  %v3540_v20 = vpop.permute.xlu1 %3539 }
0x16f7   : > { %4533 = vmatmul.mubr.msk.bf16.vlgmr.msra.gmra.mxu1 %vm412_vm3, %v4795_v14  ;;  %4538 = vmatprep.subr.bf16.mxu0 %v3540_v20 }
0x16f8   : > { %4544 = vmatprep.subr.bf16.mxu1 %v3618_v37  ;;  %4539 = vmatpush3.bf16.msra.mxu0 %v3540_v20 }
0x16f9   : > { %4545 = vmatpush3.bf16.msra.mxu1 %v3618_v37  ;;  %4548 = vmatprep.mubr.msk.bf16.mxu1 %vm412_vm3, %v4798_v38 }
0x16fa   : > { %v3616_v11 = vpop.permute.xlu0 %3615  ;;  %v3698_v30 = vpop.permute.xlu1 %3697 }
0x16fb   : > { %4541 = vmatmul.mubr.msk.bf16.vlgmr.msra.gmra.mxu0 %vm412_vm3, %v4797_v54  ;;  %4546 = vmatprep.subr.bf16.mxu1 %v3616_v11 }
0x16fc   : > { %4552 = vmatprep.subr.bf16.mxu0 %v3698_v30  ;;  %4556 = vmatprep.mubr.msk.bf16.mxu0 %vm412_vm3, %v4800_v5 }
0x16fd   : > { %4547 = vmatpush3.bf16.msra.mxu1 %v3616_v11  ;;  %4553 = vmatpush3.bf16.msra.mxu0 %v3698_v30 }
0x16fe   : > { %v3696_v36 = vpop.permute.xlu1 %3695 }
0x16ff   : > { %4554 = vmatprep.subr.bf16.mxu0 %v3696_v36 }
0x1700   : > { %4549 = vmatmul.mubr.msk.bf16.vlgmr.msra.gmra.mxu1 %vm412_vm3, %v4799_v12 }
0x1701   : > { %4555 = vmatpush3.bf16.msra.mxu0 %v3696_v36 }
0x1704   : > { %4557 = vmatmul.mubr.msk.bf16.vlgmr.msra.gmra.mxu0 %vm412_vm3, %v4801_v15 }
0x1707   : > { %v3767_v41 = vpop.permute.xlu0 %3766 }
0x170b   : > { %v3772_v24 = vpop.permute.xlu1 %3771  ;;  %v3782_v17 = vpop.permute.xlu0 %3781 }
0x170f   : > { %v3777_v32 = vpop.permute.xlu1 %3776 }
0x17b7   : > { %v4534_v10 = vpop.f32.mrf.mxu1 }
0x17b9   : > { %v3504_v18 = vpop.f32.mrf.mxu1 }
0x17bb   : > { %v4535_v31 = vpop.f32.mrf.mxu1  ;;  %v4542_v25 = vpop.f32.mrf.mxu0 }
0x17bc   : > { %v3594_v62 = vadd.f32 %v4542_v25, %v4534_v10 }
0x17bd   : > { %v3507_v19 = vpop.f32.mrf.mxu1  ;;  %v3585_v21 = vpop.f32.mrf.mxu0 }
0x17be   : > { %v3586_v40 = vadd.f32 %v3585_v21, %v3504_v18 }
0x17bf   : > { %v4543_v22 = vpop.f32.mrf.mxu0 }
0x17c0   : > { %v4550_v13 = vpop.f32.mrf.mxu1  ;;  %v3597_v49 = vadd.f32 %v4543_v22, %v4535_v31 }
0x17c1   : > { %v3588_v27 = vpop.f32.mrf.mxu0  ;;  %v3678_v47 = vadd.f32 %v4550_v13, %v3594_v62 }
0x17c2   : > { %v3661_v53 = vpop.f32.mrf.mxu1  ;;  %v3589_v51 = vadd.f32 %v3588_v27, %v3507_v19 }
0x17c3   : > { %v3676_v33 = vadd.f32 %v3661_v53, %v3586_v40 }
0x17c4   : > { %v4551_v43 = vpop.f32.mrf.mxu1  ;;  %v4558_v46 = vpop.f32.mrf.mxu0 }
0x17c5   : > { %v3758_v50 = vadd.f32 %v4558_v46, %v3678_v47  ;;  %v3679_v52 = vadd.f32 %v4551_v43, %v3597_v49 }
0x17c6   : > { %v3664_v23 = vpop.f32.mrf.mxu1  ;;  %v3741_v34 = vpop.f32.mrf.mxu0 }
0x17c7   : > { %v5855_v29 = vadd.f32 %v3777_v32, %v3758_v50  ;;  %v3756_v48 = vadd.f32 %v3741_v34, %v3676_v33  ;;  %v3677_v28 = vadd.f32 %v3664_v23, %v3589_v51 }
0x17c8   : > { %v4559_v58 = vpop.f32.mrf.mxu0 }
0x17c9   : > { %v5857_v55 = vadd.f32 %v3767_v41, %v3756_v48  ;;  %v3759_v26 = vadd.f32 %v4559_v58, %v3679_v52  ;;  %v3795_v39 = vsel %vm3788_vm2, %v5855_v29, 0.0  ;;  %v3803_v7 = vmul.f32 %v5855_v29, %v5855_v29 }
0x17ca   : > { %v3744_v42 = vpop.f32.mrf.mxu0  ;;  %3796 = vadd.xlane.f32.xlu0 %v3795_v39 }
0x17cb   : > { %v5861_v56 = vadd.f32 %v3782_v17, %v3759_v26  ;;  %v3757_v57 = vadd.f32 %v3744_v42, %v3677_v28  ;;  %v3789_v60 = vsel %vm3788_vm2, %v5857_v55, 0.0  ;;  %v3801_v61 = vmul.f32 %v5857_v55, %v5857_v55 }
0x17cc   : > { %3790 = vadd.xlane.f32.xlu1 %v3789_v60  ;;  %v3811_v16 = vsel %vm3788_vm2, %v3803_v7, 0.0 }
0x17cd   : > { %v5867_v35 = vadd.f32 %v3772_v24, %v3757_v57  ;;  %v3805_v44 = vsel %vm3788_vm2, %v3801_v61, 0.0  ;;  %v3798_v1 = vsel %vm3788_vm2, %v5861_v56, 0.0  ;;  %v3804_v3 = vmul.f32 %v5861_v56, %v5861_v56 }
0x17ce   : > { %3806 = vadd.xlane.f32.xlu0 %v3805_v44 }
0x17cf   : > { %v3802_v45 = vmul.f32 %v5867_v35, %v5867_v35  ;;  %v3792_v4 = vsel %vm3788_vm2, %v5867_v35, 0.0  ;;  %v3814_v14 = vsel %vm3788_vm2, %v3804_v3, 0.0 }
0x17d0   : > { %3799 = vadd.xlane.f32.xlu1 %v3798_v1 }
0x17d1   : > { %v3808_v59 = vsel %vm3788_vm2, %v3802_v45, 0.0 }
0x17d2   : > { %3793 = vadd.xlane.f32.xlu0 %v3792_v4 }
0x17d4   : > { %3809 = vadd.xlane.f32.xlu1 %v3808_v59 }
0x17d6   : > { %3812 = vadd.xlane.f32.xlu0 %v3811_v16 }
0x17d8   : > { %3815 = vadd.xlane.f32.xlu1 %v3814_v14 }
0x1853   : > { %v3797_v38 = vpop.xlane.xlu0 %3796 }
0x1854   : > { %v3847_v19 = vsel %vm859_vm5, %v3797_v38, 0.0 }
0x1855   : > { %v3791_v37 = vpop.xlane.xlu1 %3790 }
0x1856   : > { %v3817_v11 = vsel %vm859_vm5, %v3791_v37, 0.0 }
0x1857   : > { %v3807_v20 = vpop.xlane.xlu0 %3806 }
0x1858   : > { %v3831_v15 = vsel %vm859_vm5, %v3807_v20, 0.0 }
0x1859   : > { %v3800_v54 = vpop.xlane.xlu1 %3799 }
0x185a   : > { %v3848_v10 = vsel %vm859_vm5, %v3800_v54, 0.0 }
0x185b   : > { %v3794_v5 = vpop.xlane.xlu0 %3793  ;;  %v3849_v21 = vadd.f32 %v3848_v10, %v3847_v19 }
0x185c   : > { %v3818_v30 = vsel %vm859_vm5, %v3794_v5, 0.0 }
0x185d   : > { %v3819_v12 = vadd.f32 %v3818_v30, %v3817_v11  ;;  %v3810_v36 = vpop.xlane.xlu1 %3809 }
0x185e   : > { %v3832_v18 = vsel %vm859_vm5, %v3810_v36, 0.0 }
0x185f   : > { %v3833_v31 = vadd.f32 %v3832_v18, %v3831_v15  ;;  %v3813_v25 = vpop.xlane.xlu0 %3812  ;;  %3820 = vadd.xlane.f32.xlu0 %v3819_v12 }
0x1860   : > { %v3861_v22 = vsel %vm859_vm5, %v3813_v25, 0.0 }
0x1861   : > { %3834 = vadd.xlane.f32.xlu1 %v3833_v31  ;;  %v3816_v24 = vpop.xlane.xlu1 %3815 }
0x1862   : > { %v3862_v13 = vsel %vm859_vm5, %v3816_v24, 0.0 }
0x1863   : > { %v3863_v62 = vadd.f32 %v3862_v13, %v3861_v22  ;;  %3850 = vadd.xlane.f32.xlu0 %v3849_v21 }
0x1865   : > { %3864 = vadd.xlane.f32.xlu1 %v3863_v62 }
0x1876   : > { %3910 = vperm.xlu1 %4746, %v5825_v2  }
0x1879   : > { %3914 = vperm.xlu0 %4747, %v5832_v8  }
0x187a   : > { %3918 = vperm.xlu1 %4746, %v5844_v9  }
0x187d   : > { %4748 = vset.pattern.permute.xlu0 %v5005_v6 }
0x187e   : > { %3922 = vperm.xlu1 %4746, %v5837_v63   ;;  %3930 = vperm.xlu0 %4748, %v5825_v2  }
0x1882   : > { %4749 = vset.pattern.permute.xlu1 %v5005_v6  ;;  %4750 = vset.pattern.permute.xlu0 %v4997_v0 }
0x1883   : > { %3934 = vperm.xlu1 %4749, %v5832_v8  }
0x1887   : > { %4751 = vset.pattern.permute.xlu1 %v4997_v0 }
0x18e8   : > { %v3821_v27 = vpop.xlane.xlu0 %3820 }
0x18e9   : > { %v3822_v53 = vrot.slane %v3821_v27, 4 }
0x18ea   : > { %v3835_v40 = vpop.xlane.xlu1 %3834 }
0x18eb   : > { %v3823_v47 = vadd.f32 %v3822_v53, %v3821_v27  ;;  %v3836_v41 = vrot.slane %v3835_v40, 4 }
0x18ec   : > { %v3851_v43 = vpop.xlane.xlu0 %3850 }
0x18ed   : > { %v3824_v46 = vrot.slane %v3823_v47, 2  ;;  %v3837_v49 = vadd.f32 %v3836_v41, %v3835_v40  ;;  %v3852_v33 = vrot.slane %v3851_v43, 4 }
0x18ee   : > { %v3865_v32 = vpop.xlane.xlu1 %3864 }
0x18ef   : > { %v3838_v50 = vrot.slane %v3837_v49, 2  ;;  %v3853_v2 = vadd.f32 %v3852_v33, %v3851_v43  ;;  %v3866_v23 = vrot.slane %v3865_v32, 4  ;;  %v3825_v34 = vadd.f32 %v3824_v46, %v3823_v47 }
0x18f1   : > { %v3854_v51 = vrot.slane %v3853_v2, 2  ;;  %v3867_v52 = vadd.f32 %v3866_v23, %v3865_v32  ;;  %v3826_v48 = vrot.slane %v3825_v34, 1  ;;  %v3839_v8 = vadd.f32 %v3838_v50, %v3837_v49 }
0x18f2   : > { %v3911_v12 = vpop.permute.xlu1 %3910 }
0x18f3   : > { %v3868_v58 = vrot.slane %v3867_v52, 2  ;;  %v3827_v0 = vadd.f32 %v3826_v48, %v3825_v34  ;;  %v3840_v28 = vrot.slane %v3839_v8, 1  ;;  %v3855_v26 = vadd.f32 %v3854_v51, %v3853_v2 }
0x18f4   : > { %v3915_v15 = vpop.permute.xlu0 %3914 }
0x18f5   : > { %4608 = vpush %v3827_v0  ;;  %v3841_v39 = vadd.f32 %v3840_v28, %v3839_v8  ;;  %v3856_v17 = vrot.slane %v3855_v26, 1  ;;  %v3869_v42 = vadd.f32 %v3868_v58, %v3867_v52 }
0x18f6   : > { %v3919_v36 = vpop.permute.xlu1 %3918 }
0x18f7   : > { %4610 = vpush %v3841_v39  ;;  %v3857_v57 = vadd.f32 %v3856_v17, %v3855_v26  ;;  %v3870_v60 = vrot.slane %v3869_v42, 1 }
0x18f9   : > { %4612 = vpush %v3857_v57  ;;  %v3871_v61 = vadd.f32 %v3870_v60, %v3869_v42  ;;  %v3931_v18 = vpop.permute.xlu0 %3930 }
0x18fa   : > { %v3923_v10 = vpop.permute.xlu1 %3922 }
0x18fb   : > { %4614 = vpush %v3871_v61 }
0x18fe   : > { %v3935_v31 = vpop.permute.xlu1 %3934 }
0x1926   : > { %s4609_s28 = spop %4608 }
0x1927   : > { %v3829_v44 = vstv %s4609_s28 }
0x1928   : > { %v3830_v1 = vmul.f32 0.002016129, %v3829_v44  ;;  %s4611_s14 = spop %4610 }
0x1929   : > { %v3843_v45 = vstv %s4611_s14 }
0x192a   : > { %v3845_v4 = vmul.f32 %v3830_v1, %v3830_v1  ;;  %v3844_v7 = vmul.f32 0.002016129, %v3843_v45  ;;  %3879 = vperm.xlu0 %4750, %v3830_v1   ;;  %s4613_s15 = spop %4612 }
0x192b   : > { %v3859_v59 = vstv %s4613_s15 }
0x192c   : > { %v3846_v3 = vsub.f32 %v3844_v7, %v3845_v4  ;;  %v3860_v16 = vmul.f32 0.002016129, %v3859_v59  ;;  %s4615_s16 = spop %4614 }
0x192d   : > { %v3873_v14 = vstv %s4615_s16 }
0x192e   : > { %v3891_v38 = vadd.f32 1e-05, %v3846_v3  ;;  %v3875_v37 = vmul.f32 %v3860_v16, %v3860_v16  ;;  %v3874_v20 = vmul.f32 0.002016129, %v3873_v14  ;;  %3884 = vperm.xlu1 %4751, %v3860_v16  }
0x1930   : > { %4874 = vrsqrt.f32 %v3891_v38  ;;  %v3876_v54 = vsub.f32 %v3874_v20, %v3875_v37 }
0x1932   : > { %v3892_v5 = vadd.f32 1e-05, %v3876_v54 }
0x1934   : > { %4876 = vrsqrt.f32 %v3892_v5 }
0x193d   : > { %v4875_v11 = vpop.eup %4874 }
0x193e   : > { %3897 = vperm.xlu1 %4751, %v4875_v11  }
0x1941   : > { %v4877_v30 = vpop.eup %4876 }
0x1942   : > { %3902 = vperm.xlu0 %4750, %v4877_v30   ;;  %4752 = vset.pattern.permute.xlu1 %v5005_v6 }
0x1943   : > { %3938 = vperm.xlu1 %4752, %v5844_v9  }
0x1946   : > { %4753 = vset.pattern.permute.xlu0 %v5005_v6 }
0x1947   : > { %3942 = vperm.xlu0 %4753, %v5837_v63  }
0x19a5   : > { %v3880_v25 = vpop.permute.xlu0 %3879 }
0x19a6   : > { %v3887_v21 = vsub.f32 %v5857_v55, %v3880_v25  ;;  %v3888_v24 = vsub.f32 %v5867_v35, %v3880_v25 }
0x19a9   : > { %v3885_v19 = vpop.permute.xlu1 %3884 }
0x19aa   : > { %v3889_v9 = vsub.f32 %v5855_v29, %v3885_v19  ;;  %v3890_v41 = vsub.f32 %v5861_v56, %v3885_v19 }
0x19b9   : > { %v3898_v22 = vpop.permute.xlu1 %3897 }
0x19ba   : > { %v3905_v13 = vmul.f32 %v3898_v22, %v3887_v21  ;;  %v3906_v62 = vmul.f32 %v3898_v22, %v3888_v24 }
0x19bc   : > { %v3925_v6 = vmul.f32 %v3911_v12, %v3905_v13  ;;  %v3926_v27 = vmul.f32 %v3915_v15, %v3906_v62 }
0x19bd   : > { %v3903_v63 = vpop.permute.xlu0 %3902 }
0x19be   : > { %v3945_v53 = vadd.f32 %v3931_v18, %v3925_v6  ;;  %v3946_v40 = vadd.f32 %v3935_v31, %v3926_v27  ;;  %v3907_v47 = vmul.f32 %v3903_v63, %v3889_v9  ;;  %v3939_v43 = vpop.permute.xlu1 %3938  ;;  %v3908_v55 = vmul.f32 %v3903_v63, %v3890_v41 }
0x19c0   : > { %v3949_v46 = vmul.f32 1.442695, %v3945_v53  ;;  %v3951_v49 = vmul.f32 1.442695, %v3946_v40  ;;  %v3927_v33 = vmul.f32 %v3919_v36, %v3907_v47  ;;  %v3928_v2 = vmul.f32 %v3923_v10, %v3908_v55 }
0x19c1   : > { %v3969_v23 = vmul.f32 0.5, %v3945_v53  ;;  %v3970_v34 = vmul.f32 0.5, %v3946_v40  ;;  %v3961_v52 = vand.u32 2147483647, %v3945_v53  ;;  %v3962_v58 = vand.u32 2147483647, %v3946_v40 }
0x19c2   : > { %4878 = vpow2.f32 %v3949_v46  ;;  %v3947_v35 = vadd.f32 %v3939_v43, %v3927_v33  ;;  %v3943_v50 = vpop.permute.xlu0 %3942  ;;  %vm3985_vm1 = vcmp.gt.f32.partialorder %v3945_v53, 0.0  ;;  %vm3986_vm6 = vcmp.gt.f32.partialorder %v3946_v40, 0.0 }
0x19c3   : > { %4880 = vpow2.f32 %v3951_v49  ;;  %v3948_v29 = vadd.f32 %v3943_v50, %v3928_v2  ;;  %v3973_v56 = vadd.f32 1.0, %v3969_v23  ;;  %v3974_v8 = vadd.f32 1.0, %v3970_v34 }
0x19c4   : > { %v3953_v32 = vmul.f32 1.442695, %v3947_v35  ;;  %v3971_v48 = vmul.f32 0.5, %v3947_v35  ;;  %vm3965_vm3 = vcmp.lt.f32.partialorder %v3961_v52, 0.001  ;;  %vm3987_vm8 = vcmp.gt.f32.partialorder %v3947_v35, 0.0 }
0x19c5   : > { %v3955_v51 = vmul.f32 1.442695, %v3948_v29  ;;  %v3977_v39 = vmul.f32 %v3973_v56, %v3945_v53  ;;  %v3978_v57 = vmul.f32 %v3974_v8, %v3946_v40  ;;  %v3963_v60 = vand.u32 2147483647, %v3947_v35 }
0x19c6   : > { %4882 = vpow2.f32 %v3953_v32  ;;  %v3975_v17 = vadd.f32 1.0, %v3971_v48  ;;  %v3972_v61 = vmul.f32 0.5, %v3948_v29  ;;  %vm3966_vm5 = vcmp.lt.f32.partialorder %v3962_v58, 0.001 }
0x19c7   : > { %4884 = vpow2.f32 %v3955_v51  ;;  %vm3967_vm7 = vcmp.lt.f32.partialorder %v3963_v60, 0.001  ;;  %v3964_v38 = vand.u32 2147483647, %v3948_v29  ;;  %vm3988_vm4 = vcmp.gt.f32.partialorder %v3948_v29, 0.0 }
0x19c8   : > { %v3979_v3 = vmul.f32 %v3975_v17, %v3947_v35  ;;  %v3976_v16 = vadd.f32 1.0, %v3972_v61 }
0x19c9   : > { %vm3968_vm9 = vcmp.lt.f32.partialorder %v3964_v38, 0.001 }
0x19ca   : > { %v3980_v5 = vmul.f32 %v3976_v16, %v3948_v29 }
0x19cf   : > { %v4879_v0 = vpop.eup %4878 }
0x19d0   : > { %v4881_v28 = vpop.eup %4880  ;;  %v4236_v26 = vadd.f32 -1.0, %v4879_v0 }
0x19d1   : > { %v4237_v42 = vadd.f32 -1.0, %v4881_v28 }
0x19d2   : > { %v3981_v44 = vsel %vm3965_vm3, %v3977_v39, %v4236_v26 }
0x19d3   : > { %v4883_v1 = vpop.eup %4882  ;;  %v3982_v45 = vsel %vm3966_vm5, %v3978_v57, %v4237_v42  ;;  %v3989_v4 = vsel %vm3985_vm1, %v3945_v53, %v3981_v44 }
0x19d4   : > { %v3990_v7 = vsel %vm3986_vm6, %v3946_v40, %v3982_v45  ;;  %3993 = vst.msk [vmem:[%s5914_s13] sm:$0xff] %vm3788_vm2, %v3989_v4  ;;  %v4238_v59 = vadd.f32 -1.0, %v4883_v1  ;;  %v4885_v20 = vpop.eup %4884 }
0x19d5   : > { %3994 = vst.msk [vmem:[%s5914_s13 + $0x8] sm:$0xff] %vm3788_vm2, %v3990_v7  ;;  %v4239_v54 = vadd.f32 -1.0, %v4885_v20 }
0x19d6   : > { %v3983_v14 = vsel %vm3967_vm7, %v3979_v3, %v4238_v59 }
0x19d7   : > { %v3991_v37 = vsel %vm3987_vm8, %v3947_v35, %v3983_v14  ;;  %v3984_v11 = vsel %vm3968_vm9, %v3980_v5, %v4239_v54 }
0x19d8   : > { %3995 = vst.msk [vmem:[%s5914_s13 + $0x10] sm:$0xff] %vm3788_vm2, %v3991_v37  ;;  %v3992_v30 = vsel %vm3988_vm4, %v3948_v29, %v3984_v11 }
0x19d9   : > { %3996 = vst.msk [vmem:[%s5914_s13 + $0x18] sm:$0xff] %vm3788_vm2, %v3992_v30 }
0x19da PF: > { %s18_s21 = sadd.s32 1, %s4990_s21  }
0x19db   : > { %p15_p2 = scmp.ge.s32.totalorder %s18_s21, 4  }
0x19dd   :  { %17 = sbr.rel (!%p15_p2) target bundleno = 2 (0x2), region = 101 }
0x19e2   :  { %4018 = vsyncpa [#allocation4], 1 }
0x19e3   :  { %4020 = vsyncpa [#allocation4 + $0x1], 1 }
0x19e4   :  { %4021 = vsyncpa [#allocation6], 1 }

</bundles_post_ra>
